<compile_context>
chip_gen: v5e
topology: v5e:2x2
jax: 0.10.0
libtpu: 0.0.40
codegen_flags: <defaults>
</compile_context>

<pallas_src>
import math

import jax
import jax.numpy as jnp
from jax.experimental import pallas as pl
from jax.experimental.pallas import tpu as pltpu

NEG_INF = -1e9


def _make_kernel(H, dk, tile_T, T, S, eps=1e-6):
    inv_sqrt_dk = 1.0 / math.sqrt(dk)

    def layer_norm(v, g, b):
        # v: (rows, D) float32; statistics stay in f32.
        mean = jnp.mean(v, axis=-1, keepdims=True)
        var = jnp.mean(jnp.square(v - mean), axis=-1, keepdims=True)
        return (v - mean) * jax.lax.rsqrt(var + eps) * g + b

    def attention(q_bf, k_scr, v_scr, bias, wo_ref, bo_ref):
        # q_bf: (tile_T, D) bf16; k_scr/v_scr: VMEM refs (S_kv, D) bf16;
        # bias: (tile_T, S_kv) f32 additive mask.
        # Per-head output is folded straight into the Wo product so only a
        # single f32 (tile_T, D) accumulator stays live across heads (no
        # lane-concat, bounded vreg live ranges).
        # TODO(synk): for very large H switch to lax.fori_loop to bound code size.
        acc = jnp.zeros((q_bf.shape[0], wo_ref.shape[-1]), jnp.float32)
        for h in range(H):
            qh = q_bf[:, h * dk:(h + 1) * dk]
            kh = k_scr[:, h * dk:(h + 1) * dk]
            vh = v_scr[:, h * dk:(h + 1) * dk]
            sc = jnp.einsum('td,sd->ts', qh, kh,
                            preferred_element_type=jnp.float32) * inv_sqrt_dk
            sc = sc + bias                      # additive -1e9 mask bias (f32)
            sc = sc - jnp.max(sc, axis=-1, keepdims=True)
            p = jnp.exp(sc)
            inv_l = pl.reciprocal(jnp.sum(p, axis=-1, keepdims=True), approx=True)
            oh = jnp.dot(p.astype(jnp.bfloat16), vh,
                         preferred_element_type=jnp.float32) * inv_l
            acc = acc + jnp.dot(oh.astype(jnp.bfloat16),
                                wo_ref[h * dk:(h + 1) * dk, :],
                                preferred_element_type=jnp.float32)
        return acc + bo_ref[...]

    def kernel(src_len_ref,
               x_ref, mem_ref,
               sa_wq, sa_wk, sa_wv, sa_wo, sa_bq, sa_bk, sa_bv, sa_bo,
               ca_wq, ca_wk, ca_wv, ca_wo, ca_bq, ca_bk, ca_bv, ca_bo,
               ff_w1, ff_b1, ff_w2, ff_b2,
               ln1_g, ln1_b, ln2_g, ln2_b, ln3_g, ln3_b,
               o_ref,
               sa_k_scr, sa_v_scr, ca_k_scr, ca_v_scr):
        b = pl.program_id(0)
        qi = pl.program_id(1)

        # ---- per-batch (q-tile-invariant) K/V projections: only on qi == 0 ----
        @pl.when(qi == 0)
        def _():
            xn_full = layer_norm(x_ref[...].astype(jnp.float32),
                                 ln1_g[...], ln1_b[...]).astype(jnp.bfloat16)
            sa_k_scr[...] = (jnp.dot(xn_full, sa_wk[...],
                                     preferred_element_type=jnp.float32)
                             + sa_bk[...]).astype(jnp.bfloat16)
            sa_v_scr[...] = (jnp.dot(xn_full, sa_wv[...],
                                     preferred_element_type=jnp.float32)
                             + sa_bv[...]).astype(jnp.bfloat16)
            mem = mem_ref[...]                                   # (S, D) bf16
            ca_k_scr[...] = (jnp.dot(mem, ca_wk[...],
                                     preferred_element_type=jnp.float32)
                             + ca_bk[...]).astype(jnp.bfloat16)
            ca_v_scr[...] = (jnp.dot(mem, ca_wv[...],
                                     preferred_element_type=jnp.float32)
                             + ca_bv[...]).astype(jnp.bfloat16)

        # ---- q tile of the residual stream, sliced in-kernel (no dup input) ----
        q_start = pl.multiple_of(qi * tile_T, tile_T)
        x = x_ref[pl.ds(q_start, tile_T), :].astype(jnp.float32)   # (tile_T, D)

        # ---- masks built in-kernel (no HBM mask traffic) ----
        row_ids = q_start + jax.lax.broadcasted_iota(jnp.int32, (tile_T, T), 0)
        col_ids = jax.lax.broadcasted_iota(jnp.int32, (tile_T, T), 1)
        tgt_bias = jnp.where(col_ids <= row_ids, 0.0, NEG_INF).astype(jnp.float32)

        src_len = src_len_ref[b]
        key_ids = jax.lax.broadcasted_iota(jnp.int32, (tile_T, S), 1)
        src_bias = jnp.where(key_ids < src_len, 0.0, NEG_INF).astype(jnp.float32)

        # ---- Sublayer 1: pre-norm self-attention + residual ----
        xn = layer_norm(x, ln1_g[...], ln1_b[...]).astype(jnp.bfloat16)
        q = (jnp.dot(xn, sa_wq[...], preferred_element_type=jnp.float32)
             + sa_bq[...]).astype(jnp.bfloat16)
        x = x + attention(q, sa_k_scr, sa_v_scr, tgt_bias, sa_wo, sa_bo)

        # ---- Sublayer 2: pre-norm cross-attention over memory + residual ----
        xn = layer_norm(x, ln2_g[...], ln2_b[...]).astype(jnp.bfloat16)
        q = (jnp.dot(xn, ca_wq[...], preferred_element_type=jnp.float32)
             + ca_bq[...]).astype(jnp.bfloat16)
        x = x + attention(q, ca_k_scr, ca_v_scr, src_bias, ca_wo, ca_bo)

        # ---- Sublayer 3: pre-norm position-wise feed-forward + residual ----
        # TODO(synk): stream over F (pltpu.emit_pipeline) for very large D*F on v7x.
        xn = layer_norm(x, ln3_g[...], ln3_b[...]).astype(jnp.bfloat16)
        h1 = jnp.maximum(
            jnp.dot(xn, ff_w1[...], preferred_element_type=jnp.float32) + ff_b1[...],
            0.0)
        x = x + jnp.dot(h1.astype(jnp.bfloat16), ff_w2[...],
                        preferred_element_type=jnp.float32) + ff_b2[...]

        o_ref[...] = x.astype(o_ref.dtype)

    return kernel


def decoder_layer_pallas(x, memory, src_len, params, H, *, tile_T=None):
    B, T, D = x.shape
    S = memory.shape[1]
    dk = D // H
    F = params['ff_w1'].shape[1]
    if tile_T is None:
        # Biggest tile that amortizes per-step overhead; 256 is a good default
        # on v6e/v7x once the weights are single-buffered.
        tile_T = T if T <= 256 else (256 if T % 256 == 0 else 128)
    assert T % tile_T == 0, "T must be divisible by the query tile size"
    num_q_tiles = T // tile_T

    # bf16 activations in HBM / VMEM; residual stream stays f32 in-kernel.
    x_bf = x.astype(jnp.bfloat16)
    mem_bf = memory.astype(jnp.bfloat16)

    weights = [
        params['sa_wq'], params['sa_wk'], params['sa_wv'], params['sa_wo'],
        params['sa_bq'], params['sa_bk'], params['sa_bv'], params['sa_bo'],
        params['ca_wq'], params['ca_wk'], params['ca_wv'], params['ca_wo'],
        params['ca_bq'], params['ca_bk'], params['ca_bv'], params['ca_bo'],
        params['ff_w1'], params['ff_b1'], params['ff_w2'], params['ff_b2'],
        params['ln1_g'], params['ln1_b'], params['ln2_g'], params['ln2_b'],
        params['ln3_g'], params['ln3_b'],
    ]

    # ---- VMEM budget with real dtypes, clamped to the device's capacity ----
    weight_bytes = sum(int(w.size) * w.dtype.itemsize for w in weights)   # single-buffered
    act_vmem = 2 * ((T * D + S * D) * 2 + tile_T * D * 4)   # pipelined x/mem/out blocks (2 bufs)
    scratch_vmem = (2 * T + 2 * S) * D * 2                  # persistent bf16 K/V scratch
    live_vmem = (6 * tile_T * D + 2 * tile_T * max(T, S) + 2 * tile_T * F) * 4
    vmem_need = weight_bytes + act_vmem + scratch_vmem + live_vmem + (4 << 20)
    try:
        cap = int(pltpu.get_tpu_info().vmem_capacity_bytes)
    except Exception:
        cap = 64 << 20
    vmem_limit = int(min(max(vmem_need, 32 << 20), cap - (8 << 20)))

    kernel = _make_kernel(H, dk, tile_T, T, S)

    def build(single_buffer_weights):
        def shared_spec(arr):
            nd = arr.ndim
            idx = lambda b, qi, sl, nd=nd: (0,) * nd
            if single_buffer_weights:
                # Grid-invariant weight blocks: double-buffering buys nothing.
                return pl.BlockSpec(tuple(arr.shape), idx,
                                    pipeline_mode=pl.Buffered(1))
            return pl.BlockSpec(tuple(arr.shape), idx)

        in_specs = ([
            pl.BlockSpec((None, T, D), lambda b, qi, sl: (b, 0, 0)),   # x (full seq)
            pl.BlockSpec((None, S, D), lambda b, qi, sl: (b, 0, 0)),   # memory
        ] + [shared_spec(w) for w in weights])
        out_spec = pl.BlockSpec((None, tile_T, D), lambda b, qi, sl: (b, qi, 0))

        return pl.pallas_call(
            kernel,
            out_shape=jax.ShapeDtypeStruct((B, T, D), jnp.float32),
            grid_spec=pltpu.PrefetchScalarGridSpec(
                num_scalar_prefetch=1,
                grid=(B, num_q_tiles),
                in_specs=in_specs,
                out_specs=out_spec,
                scratch_shapes=[
                    pltpu.VMEM((T, D), jnp.bfloat16),   # self-attn K (per batch)
                    pltpu.VMEM((T, D), jnp.bfloat16),   # self-attn V
                    pltpu.VMEM((S, D), jnp.bfloat16),   # cross-attn K
                    pltpu.VMEM((S, D), jnp.bfloat16),   # cross-attn V
                ]),
            compiler_params=pltpu.CompilerParams(
                # B parallel (megacore / 2-TC), q-tile axis arbitrary so the
                # K/V scratch computed at qi == 0 is reused by later tiles.
                dimension_semantics=("parallel", "arbitrary"),
                vmem_limit_bytes=vmem_limit),
        )

    args = (src_len.astype(jnp.int32), x_bf, mem_bf, *weights)
    try:
        return build(True)(*args)
    except Exception:
        # Fallback for jax versions without BlockSpec pipeline_mode / Buffered.
        return build(False)(*args)


def init_params(key, D, H, F):
    keys = list(jax.random.split(key, 16))
    it = iter(keys)

    def lin(k, din, dout):
        kw, kb = jax.random.split(k)
        w = jax.random.normal(kw, (din, dout), jnp.float32) * (1.0 / math.sqrt(din))
        b = jax.random.normal(kb, (dout,), jnp.float32) * 0.02
        return w, b

    p, full = {}, {}
    for name in ('sa', 'ca'):
        wq, bq = lin(next(it), D, D)
        wk, bk = lin(next(it), D, D)
        wv, bv = lin(next(it), D, D)
        wo, bo = lin(next(it), D, D)
        # Kernel consumes bf16 weights (MXU operands); the f32 reference uses
        # the same quantized values so the check isolates kernel math.
        wq_q, wk_q, wv_q, wo_q = (w.astype(jnp.bfloat16) for w in (wq, wk, wv, wo))
        full[name] = (wq_q.astype(jnp.float32), bq, wk_q.astype(jnp.float32), bk,
                      wv_q.astype(jnp.float32), bv, wo_q.astype(jnp.float32), bo)
        p[f'{name}_wq'] = wq_q
        p[f'{name}_wk'] = wk_q
        p[f'{name}_wv'] = wv_q
        p[f'{name}_wo'] = wo_q
        p[f'{name}_bq'] = bq.reshape(1, D)
        p[f'{name}_bk'] = bk.reshape(1, D)
        p[f'{name}_bv'] = bv.reshape(1, D)
        p[f'{name}_bo'] = bo.reshape(1, D)

    w1, b1 = lin(next(it), D, F)
    w2, b2 = lin(next(it), F, D)
    w1_q, w2_q = w1.astype(jnp.bfloat16), w2.astype(jnp.bfloat16)
    full['ff'] = (w1_q.astype(jnp.float32), b1, w2_q.astype(jnp.float32), b2)
    p['ff_w1'] = w1_q
    p['ff_b1'] = b1.reshape(1, F)
    p['ff_w2'] = w2_q
    p['ff_b2'] = b2.reshape(1, D)

    for i in (1, 2, 3):
        kg, kb = jax.random.split(next(it))
        p[f'ln{i}_g'] = 1.0 + 0.1 * jax.random.normal(kg, (1, D), jnp.float32)
        p[f'ln{i}_b'] = 0.05 * jax.random.normal(kb, (1, D), jnp.float32)
    return p, full


def ref_decoder_layer(x, memory, tgt_mask, src_mask, full, p, H):
    D = x.shape[-1]
    dk = D // H

    def ln(v, g, b):
        m = v.mean(-1, keepdims=True)
        var = ((v - m) ** 2).mean(-1, keepdims=True)
        return (v - m) / jnp.sqrt(var + 1e-6) * g + b

    def mha(xq, xkv, mask, w):
        wq, bq, wk, bk, wv, bv, wo, bo = w
        B_, T_, _ = xq.shape
        S_ = xkv.shape[1]
        q = (xq @ wq + bq).reshape(B_, T_, H, dk).transpose(0, 2, 1, 3)
        k = (xkv @ wk + bk).reshape(B_, S_, H, dk).transpose(0, 2, 1, 3)
        v = (xkv @ wv + bv).reshape(B_, S_, H, dk).transpose(0, 2, 1, 3)
        sc = jnp.einsum('bhtd,bhsd->bhts', q, k) / math.sqrt(dk)
        sc = jnp.where(mask[:, None] > 0, sc, -1e9)
        a = jax.nn.softmax(sc, axis=-1)
        o = jnp.einsum('bhts,bhsd->bhtd', a, v).transpose(0, 2, 1, 3).reshape(B_, T_, D)
        return o @ wo + bo

    xn = ln(x, p['ln1_g'], p['ln1_b'])
    x = x + mha(xn, xn, tgt_mask, full['sa'])
    xn = ln(x, p['ln2_g'], p['ln2_b'])
    x = x + mha(xn, memory, src_mask, full['ca'])
    xn = ln(x, p['ln3_g'], p['ln3_b'])
    w1, b1, w2, b2 = full['ff']
    x = x + jnp.maximum(xn @ w1 + b1, 0.0) @ w2 + b2
    return x


if __name__ == "__main__":
    # T=16 with tile_T=8 exercises the multi-q-tile path (K/V scratch computed
    # at qi==0 and reused at qi==1) plus the cross-tile causal mask.
    B, T, S, D, H, F = 2, 16, 8, 32, 4, 64
    key = jax.random.PRNGKey(0)
    kx, km, kp = jax.random.split(key, 3)

    x = jax.random.normal(kx, (B, T, D), jnp.float32)
    memory = jax.random.normal(km, (B, S, D), jnp.float32)

    # Causal target mask; source padding (batch 1 has 2 padded key positions).
    src_len = jnp.array([S, S - 2], dtype=jnp.int32)

    params, full = init_params(kp, D, H, F)

    out = decoder_layer_pallas(x, memory, src_len, params, H, tile_T=8)
    out = jax.block_until_ready(out)

    # Reference (f32 compute on the same bf16-quantized activations/weights the
    # kernel consumes, with dense masks equivalent to the in-kernel ones).
    x_q = x.astype(jnp.bfloat16).astype(jnp.float32)
    mem_q = memory.astype(jnp.bfloat16).astype(jnp.float32)
    tgt_mask = jnp.broadcast_to(jnp.tril(jnp.ones((T, T), jnp.float32)), (B, T, T))
    src_mask = (jnp.arange(S)[None, None, :] < src_len[:, None, None]).astype(jnp.float32)
    src_mask = jnp.broadcast_to(src_mask, (B, T, S))
    ref = ref_decoder_layer(x_q, mem_q, tgt_mask, src_mask, full, params, H)

    assert out.shape == (B, T, D)
    err = float(jnp.max(jnp.abs(out - ref)))
    assert jnp.allclose(out, ref, atol=2e-2, rtol=2e-2), f"max abs err {err}"

    print("KERNEL_OK")
</pallas_src>

<mosaic_0001>
module attributes {stable_mosaic.version = 11 : i64} {
  func.func @kernel(%arg0: i32, %arg1: i32, %arg2: memref<2xi32, #tpu.memory_space<smem>>, %arg3: memref<1x16x32xbf16, #tpu.memory_space<vmem>>, %arg4: memref<1x8x32xbf16, #tpu.memory_space<vmem>>, %arg5: memref<32x32xbf16, #tpu.memory_space<vmem>>, %arg6: memref<32x32xbf16, #tpu.memory_space<vmem>>, %arg7: memref<32x32xbf16, #tpu.memory_space<vmem>>, %arg8: memref<32x32xbf16, #tpu.memory_space<vmem>>, %arg9: memref<1x32xf32, #tpu.memory_space<vmem>>, %arg10: memref<1x32xf32, #tpu.memory_space<vmem>>, %arg11: memref<1x32xf32, #tpu.memory_space<vmem>>, %arg12: memref<1x32xf32, #tpu.memory_space<vmem>>, %arg13: memref<32x32xbf16, #tpu.memory_space<vmem>>, %arg14: memref<32x32xbf16, #tpu.memory_space<vmem>>, %arg15: memref<32x32xbf16, #tpu.memory_space<vmem>>, %arg16: memref<32x32xbf16, #tpu.memory_space<vmem>>, %arg17: memref<1x32xf32, #tpu.memory_space<vmem>>, %arg18: memref<1x32xf32, #tpu.memory_space<vmem>>, %arg19: memref<1x32xf32, #tpu.memory_space<vmem>>, %arg20: memref<1x32xf32, #tpu.memory_space<vmem>>, %arg21: memref<32x64xbf16, #tpu.memory_space<vmem>>, %arg22: memref<1x64xf32, #tpu.memory_space<vmem>>, %arg23: memref<64x32xbf16, #tpu.memory_space<vmem>>, %arg24: memref<1x32xf32, #tpu.memory_space<vmem>>, %arg25: memref<1x32xf32, #tpu.memory_space<vmem>>, %arg26: memref<1x32xf32, #tpu.memory_space<vmem>>, %arg27: memref<1x32xf32, #tpu.memory_space<vmem>>, %arg28: memref<1x32xf32, #tpu.memory_space<vmem>>, %arg29: memref<1x32xf32, #tpu.memory_space<vmem>>, %arg30: memref<1x32xf32, #tpu.memory_space<vmem>>, %arg31: memref<1x8x32xf32, #tpu.memory_space<vmem>>, %arg32: memref<16x32xbf16, #tpu.memory_space<vmem>>, %arg33: memref<16x32xbf16, #tpu.memory_space<vmem>>, %arg34: memref<8x32xbf16, #tpu.memory_space<vmem>>, %arg35: memref<8x32xbf16, #tpu.memory_space<vmem>>) attributes {dimension_semantics = [#tpu.dimension_semantics<parallel>, #tpu.dimension_semantics<arbitrary>], iteration_bounds = array<i64: 2, 2>, scalar_prefetch = 1 : i64, scratch_operands = 4 : i64, tpu.core_type = #tpu.core_type<tc>, window_params = [{transform_indices = @transform_0, window_bounds = array<i64: 1, 16, 32>}, {transform_indices = @transform_1, window_bounds = array<i64: 1, 8, 32>}, {pipeline_mode = #tpu.pipeline_mode<synchronous>, transform_indices = @transform_2, window_bounds = array<i64: 32, 32>}, {pipeline_mode = #tpu.pipeline_mode<synchronous>, transform_indices = @transform_3, window_bounds = array<i64: 32, 32>}, {pipeline_mode = #tpu.pipeline_mode<synchronous>, transform_indices = @transform_4, window_bounds = array<i64: 32, 32>}, {pipeline_mode = #tpu.pipeline_mode<synchronous>, transform_indices = @transform_5, window_bounds = array<i64: 32, 32>}, {pipeline_mode = #tpu.pipeline_mode<synchronous>, transform_indices = @transform_6, window_bounds = array<i64: 1, 32>}, {pipeline_mode = #tpu.pipeline_mode<synchronous>, transform_indices = @transform_7, window_bounds = array<i64: 1, 32>}, {pipeline_mode = #tpu.pipeline_mode<synchronous>, transform_indices = @transform_8, window_bounds = array<i64: 1, 32>}, {pipeline_mode = #tpu.pipeline_mode<synchronous>, transform_indices = @transform_9, window_bounds = array<i64: 1, 32>}, {pipeline_mode = #tpu.pipeline_mode<synchronous>, transform_indices = @transform_10, window_bounds = array<i64: 32, 32>}, {pipeline_mode = #tpu.pipeline_mode<synchronous>, transform_indices = @transform_11, window_bounds = array<i64: 32, 32>}, {pipeline_mode = #tpu.pipeline_mode<synchronous>, transform_indices = @transform_12, window_bounds = array<i64: 32, 32>}, {pipeline_mode = #tpu.pipeline_mode<synchronous>, transform_indices = @transform_13, window_bounds = array<i64: 32, 32>}, {pipeline_mode = #tpu.pipeline_mode<synchronous>, transform_indices = @transform_14, window_bounds = array<i64: 1, 32>}, {pipeline_mode = #tpu.pipeline_mode<synchronous>, transform_indices = @transform_15, window_bounds = array<i64: 1, 32>}, {pipeline_mode = #tpu.pipeline_mode<synchronous>, transform_indices = @transform_16, window_bounds = array<i64: 1, 32>}, {pipeline_mode = #tpu.pipeline_mode<synchronous>, transform_indices = @transform_17, window_bounds = array<i64: 1, 32>}, {pipeline_mode = #tpu.pipeline_mode<synchronous>, transform_indices = @transform_18, window_bounds = array<i64: 32, 64>}, {pipeline_mode = #tpu.pipeline_mode<synchronous>, transform_indices = @transform_19, window_bounds = array<i64: 1, 64>}, {pipeline_mode = #tpu.pipeline_mode<synchronous>, transform_indices = @transform_20, window_bounds = array<i64: 64, 32>}, {pipeline_mode = #tpu.pipeline_mode<synchronous>, transform_indices = @transform_21, window_bounds = array<i64: 1, 32>}, {pipeline_mode = #tpu.pipeline_mode<synchronous>, transform_indices = @transform_22, window_bounds = array<i64: 1, 32>}, {pipeline_mode = #tpu.pipeline_mode<synchronous>, transform_indices = @transform_23, window_bounds = array<i64: 1, 32>}, {pipeline_mode = #tpu.pipeline_mode<synchronous>, transform_indices = @transform_24, window_bounds = array<i64: 1, 32>}, {pipeline_mode = #tpu.pipeline_mode<synchronous>, transform_indices = @transform_25, window_bounds = array<i64: 1, 32>}, {pipeline_mode = #tpu.pipeline_mode<synchronous>, transform_indices = @transform_26, window_bounds = array<i64: 1, 32>}, {pipeline_mode = #tpu.pipeline_mode<synchronous>, transform_indices = @transform_27, window_bounds = array<i64: 1, 32>}, {transform_indices = @transform_28, window_bounds = array<i64: 1, 8, 32>}]} {
    %c0_i32 = arith.constant 0 : i32
    %0 = arith.cmpi eq, %arg1, %c0_i32 : i32
    %1 = arith.extui %0 : i1 to i32
    %c0_i32_0 = arith.constant 0 : i32
    %2 = arith.cmpi ne, %1, %c0_i32_0 : i32
    scf.if %2 {
      %c0_155 = arith.constant 0 : index
      %c0_156 = arith.constant 0 : index
      %c0_157 = arith.constant 0 : index
      %323 = vector.load %arg3[%c0_155, %c0_156, %c0_157] : memref<1x16x32xbf16, #tpu.memory_space<vmem>>, vector<1x16x32xbf16>
      %324 = vector.shape_cast %323 : vector<1x16x32xbf16> to vector<16x32xbf16>
      %325 = arith.extf %324 : vector<16x32xbf16> to vector<16x32xf32>
      %c0_158 = arith.constant 0 : index
      %c0_159 = arith.constant 0 : index
      %326 = vector.load %arg25[%c0_158, %c0_159] : memref<1x32xf32, #tpu.memory_space<vmem>>, vector<1x32xf32>
      %c0_160 = arith.constant 0 : index
      %c0_161 = arith.constant 0 : index
      %327 = vector.load %arg26[%c0_160, %c0_161] : memref<1x32xf32, #tpu.memory_space<vmem>>, vector<1x32xf32>
      %cst_162 = arith.constant dense<0.000000e+00> : vector<16xf32>
      %328 = vector.multi_reduction <add>, %325, %cst_162 [1] : vector<16x32xf32> to vector<16xf32>
      %329 = vector.shape_cast %328 : vector<16xf32> to vector<16x1xf32>
      %cst_163 = arith.constant 3.200000e+01 : f32
      %330 = vector.broadcast %cst_163 : f32 to vector<16x1xf32>
      %331 = arith.divf %329, %330 : vector<16x1xf32>
      %332 = vector.broadcast %331 : vector<16x1xf32> to vector<16x32xf32>
      %333 = arith.subf %325, %332 : vector<16x32xf32>
      %334 = arith.mulf %333, %333 : vector<16x32xf32>
      %cst_164 = arith.constant dense<0.000000e+00> : vector<16xf32>
      %335 = vector.multi_reduction <add>, %334, %cst_164 [1] : vector<16x32xf32> to vector<16xf32>
      %336 = vector.shape_cast %335 : vector<16xf32> to vector<16x1xf32>
      %cst_165 = arith.constant 3.200000e+01 : f32
      %337 = vector.broadcast %cst_165 : f32 to vector<16x1xf32>
      %338 = arith.divf %336, %337 : vector<16x1xf32>
      %339 = vector.broadcast %331 : vector<16x1xf32> to vector<16x32xf32>
      %340 = arith.subf %325, %339 : vector<16x32xf32>
      %cst_166 = arith.constant 9.99999997E-7 : f32
      %341 = vector.broadcast %cst_166 : f32 to vector<16x1xf32>
      %342 = arith.addf %338, %341 : vector<16x1xf32>
      %343 = math.rsqrt %342 : vector<16x1xf32>
      %344 = vector.broadcast %343 : vector<16x1xf32> to vector<16x32xf32>
      %345 = arith.mulf %340, %344 : vector<16x32xf32>
      %346 = vector.broadcast %326 : vector<1x32xf32> to vector<16x32xf32>
      %347 = arith.mulf %345, %346 : vector<16x32xf32>
      %348 = vector.broadcast %327 : vector<1x32xf32> to vector<16x32xf32>
      %349 = arith.addf %347, %348 : vector<16x32xf32>
      %350 = arith.truncf %349 : vector<16x32xf32> to vector<16x32xbf16>
      %c0_167 = arith.constant 0 : index
      %c0_168 = arith.constant 0 : index
      %351 = vector.load %arg6[%c0_167, %c0_168] : memref<32x32xbf16, #tpu.memory_space<vmem>>, vector<32x32xbf16>
      %cst_169 = arith.constant dense<0.000000e+00> : vector<16x32xf32>
      %352 = tpu.matmul %350, %351, %cst_169 {dimension_numbers = #tpu.dot_dimension_numbers<[1], [0], [0], [1], [0, 0, 1, 1], [], []>} : vector<16x32xbf16>, vector<32x32xbf16>, vector<16x32xf32> -> vector<16x32xf32>
      %c0_170 = arith.constant 0 : index
      %c0_171 = arith.constant 0 : index
      %353 = vector.load %arg10[%c0_170, %c0_171] : memref<1x32xf32, #tpu.memory_space<vmem>>, vector<1x32xf32>
      %354 = vector.broadcast %353 : vector<1x32xf32> to vector<16x32xf32>
      %355 = arith.addf %352, %354 : vector<16x32xf32>
      %356 = arith.truncf %355 : vector<16x32xf32> to vector<16x32xbf16>
      %c0_172 = arith.constant 0 : index
      %c0_173 = arith.constant 0 : index
      %357 = vector.load %arg32[%c0_172, %c0_173] : memref<16x32xbf16, #tpu.memory_space<vmem>>, vector<16x32xbf16>
      tpu.vector_store %arg32[%c0_172, %c0_173], %356 {strides = array<i32>} : memref<16x32xbf16, #tpu.memory_space<vmem>>, vector<16x32xbf16>,
      %c0_174 = arith.constant 0 : index
      %c0_175 = arith.constant 0 : index
      %358 = vector.load %arg7[%c0_174, %c0_175] : memref<32x32xbf16, #tpu.memory_space<vmem>>, vector<32x32xbf16>
      %cst_176 = arith.constant dense<0.000000e+00> : vector<16x32xf32>
      %359 = tpu.matmul %350, %358, %cst_176 {dimension_numbers = #tpu.dot_dimension_numbers<[1], [0], [0], [1], [0, 0, 1, 1], [], []>} : vector<16x32xbf16>, vector<32x32xbf16>, vector<16x32xf32> -> vector<16x32xf32>
      %c0_177 = arith.constant 0 : index
      %c0_178 = arith.constant 0 : index
      %360 = vector.load %arg11[%c0_177, %c0_178] : memref<1x32xf32, #tpu.memory_space<vmem>>, vector<1x32xf32>
      %361 = vector.broadcast %360 : vector<1x32xf32> to vector<16x32xf32>
      %362 = arith.addf %359, %361 : vector<16x32xf32>
      %363 = arith.truncf %362 : vector<16x32xf32> to vector<16x32xbf16>
      %c0_179 = arith.constant 0 : index
      %c0_180 = arith.constant 0 : index
      %364 = vector.load %arg33[%c0_179, %c0_180] : memref<16x32xbf16, #tpu.memory_space<vmem>>, vector<16x32xbf16>
      tpu.vector_store %arg33[%c0_179, %c0_180], %363 {strides = array<i32>} : memref<16x32xbf16, #tpu.memory_space<vmem>>, vector<16x32xbf16>,
      %c0_181 = arith.constant 0 : index
      %c0_182 = arith.constant 0 : index
      %c0_183 = arith.constant 0 : index
      %365 = vector.load %arg4[%c0_181, %c0_182, %c0_183] : memref<1x8x32xbf16, #tpu.memory_space<vmem>>, vector<1x8x32xbf16>
      %366 = vector.shape_cast %365 : vector<1x8x32xbf16> to vector<8x32xbf16>
      %c0_184 = arith.constant 0 : index
      %c0_185 = arith.constant 0 : index
      %367 = vector.load %arg14[%c0_184, %c0_185] : memref<32x32xbf16, #tpu.memory_space<vmem>>, vector<32x32xbf16>
      %cst_186 = arith.constant dense<0.000000e+00> : vector<8x32xf32>
      %368 = tpu.matmul %366, %367, %cst_186 {dimension_numbers = #tpu.dot_dimension_numbers<[1], [0], [0], [1], [0, 0, 1, 1], [], []>} : vector<8x32xbf16>, vector<32x32xbf16>, vector<8x32xf32> -> vector<8x32xf32>
      %c0_187 = arith.constant 0 : index
      %c0_188 = arith.constant 0 : index
      %369 = vector.load %arg18[%c0_187, %c0_188] : memref<1x32xf32, #tpu.memory_space<vmem>>, vector<1x32xf32>
      %370 = vector.broadcast %369 : vector<1x32xf32> to vector<8x32xf32>
      %371 = arith.addf %368, %370 : vector<8x32xf32>
      %372 = arith.truncf %371 : vector<8x32xf32> to vector<8x32xbf16>
      %c0_189 = arith.constant 0 : index
      %c0_190 = arith.constant 0 : index
      %373 = vector.load %arg34[%c0_189, %c0_190] : memref<8x32xbf16, #tpu.memory_space<vmem>>, vector<8x32xbf16>
      tpu.vector_store %arg34[%c0_189, %c0_190], %372 {strides = array<i32>} : memref<8x32xbf16, #tpu.memory_space<vmem>>, vector<8x32xbf16>,
      %c0_191 = arith.constant 0 : index
      %c0_192 = arith.constant 0 : index
      %374 = vector.load %arg15[%c0_191, %c0_192] : memref<32x32xbf16, #tpu.memory_space<vmem>>, vector<32x32xbf16>
      %cst_193 = arith.constant dense<0.000000e+00> : vector<8x32xf32>
      %375 = tpu.matmul %366, %374, %cst_193 {dimension_numbers = #tpu.dot_dimension_numbers<[1], [0], [0], [1], [0, 0, 1, 1], [], []>} : vector<8x32xbf16>, vector<32x32xbf16>, vector<8x32xf32> -> vector<8x32xf32>
      %c0_194 = arith.constant 0 : index
      %c0_195 = arith.constant 0 : index
      %376 = vector.load %arg19[%c0_194, %c0_195] : memref<1x32xf32, #tpu.memory_space<vmem>>, vector<1x32xf32>
      %377 = vector.broadcast %376 : vector<1x32xf32> to vector<8x32xf32>
      %378 = arith.addf %375, %377 : vector<8x32xf32>
      %379 = arith.truncf %378 : vector<8x32xf32> to vector<8x32xbf16>
      %c0_196 = arith.constant 0 : index
      %c0_197 = arith.constant 0 : index
      %380 = vector.load %arg35[%c0_196, %c0_197] : memref<8x32xbf16, #tpu.memory_space<vmem>>, vector<8x32xbf16>
      tpu.vector_store %arg35[%c0_196, %c0_197], %379 {strides = array<i32>} : memref<8x32xbf16, #tpu.memory_space<vmem>>, vector<8x32xbf16>,
    } else {
    }
    %c8_i32 = arith.constant 8 : i32
    %3 = arith.muli %arg1, %c8_i32 : i32
    %4 = tpu.assume_multiple %3, 8 : i32
    %c0 = arith.constant 0 : index
    %5 = arith.index_cast %4 : i32 to index
    %c0_1 = arith.constant 0 : index
    %6 = vector.load %arg3[%c0, %5, %c0_1] : memref<1x16x32xbf16, #tpu.memory_space<vmem>>, vector<1x8x32xbf16>
    %7 = vector.shape_cast %6 : vector<1x8x32xbf16> to vector<8x32xbf16>
    %8 = arith.extf %7 : vector<8x32xbf16> to vector<8x32xf32>
    %9 = tpu.iota {dimensions = array<i32: 0>} : vector<8x16xi32>
    %10 = vector.broadcast %4 : i32 to vector<8x16xi32>
    %11 = arith.addi %10, %9 : vector<8x16xi32>
    %12 = tpu.iota {dimensions = array<i32: 1>} : vector<8x16xi32>
    %13 = arith.cmpi sle, %12, %11 : vector<8x16xi32>
    %cst = arith.constant 0.000000e+00 : f32
    %cst_2 = arith.constant -1.000000e+09 : f32
    %14 = vector.broadcast %cst : f32 to vector<8x16xf32>
    %15 = vector.broadcast %cst_2 : f32 to vector<8x16xf32>
    %16 = arith.select %13, %14, %15 : vector<8x16xi1>, vector<8x16xf32>
    %17 = arith.index_cast %arg0 : i32 to index
    %18 = memref.load %arg2[%17] : memref<2xi32, #tpu.memory_space<smem>>
    %19 = tpu.iota {dimensions = array<i32: 1>} : vector<8x8xi32>
    %20 = vector.broadcast %18 : i32 to vector<8x8xi32>
    %21 = arith.cmpi slt, %19, %20 : vector<8x8xi32>
    %cst_3 = arith.constant 0.000000e+00 : f32
    %cst_4 = arith.constant -1.000000e+09 : f32
    %22 = vector.broadcast %cst_3 : f32 to vector<8x8xf32>
    %23 = vector.broadcast %cst_4 : f32 to vector<8x8xf32>
    %24 = arith.select %21, %22, %23 : vector<8x8xi1>, vector<8x8xf32>
    %c0_5 = arith.constant 0 : index
    %c0_6 = arith.constant 0 : index
    %25 = vector.load %arg25[%c0_5, %c0_6] : memref<1x32xf32, #tpu.memory_space<vmem>>, vector<1x32xf32>
    %c0_7 = arith.constant 0 : index
    %c0_8 = arith.constant 0 : index
    %26 = vector.load %arg26[%c0_7, %c0_8] : memref<1x32xf32, #tpu.memory_space<vmem>>, vector<1x32xf32>
    %cst_9 = arith.constant dense<0.000000e+00> : vector<8xf32>
    %27 = vector.multi_reduction <add>, %8, %cst_9 [1] : vector<8x32xf32> to vector<8xf32>
    %28 = vector.shape_cast %27 : vector<8xf32> to vector<8x1xf32>
    %cst_10 = arith.constant 3.200000e+01 : f32
    %29 = vector.broadcast %cst_10 : f32 to vector<8x1xf32>
    %30 = arith.divf %28, %29 : vector<8x1xf32>
    %31 = vector.broadcast %30 : vector<8x1xf32> to vector<8x32xf32>
    %32 = arith.subf %8, %31 : vector<8x32xf32>
    %33 = arith.mulf %32, %32 : vector<8x32xf32>
    %cst_11 = arith.constant dense<0.000000e+00> : vector<8xf32>
    %34 = vector.multi_reduction <add>, %33, %cst_11 [1] : vector<8x32xf32> to vector<8xf32>
    %35 = vector.shape_cast %34 : vector<8xf32> to vector<8x1xf32>
    %cst_12 = arith.constant 3.200000e+01 : f32
    %36 = vector.broadcast %cst_12 : f32 to vector<8x1xf32>
    %37 = arith.divf %35, %36 : vector<8x1xf32>
    %38 = vector.broadcast %30 : vector<8x1xf32> to vector<8x32xf32>
    %39 = arith.subf %8, %38 : vector<8x32xf32>
    %cst_13 = arith.constant 9.99999997E-7 : f32
    %40 = vector.broadcast %cst_13 : f32 to vector<8x1xf32>
    %41 = arith.addf %37, %40 : vector<8x1xf32>
    %42 = math.rsqrt %41 : vector<8x1xf32>
    %43 = vector.broadcast %42 : vector<8x1xf32> to vector<8x32xf32>
    %44 = arith.mulf %39, %43 : vector<8x32xf32>
    %45 = vector.broadcast %25 : vector<1x32xf32> to vector<8x32xf32>
    %46 = arith.mulf %44, %45 : vector<8x32xf32>
    %47 = vector.broadcast %26 : vector<1x32xf32> to vector<8x32xf32>
    %48 = arith.addf %46, %47 : vector<8x32xf32>
    %49 = arith.truncf %48 : vector<8x32xf32> to vector<8x32xbf16>
    %c0_14 = arith.constant 0 : index
    %c0_15 = arith.constant 0 : index
    %50 = vector.load %arg5[%c0_14, %c0_15] : memref<32x32xbf16, #tpu.memory_space<vmem>>, vector<32x32xbf16>
    %cst_16 = arith.constant dense<0.000000e+00> : vector<8x32xf32>
    %51 = tpu.matmul %49, %50, %cst_16 {dimension_numbers = #tpu.dot_dimension_numbers<[1], [0], [0], [1], [0, 0, 1, 1], [], []>} : vector<8x32xbf16>, vector<32x32xbf16>, vector<8x32xf32> -> vector<8x32xf32>
    %c0_17 = arith.constant 0 : index
    %c0_18 = arith.constant 0 : index
    %52 = vector.load %arg9[%c0_17, %c0_18] : memref<1x32xf32, #tpu.memory_space<vmem>>, vector<1x32xf32>
    %53 = vector.broadcast %52 : vector<1x32xf32> to vector<8x32xf32>
    %54 = arith.addf %51, %53 : vector<8x32xf32>
    %55 = arith.truncf %54 : vector<8x32xf32> to vector<8x32xbf16>
    %cst_19 = arith.constant 0.000000e+00 : f32
    %56 = vector.broadcast %cst_19 : f32 to vector<8x32xf32>
    %57 = vector.extract_strided_slice %55 {offsets = [0, 0], sizes = [8, 8], strides = [1, 1]} : vector<8x32xbf16> to vector<8x8xbf16>
    %c0_20 = arith.constant 0 : index
    %c0_21 = arith.constant 0 : index
    %58 = vector.load %arg32[%c0_20, %c0_21] : memref<16x32xbf16, #tpu.memory_space<vmem>>, vector<16x8xbf16>
    %c0_22 = arith.constant 0 : index
    %c0_23 = arith.constant 0 : index
    %59 = vector.load %arg33[%c0_22, %c0_23] : memref<16x32xbf16, #tpu.memory_space<vmem>>, vector<16x8xbf16>
    "tpu.trace_start"() <{level = 10 : i32, message = "td,sd->ts"}> : () -> ()
    %cst_24 = arith.constant dense<0.000000e+00> : vector<8x16xf32>
    %60 = tpu.matmul %57, %58, %cst_24 {dimension_numbers = #tpu.dot_dimension_numbers<[1], [1], [0], [0], [0, 0, 1, 0], [], []>} : vector<8x8xbf16>, vector<16x8xbf16>, vector<8x16xf32> -> vector<8x16xf32>
    "tpu.trace_stop"() : () -> ()
    %cst_25 = arith.constant 0.353553385 : f32
    %61 = vector.broadcast %cst_25 : f32 to vector<8x16xf32>
    %62 = arith.mulf %60, %61 : vector<8x16xf32>
    %63 = arith.addf %62, %16 : vector<8x16xf32>
    %cst_26 = arith.constant dense<0xFF800000> : vector<8xf32>
    %64 = vector.multi_reduction <maximumf>, %63, %cst_26 [1] : vector<8x16xf32> to vector<8xf32>
    %65 = vector.shape_cast %64 : vector<8xf32> to vector<8x1xf32>
    %66 = vector.broadcast %65 : vector<8x1xf32> to vector<8x16xf32>
    %67 = arith.subf %63, %66 : vector<8x16xf32>
    %68 = math.exp %67 : vector<8x16xf32>
    %cst_27 = arith.constant dense<0.000000e+00> : vector<8xf32>
    %69 = vector.multi_reduction <add>, %68, %cst_27 [1] : vector<8x16xf32> to vector<8xf32>
    %70 = vector.shape_cast %69 : vector<8xf32> to vector<8x1xf32>
    %71 = tpu.reciprocal %70 {approx = true} : vector<8x1xf32> -> vector<8x1xf32>
    %72 = arith.truncf %68 : vector<8x16xf32> to vector<8x16xbf16>
    %cst_28 = arith.constant dense<0.000000e+00> : vector<8x8xf32>
    %73 = tpu.matmul %72, %59, %cst_28 {dimension_numbers = #tpu.dot_dimension_numbers<[1], [0], [0], [1], [0, 0, 1, 1], [], []>} : vector<8x16xbf16>, vector<16x8xbf16>, vector<8x8xf32> -> vector<8x8xf32>
    %74 = vector.broadcast %71 : vector<8x1xf32> to vector<8x8xf32>
    %75 = arith.mulf %73, %74 : vector<8x8xf32>
    %76 = arith.truncf %75 : vector<8x8xf32> to vector<8x8xbf16>
    %c0_29 = arith.constant 0 : index
    %c0_30 = arith.constant 0 : index
    %77 = vector.load %arg8[%c0_29, %c0_30] : memref<32x32xbf16, #tpu.memory_space<vmem>>, vector<8x32xbf16>
    %cst_31 = arith.constant dense<0.000000e+00> : vector<8x32xf32>
    %78 = tpu.matmul %76, %77, %cst_31 {dimension_numbers = #tpu.dot_dimension_numbers<[1], [0], [0], [1], [0, 0, 1, 1], [], []>} : vector<8x8xbf16>, vector<8x32xbf16>, vector<8x32xf32> -> vector<8x32xf32>
    %79 = arith.addf %56, %78 : vector<8x32xf32>
    %80 = vector.extract_strided_slice %55 {offsets = [0, 8], sizes = [8, 8], strides = [1, 1]} : vector<8x32xbf16> to vector<8x8xbf16>
    %c0_32 = arith.constant 0 : index
    %c8 = arith.constant 8 : index
    %81 = vector.load %arg32[%c0_32, %c8] : memref<16x32xbf16, #tpu.memory_space<vmem>>, vector<16x8xbf16>
    %c0_33 = arith.constant 0 : index
    %c8_34 = arith.constant 8 : index
    %82 = vector.load %arg33[%c0_33, %c8_34] : memref<16x32xbf16, #tpu.memory_space<vmem>>, vector<16x8xbf16>
    "tpu.trace_start"() <{level = 10 : i32, message = "td,sd->ts"}> : () -> ()
    %cst_35 = arith.constant dense<0.000000e+00> : vector<8x16xf32>
    %83 = tpu.matmul %80, %81, %cst_35 {dimension_numbers = #tpu.dot_dimension_numbers<[1], [1], [0], [0], [0, 0, 1, 0], [], []>} : vector<8x8xbf16>, vector<16x8xbf16>, vector<8x16xf32> -> vector<8x16xf32>
    "tpu.trace_stop"() : () -> ()
    %cst_36 = arith.constant 0.353553385 : f32
    %84 = vector.broadcast %cst_36 : f32 to vector<8x16xf32>
    %85 = arith.mulf %83, %84 : vector<8x16xf32>
    %86 = arith.addf %85, %16 : vector<8x16xf32>
    %cst_37 = arith.constant dense<0xFF800000> : vector<8xf32>
    %87 = vector.multi_reduction <maximumf>, %86, %cst_37 [1] : vector<8x16xf32> to vector<8xf32>
    %88 = vector.shape_cast %87 : vector<8xf32> to vector<8x1xf32>
    %89 = vector.broadcast %88 : vector<8x1xf32> to vector<8x16xf32>
    %90 = arith.subf %86, %89 : vector<8x16xf32>
    %91 = math.exp %90 : vector<8x16xf32>
    %cst_38 = arith.constant dense<0.000000e+00> : vector<8xf32>
    %92 = vector.multi_reduction <add>, %91, %cst_38 [1] : vector<8x16xf32> to vector<8xf32>
    %93 = vector.shape_cast %92 : vector<8xf32> to vector<8x1xf32>
    %94 = tpu.reciprocal %93 {approx = true} : vector<8x1xf32> -> vector<8x1xf32>
    %95 = arith.truncf %91 : vector<8x16xf32> to vector<8x16xbf16>
    %cst_39 = arith.constant dense<0.000000e+00> : vector<8x8xf32>
    %96 = tpu.matmul %95, %82, %cst_39 {dimension_numbers = #tpu.dot_dimension_numbers<[1], [0], [0], [1], [0, 0, 1, 1], [], []>} : vector<8x16xbf16>, vector<16x8xbf16>, vector<8x8xf32> -> vector<8x8xf32>
    %97 = vector.broadcast %94 : vector<8x1xf32> to vector<8x8xf32>
    %98 = arith.mulf %96, %97 : vector<8x8xf32>
    %99 = arith.truncf %98 : vector<8x8xf32> to vector<8x8xbf16>
    %c8_40 = arith.constant 8 : index
    %c0_41 = arith.constant 0 : index
    %100 = vector.load %arg8[%c8_40, %c0_41] : memref<32x32xbf16, #tpu.memory_space<vmem>>, vector<8x32xbf16>
    %cst_42 = arith.constant dense<0.000000e+00> : vector<8x32xf32>
    %101 = tpu.matmul %99, %100, %cst_42 {dimension_numbers = #tpu.dot_dimension_numbers<[1], [0], [0], [1], [0, 0, 1, 1], [], []>} : vector<8x8xbf16>, vector<8x32xbf16>, vector<8x32xf32> -> vector<8x32xf32>
    %102 = arith.addf %79, %101 : vector<8x32xf32>
    %103 = vector.extract_strided_slice %55 {offsets = [0, 16], sizes = [8, 8], strides = [1, 1]} : vector<8x32xbf16> to vector<8x8xbf16>
    %c0_43 = arith.constant 0 : index
    %c16 = arith.constant 16 : index
    %104 = vector.load %arg32[%c0_43, %c16] : memref<16x32xbf16, #tpu.memory_space<vmem>>, vector<16x8xbf16>
    %c0_44 = arith.constant 0 : index
    %c16_45 = arith.constant 16 : index
    %105 = vector.load %arg33[%c0_44, %c16_45] : memref<16x32xbf16, #tpu.memory_space<vmem>>, vector<16x8xbf16>
    "tpu.trace_start"() <{level = 10 : i32, message = "td,sd->ts"}> : () -> ()
    %cst_46 = arith.constant dense<0.000000e+00> : vector<8x16xf32>
    %106 = tpu.matmul %103, %104, %cst_46 {dimension_numbers = #tpu.dot_dimension_numbers<[1], [1], [0], [0], [0, 0, 1, 0], [], []>} : vector<8x8xbf16>, vector<16x8xbf16>, vector<8x16xf32> -> vector<8x16xf32>
    "tpu.trace_stop"() : () -> ()
    %cst_47 = arith.constant 0.353553385 : f32
    %107 = vector.broadcast %cst_47 : f32 to vector<8x16xf32>
    %108 = arith.mulf %106, %107 : vector<8x16xf32>
    %109 = arith.addf %108, %16 : vector<8x16xf32>
    %cst_48 = arith.constant dense<0xFF800000> : vector<8xf32>
    %110 = vector.multi_reduction <maximumf>, %109, %cst_48 [1] : vector<8x16xf32> to vector<8xf32>
    %111 = vector.shape_cast %110 : vector<8xf32> to vector<8x1xf32>
    %112 = vector.broadcast %111 : vector<8x1xf32> to vector<8x16xf32>
    %113 = arith.subf %109, %112 : vector<8x16xf32>
    %114 = math.exp %113 : vector<8x16xf32>
    %cst_49 = arith.constant dense<0.000000e+00> : vector<8xf32>
    %115 = vector.multi_reduction <add>, %114, %cst_49 [1] : vector<8x16xf32> to vector<8xf32>
    %116 = vector.shape_cast %115 : vector<8xf32> to vector<8x1xf32>
    %117 = tpu.reciprocal %116 {approx = true} : vector<8x1xf32> -> vector<8x1xf32>
    %118 = arith.truncf %114 : vector<8x16xf32> to vector<8x16xbf16>
    %cst_50 = arith.constant dense<0.000000e+00> : vector<8x8xf32>
    %119 = tpu.matmul %118, %105, %cst_50 {dimension_numbers = #tpu.dot_dimension_numbers<[1], [0], [0], [1], [0, 0, 1, 1], [], []>} : vector<8x16xbf16>, vector<16x8xbf16>, vector<8x8xf32> -> vector<8x8xf32>
    %120 = vector.broadcast %117 : vector<8x1xf32> to vector<8x8xf32>
    %121 = arith.mulf %119, %120 : vector<8x8xf32>
    %122 = arith.truncf %121 : vector<8x8xf32> to vector<8x8xbf16>
    %c16_51 = arith.constant 16 : index
    %c0_52 = arith.constant 0 : index
    %123 = vector.load %arg8[%c16_51, %c0_52] : memref<32x32xbf16, #tpu.memory_space<vmem>>, vector<8x32xbf16>
    %cst_53 = arith.constant dense<0.000000e+00> : vector<8x32xf32>
    %124 = tpu.matmul %122, %123, %cst_53 {dimension_numbers = #tpu.dot_dimension_numbers<[1], [0], [0], [1], [0, 0, 1, 1], [], []>} : vector<8x8xbf16>, vector<8x32xbf16>, vector<8x32xf32> -> vector<8x32xf32>
    %125 = arith.addf %102, %124 : vector<8x32xf32>
    %126 = vector.extract_strided_slice %55 {offsets = [0, 24], sizes = [8, 8], strides = [1, 1]} : vector<8x32xbf16> to vector<8x8xbf16>
    %c0_54 = arith.constant 0 : index
    %c24 = arith.constant 24 : index
    %127 = vector.load %arg32[%c0_54, %c24] : memref<16x32xbf16, #tpu.memory_space<vmem>>, vector<16x8xbf16>
    %c0_55 = arith.constant 0 : index
    %c24_56 = arith.constant 24 : index
    %128 = vector.load %arg33[%c0_55, %c24_56] : memref<16x32xbf16, #tpu.memory_space<vmem>>, vector<16x8xbf16>
    "tpu.trace_start"() <{level = 10 : i32, message = "td,sd->ts"}> : () -> ()
    %cst_57 = arith.constant dense<0.000000e+00> : vector<8x16xf32>
    %129 = tpu.matmul %126, %127, %cst_57 {dimension_numbers = #tpu.dot_dimension_numbers<[1], [1], [0], [0], [0, 0, 1, 0], [], []>} : vector<8x8xbf16>, vector<16x8xbf16>, vector<8x16xf32> -> vector<8x16xf32>
    "tpu.trace_stop"() : () -> ()
    %cst_58 = arith.constant 0.353553385 : f32
    %130 = vector.broadcast %cst_58 : f32 to vector<8x16xf32>
    %131 = arith.mulf %129, %130 : vector<8x16xf32>
    %132 = arith.addf %131, %16 : vector<8x16xf32>
    %cst_59 = arith.constant dense<0xFF800000> : vector<8xf32>
    %133 = vector.multi_reduction <maximumf>, %132, %cst_59 [1] : vector<8x16xf32> to vector<8xf32>
    %134 = vector.shape_cast %133 : vector<8xf32> to vector<8x1xf32>
    %135 = vector.broadcast %134 : vector<8x1xf32> to vector<8x16xf32>
    %136 = arith.subf %132, %135 : vector<8x16xf32>
    %137 = math.exp %136 : vector<8x16xf32>
    %cst_60 = arith.constant dense<0.000000e+00> : vector<8xf32>
    %138 = vector.multi_reduction <add>, %137, %cst_60 [1] : vector<8x16xf32> to vector<8xf32>
    %139 = vector.shape_cast %138 : vector<8xf32> to vector<8x1xf32>
    %140 = tpu.reciprocal %139 {approx = true} : vector<8x1xf32> -> vector<8x1xf32>
    %141 = arith.truncf %137 : vector<8x16xf32> to vector<8x16xbf16>
    %cst_61 = arith.constant dense<0.000000e+00> : vector<8x8xf32>
    %142 = tpu.matmul %141, %128, %cst_61 {dimension_numbers = #tpu.dot_dimension_numbers<[1], [0], [0], [1], [0, 0, 1, 1], [], []>} : vector<8x16xbf16>, vector<16x8xbf16>, vector<8x8xf32> -> vector<8x8xf32>
    %143 = vector.broadcast %140 : vector<8x1xf32> to vector<8x8xf32>
    %144 = arith.mulf %142, %143 : vector<8x8xf32>
    %145 = arith.truncf %144 : vector<8x8xf32> to vector<8x8xbf16>
    %c24_62 = arith.constant 24 : index
    %c0_63 = arith.constant 0 : index
    %146 = vector.load %arg8[%c24_62, %c0_63] : memref<32x32xbf16, #tpu.memory_space<vmem>>, vector<8x32xbf16>
    %cst_64 = arith.constant dense<0.000000e+00> : vector<8x32xf32>
    %147 = tpu.matmul %145, %146, %cst_64 {dimension_numbers = #tpu.dot_dimension_numbers<[1], [0], [0], [1], [0, 0, 1, 1], [], []>} : vector<8x8xbf16>, vector<8x32xbf16>, vector<8x32xf32> -> vector<8x32xf32>
    %148 = arith.addf %125, %147 : vector<8x32xf32>
    %c0_65 = arith.constant 0 : index
    %c0_66 = arith.constant 0 : index
    %149 = vector.load %arg12[%c0_65, %c0_66] : memref<1x32xf32, #tpu.memory_space<vmem>>, vector<1x32xf32>
    %150 = vector.broadcast %149 : vector<1x32xf32> to vector<8x32xf32>
    %151 = arith.addf %148, %150 : vector<8x32xf32>
    %152 = arith.addf %8, %151 : vector<8x32xf32>
    %c0_67 = arith.constant 0 : index
    %c0_68 = arith.constant 0 : index
    %153 = vector.load %arg27[%c0_67, %c0_68] : memref<1x32xf32, #tpu.memory_space<vmem>>, vector<1x32xf32>
    %c0_69 = arith.constant 0 : index
    %c0_70 = arith.constant 0 : index
    %154 = vector.load %arg28[%c0_69, %c0_70] : memref<1x32xf32, #tpu.memory_space<vmem>>, vector<1x32xf32>
    %cst_71 = arith.constant dense<0.000000e+00> : vector<8xf32>
    %155 = vector.multi_reduction <add>, %152, %cst_71 [1] : vector<8x32xf32> to vector<8xf32>
    %156 = vector.shape_cast %155 : vector<8xf32> to vector<8x1xf32>
    %cst_72 = arith.constant 3.200000e+01 : f32
    %157 = vector.broadcast %cst_72 : f32 to vector<8x1xf32>
    %158 = arith.divf %156, %157 : vector<8x1xf32>
    %159 = vector.broadcast %158 : vector<8x1xf32> to vector<8x32xf32>
    %160 = arith.subf %152, %159 : vector<8x32xf32>
    %161 = arith.mulf %160, %160 : vector<8x32xf32>
    %cst_73 = arith.constant dense<0.000000e+00> : vector<8xf32>
    %162 = vector.multi_reduction <add>, %161, %cst_73 [1] : vector<8x32xf32> to vector<8xf32>
    %163 = vector.shape_cast %162 : vector<8xf32> to vector<8x1xf32>
    %cst_74 = arith.constant 3.200000e+01 : f32
    %164 = vector.broadcast %cst_74 : f32 to vector<8x1xf32>
    %165 = arith.divf %163, %164 : vector<8x1xf32>
    %166 = vector.broadcast %158 : vector<8x1xf32> to vector<8x32xf32>
    %167 = arith.subf %152, %166 : vector<8x32xf32>
    %cst_75 = arith.constant 9.99999997E-7 : f32
    %168 = vector.broadcast %cst_75 : f32 to vector<8x1xf32>
    %169 = arith.addf %165, %168 : vector<8x1xf32>
    %170 = math.rsqrt %169 : vector<8x1xf32>
    %171 = vector.broadcast %170 : vector<8x1xf32> to vector<8x32xf32>
    %172 = arith.mulf %167, %171 : vector<8x32xf32>
    %173 = vector.broadcast %153 : vector<1x32xf32> to vector<8x32xf32>
    %174 = arith.mulf %172, %173 : vector<8x32xf32>
    %175 = vector.broadcast %154 : vector<1x32xf32> to vector<8x32xf32>
    %176 = arith.addf %174, %175 : vector<8x32xf32>
    %177 = arith.truncf %176 : vector<8x32xf32> to vector<8x32xbf16>
    %c0_76 = arith.constant 0 : index
    %c0_77 = arith.constant 0 : index
    %178 = vector.load %arg13[%c0_76, %c0_77] : memref<32x32xbf16, #tpu.memory_space<vmem>>, vector<32x32xbf16>
    %cst_78 = arith.constant dense<0.000000e+00> : vector<8x32xf32>
    %179 = tpu.matmul %177, %178, %cst_78 {dimension_numbers = #tpu.dot_dimension_numbers<[1], [0], [0], [1], [0, 0, 1, 1], [], []>} : vector<8x32xbf16>, vector<32x32xbf16>, vector<8x32xf32> -> vector<8x32xf32>
    %c0_79 = arith.constant 0 : index
    %c0_80 = arith.constant 0 : index
    %180 = vector.load %arg17[%c0_79, %c0_80] : memref<1x32xf32, #tpu.memory_space<vmem>>, vector<1x32xf32>
    %181 = vector.broadcast %180 : vector<1x32xf32> to vector<8x32xf32>
    %182 = arith.addf %179, %181 : vector<8x32xf32>
    %183 = arith.truncf %182 : vector<8x32xf32> to vector<8x32xbf16>
    %cst_81 = arith.constant 0.000000e+00 : f32
    %184 = vector.broadcast %cst_81 : f32 to vector<8x32xf32>
    %185 = vector.extract_strided_slice %183 {offsets = [0, 0], sizes = [8, 8], strides = [1, 1]} : vector<8x32xbf16> to vector<8x8xbf16>
    %c0_82 = arith.constant 0 : index
    %c0_83 = arith.constant 0 : index
    %186 = vector.load %arg34[%c0_82, %c0_83] : memref<8x32xbf16, #tpu.memory_space<vmem>>, vector<8x8xbf16>
    %c0_84 = arith.constant 0 : index
    %c0_85 = arith.constant 0 : index
    %187 = vector.load %arg35[%c0_84, %c0_85] : memref<8x32xbf16, #tpu.memory_space<vmem>>, vector<8x8xbf16>
    "tpu.trace_start"() <{level = 10 : i32, message = "td,sd->ts"}> : () -> ()
    %cst_86 = arith.constant dense<0.000000e+00> : vector<8x8xf32>
    %188 = tpu.matmul %185, %186, %cst_86 {dimension_numbers = #tpu.dot_dimension_numbers<[1], [1], [0], [0], [0, 0, 1, 0], [], []>} : vector<8x8xbf16>, vector<8x8xbf16>, vector<8x8xf32> -> vector<8x8xf32>
    "tpu.trace_stop"() : () -> ()
    %cst_87 = arith.constant 0.353553385 : f32
    %189 = vector.broadcast %cst_87 : f32 to vector<8x8xf32>
    %190 = arith.mulf %188, %189 : vector<8x8xf32>
    %191 = arith.addf %190, %24 : vector<8x8xf32>
    %cst_88 = arith.constant dense<0xFF800000> : vector<8xf32>
    %192 = vector.multi_reduction <maximumf>, %191, %cst_88 [1] : vector<8x8xf32> to vector<8xf32>
    %193 = vector.shape_cast %192 : vector<8xf32> to vector<8x1xf32>
    %194 = vector.broadcast %193 : vector<8x1xf32> to vector<8x8xf32>
    %195 = arith.subf %191, %194 : vector<8x8xf32>
    %196 = math.exp %195 : vector<8x8xf32>
    %cst_89 = arith.constant dense<0.000000e+00> : vector<8xf32>
    %197 = vector.multi_reduction <add>, %196, %cst_89 [1] : vector<8x8xf32> to vector<8xf32>
    %198 = vector.shape_cast %197 : vector<8xf32> to vector<8x1xf32>
    %199 = tpu.reciprocal %198 {approx = true} : vector<8x1xf32> -> vector<8x1xf32>
    %200 = arith.truncf %196 : vector<8x8xf32> to vector<8x8xbf16>
    %cst_90 = arith.constant dense<0.000000e+00> : vector<8x8xf32>
    %201 = tpu.matmul %200, %187, %cst_90 {dimension_numbers = #tpu.dot_dimension_numbers<[1], [0], [0], [1], [0, 0, 1, 1], [], []>} : vector<8x8xbf16>, vector<8x8xbf16>, vector<8x8xf32> -> vector<8x8xf32>
    %202 = vector.broadcast %199 : vector<8x1xf32> to vector<8x8xf32>
    %203 = arith.mulf %201, %202 : vector<8x8xf32>
    %204 = arith.truncf %203 : vector<8x8xf32> to vector<8x8xbf16>
    %c0_91 = arith.constant 0 : index
    %c0_92 = arith.constant 0 : index
    %205 = vector.load %arg16[%c0_91, %c0_92] : memref<32x32xbf16, #tpu.memory_space<vmem>>, vector<8x32xbf16>
    %cst_93 = arith.constant dense<0.000000e+00> : vector<8x32xf32>
    %206 = tpu.matmul %204, %205, %cst_93 {dimension_numbers = #tpu.dot_dimension_numbers<[1], [0], [0], [1], [0, 0, 1, 1], [], []>} : vector<8x8xbf16>, vector<8x32xbf16>, vector<8x32xf32> -> vector<8x32xf32>
    %207 = arith.addf %184, %206 : vector<8x32xf32>
    %208 = vector.extract_strided_slice %183 {offsets = [0, 8], sizes = [8, 8], strides = [1, 1]} : vector<8x32xbf16> to vector<8x8xbf16>
    %c0_94 = arith.constant 0 : index
    %c8_95 = arith.constant 8 : index
    %209 = vector.load %arg34[%c0_94, %c8_95] : memref<8x32xbf16, #tpu.memory_space<vmem>>, vector<8x8xbf16>
    %c0_96 = arith.constant 0 : index
    %c8_97 = arith.constant 8 : index
    %210 = vector.load %arg35[%c0_96, %c8_97] : memref<8x32xbf16, #tpu.memory_space<vmem>>, vector<8x8xbf16>
    "tpu.trace_start"() <{level = 10 : i32, message = "td,sd->ts"}> : () -> ()
    %cst_98 = arith.constant dense<0.000000e+00> : vector<8x8xf32>
    %211 = tpu.matmul %208, %209, %cst_98 {dimension_numbers = #tpu.dot_dimension_numbers<[1], [1], [0], [0], [0, 0, 1, 0], [], []>} : vector<8x8xbf16>, vector<8x8xbf16>, vector<8x8xf32> -> vector<8x8xf32>
    "tpu.trace_stop"() : () -> ()
    %cst_99 = arith.constant 0.353553385 : f32
    %212 = vector.broadcast %cst_99 : f32 to vector<8x8xf32>
    %213 = arith.mulf %211, %212 : vector<8x8xf32>
    %214 = arith.addf %213, %24 : vector<8x8xf32>
    %cst_100 = arith.constant dense<0xFF800000> : vector<8xf32>
    %215 = vector.multi_reduction <maximumf>, %214, %cst_100 [1] : vector<8x8xf32> to vector<8xf32>
    %216 = vector.shape_cast %215 : vector<8xf32> to vector<8x1xf32>
    %217 = vector.broadcast %216 : vector<8x1xf32> to vector<8x8xf32>
    %218 = arith.subf %214, %217 : vector<8x8xf32>
    %219 = math.exp %218 : vector<8x8xf32>
    %cst_101 = arith.constant dense<0.000000e+00> : vector<8xf32>
    %220 = vector.multi_reduction <add>, %219, %cst_101 [1] : vector<8x8xf32> to vector<8xf32>
    %221 = vector.shape_cast %220 : vector<8xf32> to vector<8x1xf32>
    %222 = tpu.reciprocal %221 {approx = true} : vector<8x1xf32> -> vector<8x1xf32>
    %223 = arith.truncf %219 : vector<8x8xf32> to vector<8x8xbf16>
    %cst_102 = arith.constant dense<0.000000e+00> : vector<8x8xf32>
    %224 = tpu.matmul %223, %210, %cst_102 {dimension_numbers = #tpu.dot_dimension_numbers<[1], [0], [0], [1], [0, 0, 1, 1], [], []>} : vector<8x8xbf16>, vector<8x8xbf16>, vector<8x8xf32> -> vector<8x8xf32>
    %225 = vector.broadcast %222 : vector<8x1xf32> to vector<8x8xf32>
    %226 = arith.mulf %224, %225 : vector<8x8xf32>
    %227 = arith.truncf %226 : vector<8x8xf32> to vector<8x8xbf16>
    %c8_103 = arith.constant 8 : index
    %c0_104 = arith.constant 0 : index
    %228 = vector.load %arg16[%c8_103, %c0_104] : memref<32x32xbf16, #tpu.memory_space<vmem>>, vector<8x32xbf16>
    %cst_105 = arith.constant dense<0.000000e+00> : vector<8x32xf32>
    %229 = tpu.matmul %227, %228, %cst_105 {dimension_numbers = #tpu.dot_dimension_numbers<[1], [0], [0], [1], [0, 0, 1, 1], [], []>} : vector<8x8xbf16>, vector<8x32xbf16>, vector<8x32xf32> -> vector<8x32xf32>
    %230 = arith.addf %207, %229 : vector<8x32xf32>
    %231 = vector.extract_strided_slice %183 {offsets = [0, 16], sizes = [8, 8], strides = [1, 1]} : vector<8x32xbf16> to vector<8x8xbf16>
    %c0_106 = arith.constant 0 : index
    %c16_107 = arith.constant 16 : index
    %232 = vector.load %arg34[%c0_106, %c16_107] : memref<8x32xbf16, #tpu.memory_space<vmem>>, vector<8x8xbf16>
    %c0_108 = arith.constant 0 : index
    %c16_109 = arith.constant 16 : index
    %233 = vector.load %arg35[%c0_108, %c16_109] : memref<8x32xbf16, #tpu.memory_space<vmem>>, vector<8x8xbf16>
    "tpu.trace_start"() <{level = 10 : i32, message = "td,sd->ts"}> : () -> ()
    %cst_110 = arith.constant dense<0.000000e+00> : vector<8x8xf32>
    %234 = tpu.matmul %231, %232, %cst_110 {dimension_numbers = #tpu.dot_dimension_numbers<[1], [1], [0], [0], [0, 0, 1, 0], [], []>} : vector<8x8xbf16>, vector<8x8xbf16>, vector<8x8xf32> -> vector<8x8xf32>
    "tpu.trace_stop"() : () -> ()
    %cst_111 = arith.constant 0.353553385 : f32
    %235 = vector.broadcast %cst_111 : f32 to vector<8x8xf32>
    %236 = arith.mulf %234, %235 : vector<8x8xf32>
    %237 = arith.addf %236, %24 : vector<8x8xf32>
    %cst_112 = arith.constant dense<0xFF800000> : vector<8xf32>
    %238 = vector.multi_reduction <maximumf>, %237, %cst_112 [1] : vector<8x8xf32> to vector<8xf32>
    %239 = vector.shape_cast %238 : vector<8xf32> to vector<8x1xf32>
    %240 = vector.broadcast %239 : vector<8x1xf32> to vector<8x8xf32>
    %241 = arith.subf %237, %240 : vector<8x8xf32>
    %242 = math.exp %241 : vector<8x8xf32>
    %cst_113 = arith.constant dense<0.000000e+00> : vector<8xf32>
    %243 = vector.multi_reduction <add>, %242, %cst_113 [1] : vector<8x8xf32> to vector<8xf32>
    %244 = vector.shape_cast %243 : vector<8xf32> to vector<8x1xf32>
    %245 = tpu.reciprocal %244 {approx = true} : vector<8x1xf32> -> vector<8x1xf32>
    %246 = arith.truncf %242 : vector<8x8xf32> to vector<8x8xbf16>
    %cst_114 = arith.constant dense<0.000000e+00> : vector<8x8xf32>
    %247 = tpu.matmul %246, %233, %cst_114 {dimension_numbers = #tpu.dot_dimension_numbers<[1], [0], [0], [1], [0, 0, 1, 1], [], []>} : vector<8x8xbf16>, vector<8x8xbf16>, vector<8x8xf32> -> vector<8x8xf32>
    %248 = vector.broadcast %245 : vector<8x1xf32> to vector<8x8xf32>
    %249 = arith.mulf %247, %248 : vector<8x8xf32>
    %250 = arith.truncf %249 : vector<8x8xf32> to vector<8x8xbf16>
    %c16_115 = arith.constant 16 : index
    %c0_116 = arith.constant 0 : index
    %251 = vector.load %arg16[%c16_115, %c0_116] : memref<32x32xbf16, #tpu.memory_space<vmem>>, vector<8x32xbf16>
    %cst_117 = arith.constant dense<0.000000e+00> : vector<8x32xf32>
    %252 = tpu.matmul %250, %251, %cst_117 {dimension_numbers = #tpu.dot_dimension_numbers<[1], [0], [0], [1], [0, 0, 1, 1], [], []>} : vector<8x8xbf16>, vector<8x32xbf16>, vector<8x32xf32> -> vector<8x32xf32>
    %253 = arith.addf %230, %252 : vector<8x32xf32>
    %254 = vector.extract_strided_slice %183 {offsets = [0, 24], sizes = [8, 8], strides = [1, 1]} : vector<8x32xbf16> to vector<8x8xbf16>
    %c0_118 = arith.constant 0 : index
    %c24_119 = arith.constant 24 : index
    %255 = vector.load %arg34[%c0_118, %c24_119] : memref<8x32xbf16, #tpu.memory_space<vmem>>, vector<8x8xbf16>
    %c0_120 = arith.constant 0 : index
    %c24_121 = arith.constant 24 : index
    %256 = vector.load %arg35[%c0_120, %c24_121] : memref<8x32xbf16, #tpu.memory_space<vmem>>, vector<8x8xbf16>
    "tpu.trace_start"() <{level = 10 : i32, message = "td,sd->ts"}> : () -> ()
    %cst_122 = arith.constant dense<0.000000e+00> : vector<8x8xf32>
    %257 = tpu.matmul %254, %255, %cst_122 {dimension_numbers = #tpu.dot_dimension_numbers<[1], [1], [0], [0], [0, 0, 1, 0], [], []>} : vector<8x8xbf16>, vector<8x8xbf16>, vector<8x8xf32> -> vector<8x8xf32>
    "tpu.trace_stop"() : () -> ()
    %cst_123 = arith.constant 0.353553385 : f32
    %258 = vector.broadcast %cst_123 : f32 to vector<8x8xf32>
    %259 = arith.mulf %257, %258 : vector<8x8xf32>
    %260 = arith.addf %259, %24 : vector<8x8xf32>
    %cst_124 = arith.constant dense<0xFF800000> : vector<8xf32>
    %261 = vector.multi_reduction <maximumf>, %260, %cst_124 [1] : vector<8x8xf32> to vector<8xf32>
    %262 = vector.shape_cast %261 : vector<8xf32> to vector<8x1xf32>
    %263 = vector.broadcast %262 : vector<8x1xf32> to vector<8x8xf32>
    %264 = arith.subf %260, %263 : vector<8x8xf32>
    %265 = math.exp %264 : vector<8x8xf32>
    %cst_125 = arith.constant dense<0.000000e+00> : vector<8xf32>
    %266 = vector.multi_reduction <add>, %265, %cst_125 [1] : vector<8x8xf32> to vector<8xf32>
    %267 = vector.shape_cast %266 : vector<8xf32> to vector<8x1xf32>
    %268 = tpu.reciprocal %267 {approx = true} : vector<8x1xf32> -> vector<8x1xf32>
    %269 = arith.truncf %265 : vector<8x8xf32> to vector<8x8xbf16>
    %cst_126 = arith.constant dense<0.000000e+00> : vector<8x8xf32>
    %270 = tpu.matmul %269, %256, %cst_126 {dimension_numbers = #tpu.dot_dimension_numbers<[1], [0], [0], [1], [0, 0, 1, 1], [], []>} : vector<8x8xbf16>, vector<8x8xbf16>, vector<8x8xf32> -> vector<8x8xf32>
    %271 = vector.broadcast %268 : vector<8x1xf32> to vector<8x8xf32>
    %272 = arith.mulf %270, %271 : vector<8x8xf32>
    %273 = arith.truncf %272 : vector<8x8xf32> to vector<8x8xbf16>
    %c24_127 = arith.constant 24 : index
    %c0_128 = arith.constant 0 : index
    %274 = vector.load %arg16[%c24_127, %c0_128] : memref<32x32xbf16, #tpu.memory_space<vmem>>, vector<8x32xbf16>
    %cst_129 = arith.constant dense<0.000000e+00> : vector<8x32xf32>
    %275 = tpu.matmul %273, %274, %cst_129 {dimension_numbers = #tpu.dot_dimension_numbers<[1], [0], [0], [1], [0, 0, 1, 1], [], []>} : vector<8x8xbf16>, vector<8x32xbf16>, vector<8x32xf32> -> vector<8x32xf32>
    %276 = arith.addf %253, %275 : vector<8x32xf32>
    %c0_130 = arith.constant 0 : index
    %c0_131 = arith.constant 0 : index
    %277 = vector.load %arg20[%c0_130, %c0_131] : memref<1x32xf32, #tpu.memory_space<vmem>>, vector<1x32xf32>
    %278 = vector.broadcast %277 : vector<1x32xf32> to vector<8x32xf32>
    %279 = arith.addf %276, %278 : vector<8x32xf32>
    %280 = arith.addf %152, %279 : vector<8x32xf32>
    %c0_132 = arith.constant 0 : index
    %c0_133 = arith.constant 0 : index
    %281 = vector.load %arg29[%c0_132, %c0_133] : memref<1x32xf32, #tpu.memory_space<vmem>>, vector<1x32xf32>
    %c0_134 = arith.constant 0 : index
    %c0_135 = arith.constant 0 : index
    %282 = vector.load %arg30[%c0_134, %c0_135] : memref<1x32xf32, #tpu.memory_space<vmem>>, vector<1x32xf32>
    %cst_136 = arith.constant dense<0.000000e+00> : vector<8xf32>
    %283 = vector.multi_reduction <add>, %280, %cst_136 [1] : vector<8x32xf32> to vector<8xf32>
    %284 = vector.shape_cast %283 : vector<8xf32> to vector<8x1xf32>
    %cst_137 = arith.constant 3.200000e+01 : f32
    %285 = vector.broadcast %cst_137 : f32 to vector<8x1xf32>
    %286 = arith.divf %284, %285 : vector<8x1xf32>
    %287 = vector.broadcast %286 : vector<8x1xf32> to vector<8x32xf32>
    %288 = arith.subf %280, %287 : vector<8x32xf32>
    %289 = arith.mulf %288, %288 : vector<8x32xf32>
    %cst_138 = arith.constant dense<0.000000e+00> : vector<8xf32>
    %290 = vector.multi_reduction <add>, %289, %cst_138 [1] : vector<8x32xf32> to vector<8xf32>
    %291 = vector.shape_cast %290 : vector<8xf32> to vector<8x1xf32>
    %cst_139 = arith.constant 3.200000e+01 : f32
    %292 = vector.broadcast %cst_139 : f32 to vector<8x1xf32>
    %293 = arith.divf %291, %292 : vector<8x1xf32>
    %294 = vector.broadcast %286 : vector<8x1xf32> to vector<8x32xf32>
    %295 = arith.subf %280, %294 : vector<8x32xf32>
    %cst_140 = arith.constant 9.99999997E-7 : f32
    %296 = vector.broadcast %cst_140 : f32 to vector<8x1xf32>
    %297 = arith.addf %293, %296 : vector<8x1xf32>
    %298 = math.rsqrt %297 : vector<8x1xf32>
    %299 = vector.broadcast %298 : vector<8x1xf32> to vector<8x32xf32>
    %300 = arith.mulf %295, %299 : vector<8x32xf32>
    %301 = vector.broadcast %281 : vector<1x32xf32> to vector<8x32xf32>
    %302 = arith.mulf %300, %301 : vector<8x32xf32>
    %303 = vector.broadcast %282 : vector<1x32xf32> to vector<8x32xf32>
    %304 = arith.addf %302, %303 : vector<8x32xf32>
    %305 = arith.truncf %304 : vector<8x32xf32> to vector<8x32xbf16>
    %c0_141 = arith.constant 0 : index
    %c0_142 = arith.constant 0 : index
    %306 = vector.load %arg21[%c0_141, %c0_142] : memref<32x64xbf16, #tpu.memory_space<vmem>>, vector<32x64xbf16>
    %cst_143 = arith.constant dense<0.000000e+00> : vector<8x64xf32>
    %307 = tpu.matmul %305, %306, %cst_143 {dimension_numbers = #tpu.dot_dimension_numbers<[1], [0], [0], [1], [0, 0, 1, 1], [], []>} : vector<8x32xbf16>, vector<32x64xbf16>, vector<8x64xf32> -> vector<8x64xf32>
    %c0_144 = arith.constant 0 : index
    %c0_145 = arith.constant 0 : index
    %308 = vector.load %arg22[%c0_144, %c0_145] : memref<1x64xf32, #tpu.memory_space<vmem>>, vector<1x64xf32>
    %309 = vector.broadcast %308 : vector<1x64xf32> to vector<8x64xf32>
    %310 = arith.addf %307, %309 : vector<8x64xf32>
    %cst_146 = arith.constant 0.000000e+00 : f32
    %311 = vector.broadcast %cst_146 : f32 to vector<8x64xf32>
    %312 = arith.maximumf %310, %311 : vector<8x64xf32>
    %313 = arith.truncf %312 : vector<8x64xf32> to vector<8x64xbf16>
    %c0_147 = arith.constant 0 : index
    %c0_148 = arith.constant 0 : index
    %314 = vector.load %arg23[%c0_147, %c0_148] : memref<64x32xbf16, #tpu.memory_space<vmem>>, vector<64x32xbf16>
    %cst_149 = arith.constant dense<0.000000e+00> : vector<8x32xf32>
    %315 = tpu.matmul %313, %314, %cst_149 {dimension_numbers = #tpu.dot_dimension_numbers<[1], [0], [0], [1], [0, 0, 1, 1], [], []>} : vector<8x64xbf16>, vector<64x32xbf16>, vector<8x32xf32> -> vector<8x32xf32>
    %316 = arith.addf %280, %315 : vector<8x32xf32>
    %c0_150 = arith.constant 0 : index
    %c0_151 = arith.constant 0 : index
    %317 = vector.load %arg24[%c0_150, %c0_151] : memref<1x32xf32, #tpu.memory_space<vmem>>, vector<1x32xf32>
    %318 = vector.broadcast %317 : vector<1x32xf32> to vector<8x32xf32>
    %319 = arith.addf %316, %318 : vector<8x32xf32>
    %c0_152 = arith.constant 0 : index
    %c0_153 = arith.constant 0 : index
    %c0_154 = arith.constant 0 : index
    %320 = vector.load %arg31[%c0_152, %c0_153, %c0_154] : memref<1x8x32xf32, #tpu.memory_space<vmem>>, vector<1x8x32xf32>
    %321 = vector.shape_cast %320 : vector<1x8x32xf32> to vector<8x32xf32>
    %322 = vector.shape_cast %319 : vector<8x32xf32> to vector<1x8x32xf32>
    tpu.vector_store %arg31[%c0_152, %c0_153, %c0_154], %322 {strides = array<i32>} : memref<1x8x32xf32, #tpu.memory_space<vmem>>, vector<1x8x32xf32>,
    return
  }
  func.func @transform_0(%arg0: i32, %arg1: i32, %arg2: memref<2xi32, #tpu.memory_space<smem>>) -> (i32, i32, i32) {
    %c0_i32 = arith.constant 0 : i32
    %c0_i32_0 = arith.constant 0 : i32
    %c0_i32_1 = arith.constant 0 : i32
    return %arg0, %c0_i32, %c0_i32_0 : i32, i32, i32
  }
  func.func @transform_1(%arg0: i32, %arg1: i32, %arg2: memref<2xi32, #tpu.memory_space<smem>>) -> (i32, i32, i32) {
    %c0_i32 = arith.constant 0 : i32
    %c0_i32_0 = arith.constant 0 : i32
    %c0_i32_1 = arith.constant 0 : i32
    return %arg0, %c0_i32, %c0_i32_0 : i32, i32, i32
  }
  func.func @transform_2(%arg0: i32, %arg1: i32, %arg2: memref<2xi32, #tpu.memory_space<smem>>) -> (i32, i32) {
    %c0_i32 = arith.constant 0 : i32
    %c0_i32_0 = arith.constant 0 : i32
    %c0_i32_1 = arith.constant 0 : i32
    return %c0_i32, %c0_i32_0 : i32, i32
  }
  func.func @transform_3(%arg0: i32, %arg1: i32, %arg2: memref<2xi32, #tpu.memory_space<smem>>) -> (i32, i32) {
    %c0_i32 = arith.constant 0 : i32
    %c0_i32_0 = arith.constant 0 : i32
    %c0_i32_1 = arith.constant 0 : i32
    return %c0_i32, %c0_i32_0 : i32, i32
  }
  func.func @transform_4(%arg0: i32, %arg1: i32, %arg2: memref<2xi32, #tpu.memory_space<smem>>) -> (i32, i32) {
    %c0_i32 = arith.constant 0 : i32
    %c0_i32_0 = arith.constant 0 : i32
    %c0_i32_1 = arith.constant 0 : i32
    return %c0_i32, %c0_i32_0 : i32, i32
  }
  func.func @transform_5(%arg0: i32, %arg1: i32, %arg2: memref<2xi32, #tpu.memory_space<smem>>) -> (i32, i32) {
    %c0_i32 = arith.constant 0 : i32
    %c0_i32_0 = arith.constant 0 : i32
    %c0_i32_1 = arith.constant 0 : i32
    return %c0_i32, %c0_i32_0 : i32, i32
  }
  func.func @transform_6(%arg0: i32, %arg1: i32, %arg2: memref<2xi32, #tpu.memory_space<smem>>) -> (i32, i32) {
    %c0_i32 = arith.constant 0 : i32
    %c0_i32_0 = arith.constant 0 : i32
    %c0_i32_1 = arith.constant 0 : i32
    return %c0_i32, %c0_i32_0 : i32, i32
  }
  func.func @transform_7(%arg0: i32, %arg1: i32, %arg2: memref<2xi32, #tpu.memory_space<smem>>) -> (i32, i32) {
    %c0_i32 = arith.constant 0 : i32
    %c0_i32_0 = arith.constant 0 : i32
    %c0_i32_1 = arith.constant 0 : i32
    return %c0_i32, %c0_i32_0 : i32, i32
  }
  func.func @transform_8(%arg0: i32, %arg1: i32, %arg2: memref<2xi32, #tpu.memory_space<smem>>) -> (i32, i32) {
    %c0_i32 = arith.constant 0 : i32
    %c0_i32_0 = arith.constant 0 : i32
    %c0_i32_1 = arith.constant 0 : i32
    return %c0_i32, %c0_i32_0 : i32, i32
  }
  func.func @transform_9(%arg0: i32, %arg1: i32, %arg2: memref<2xi32, #tpu.memory_space<smem>>) -> (i32, i32) {
    %c0_i32 = arith.constant 0 : i32
    %c0_i32_0 = arith.constant 0 : i32
    %c0_i32_1 = arith.constant 0 : i32
    return %c0_i32, %c0_i32_0 : i32, i32
  }
  func.func @transform_10(%arg0: i32, %arg1: i32, %arg2: memref<2xi32, #tpu.memory_space<smem>>) -> (i32, i32) {
    %c0_i32 = arith.constant 0 : i32
    %c0_i32_0 = arith.constant 0 : i32
    %c0_i32_1 = arith.constant 0 : i32
    return %c0_i32, %c0_i32_0 : i32, i32
  }
  func.func @transform_11(%arg0: i32, %arg1: i32, %arg2: memref<2xi32, #tpu.memory_space<smem>>) -> (i32, i32) {
    %c0_i32 = arith.constant 0 : i32
    %c0_i32_0 = arith.constant 0 : i32
    %c0_i32_1 = arith.constant 0 : i32
    return %c0_i32, %c0_i32_0 : i32, i32
  }
  func.func @transform_12(%arg0: i32, %arg1: i32, %arg2: memref<2xi32, #tpu.memory_space<smem>>) -> (i32, i32) {
    %c0_i32 = arith.constant 0 : i32
    %c0_i32_0 = arith.constant 0 : i32
    %c0_i32_1 = arith.constant 0 : i32
    return %c0_i32, %c0_i32_0 : i32, i32
  }
  func.func @transform_13(%arg0: i32, %arg1: i32, %arg2: memref<2xi32, #tpu.memory_space<smem>>) -> (i32, i32) {
    %c0_i32 = arith.constant 0 : i32
    %c0_i32_0 = arith.constant 0 : i32
    %c0_i32_1 = arith.constant 0 : i32
    return %c0_i32, %c0_i32_0 : i32, i32
  }
  func.func @transform_14(%arg0: i32, %arg1: i32, %arg2: memref<2xi32, #tpu.memory_space<smem>>) -> (i32, i32) {
    %c0_i32 = arith.constant 0 : i32
    %c0_i32_0 = arith.constant 0 : i32
    %c0_i32_1 = arith.constant 0 : i32
    return %c0_i32, %c0_i32_0 : i32, i32
  }
  func.func @transform_15(%arg0: i32, %arg1: i32, %arg2: memref<2xi32, #tpu.memory_space<smem>>) -> (i32, i32) {
    %c0_i32 = arith.constant 0 : i32
    %c0_i32_0 = arith.constant 0 : i32
    %c0_i32_1 = arith.constant 0 : i32
    return %c0_i32, %c0_i32_0 : i32, i32
  }
  func.func @transform_16(%arg0: i32, %arg1: i32, %arg2: memref<2xi32, #tpu.memory_space<smem>>) -> (i32, i32) {
    %c0_i32 = arith.constant 0 : i32
    %c0_i32_0 = arith.constant 0 : i32
    %c0_i32_1 = arith.constant 0 : i32
    return %c0_i32, %c0_i32_0 : i32, i32
  }
  func.func @transform_17(%arg0: i32, %arg1: i32, %arg2: memref<2xi32, #tpu.memory_space<smem>>) -> (i32, i32) {
    %c0_i32 = arith.constant 0 : i32
    %c0_i32_0 = arith.constant 0 : i32
    %c0_i32_1 = arith.constant 0 : i32
    return %c0_i32, %c0_i32_0 : i32, i32
  }
  func.func @transform_18(%arg0: i32, %arg1: i32, %arg2: memref<2xi32, #tpu.memory_space<smem>>) -> (i32, i32) {
    %c0_i32 = arith.constant 0 : i32
    %c0_i32_0 = arith.constant 0 : i32
    %c0_i32_1 = arith.constant 0 : i32
    return %c0_i32, %c0_i32_0 : i32, i32
  }
  func.func @transform_19(%arg0: i32, %arg1: i32, %arg2: memref<2xi32, #tpu.memory_space<smem>>) -> (i32, i32) {
    %c0_i32 = arith.constant 0 : i32
    %c0_i32_0 = arith.constant 0 : i32
    %c0_i32_1 = arith.constant 0 : i32
    return %c0_i32, %c0_i32_0 : i32, i32
  }
  func.func @transform_20(%arg0: i32, %arg1: i32, %arg2: memref<2xi32, #tpu.memory_space<smem>>) -> (i32, i32) {
    %c0_i32 = arith.constant 0 : i32
    %c0_i32_0 = arith.constant 0 : i32
    %c0_i32_1 = arith.constant 0 : i32
    return %c0_i32, %c0_i32_0 : i32, i32
  }
  func.func @transform_21(%arg0: i32, %arg1: i32, %arg2: memref<2xi32, #tpu.memory_space<smem>>) -> (i32, i32) {
    %c0_i32 = arith.constant 0 : i32
    %c0_i32_0 = arith.constant 0 : i32
    %c0_i32_1 = arith.constant 0 : i32
    return %c0_i32, %c0_i32_0 : i32, i32
  }
  func.func @transform_22(%arg0: i32, %arg1: i32, %arg2: memref<2xi32, #tpu.memory_space<smem>>) -> (i32, i32) {
    %c0_i32 = arith.constant 0 : i32
    %c0_i32_0 = arith.constant 0 : i32
    %c0_i32_1 = arith.constant 0 : i32
    return %c0_i32, %c0_i32_0 : i32, i32
  }
  func.func @transform_23(%arg0: i32, %arg1: i32, %arg2: memref<2xi32, #tpu.memory_space<smem>>) -> (i32, i32) {
    %c0_i32 = arith.constant 0 : i32
    %c0_i32_0 = arith.constant 0 : i32
    %c0_i32_1 = arith.constant 0 : i32
    return %c0_i32, %c0_i32_0 : i32, i32
  }
  func.func @transform_24(%arg0: i32, %arg1: i32, %arg2: memref<2xi32, #tpu.memory_space<smem>>) -> (i32, i32) {
    %c0_i32 = arith.constant 0 : i32
    %c0_i32_0 = arith.constant 0 : i32
    %c0_i32_1 = arith.constant 0 : i32
    return %c0_i32, %c0_i32_0 : i32, i32
  }
  func.func @transform_25(%arg0: i32, %arg1: i32, %arg2: memref<2xi32, #tpu.memory_space<smem>>) -> (i32, i32) {
    %c0_i32 = arith.constant 0 : i32
    %c0_i32_0 = arith.constant 0 : i32
    %c0_i32_1 = arith.constant 0 : i32
    return %c0_i32, %c0_i32_0 : i32, i32
  }
  func.func @transform_26(%arg0: i32, %arg1: i32, %arg2: memref<2xi32, #tpu.memory_space<smem>>) -> (i32, i32) {
    %c0_i32 = arith.constant 0 : i32
    %c0_i32_0 = arith.constant 0 : i32
    %c0_i32_1 = arith.constant 0 : i32
    return %c0_i32, %c0_i32_0 : i32, i32
  }
  func.func @transform_27(%arg0: i32, %arg1: i32, %arg2: memref<2xi32, #tpu.memory_space<smem>>) -> (i32, i32) {
    %c0_i32 = arith.constant 0 : i32
    %c0_i32_0 = arith.constant 0 : i32
    %c0_i32_1 = arith.constant 0 : i32
    return %c0_i32, %c0_i32_0 : i32, i32
  }
  func.func @transform_28(%arg0: i32, %arg1: i32, %arg2: memref<2xi32, #tpu.memory_space<smem>>) -> (i32, i32, i32) {
    %c0_i32 = arith.constant 0 : i32
    %c0_i32_0 = arith.constant 0 : i32
    return %arg0, %arg1, %c0_i32 : i32, i32, i32
  }
}

module attributes {stable_mosaic.version = 11 : i64} {
  func.func @kernel(%arg0: i32, %arg1: i32, %arg2: memref<2xi32, #tpu.memory_space<smem>>, %arg3: memref<1x16x32xbf16, #tpu.memory_space<vmem>>, %arg4: memref<1x8x32xbf16, #tpu.memory_space<vmem>>, %arg5: memref<32x32xbf16, #tpu.memory_space<vmem>>, %arg6: memref<32x32xbf16, #tpu.memory_space<vmem>>, %arg7: memref<32x32xbf16, #tpu.memory_space<vmem>>, %arg8: memref<32x32xbf16, #tpu.memory_space<vmem>>, %arg9: memref<1x32xf32, #tpu.memory_space<vmem>>, %arg10: memref<1x32xf32, #tpu.memory_space<vmem>>, %arg11: memref<1x32xf32, #tpu.memory_space<vmem>>, %arg12: memref<1x32xf32, #tpu.memory_space<vmem>>, %arg13: memref<32x32xbf16, #tpu.memory_space<vmem>>, %arg14: memref<32x32xbf16, #tpu.memory_space<vmem>>, %arg15: memref<32x32xbf16, #tpu.memory_space<vmem>>, %arg16: memref<32x32xbf16, #tpu.memory_space<vmem>>, %arg17: memref<1x32xf32, #tpu.memory_space<vmem>>, %arg18: memref<1x32xf32, #tpu.memory_space<vmem>>, %arg19: memref<1x32xf32, #tpu.memory_space<vmem>>, %arg20: memref<1x32xf32, #tpu.memory_space<vmem>>, %arg21: memref<32x64xbf16, #tpu.memory_space<vmem>>, %arg22: memref<1x64xf32, #tpu.memory_space<vmem>>, %arg23: memref<64x32xbf16, #tpu.memory_space<vmem>>, %arg24: memref<1x32xf32, #tpu.memory_space<vmem>>, %arg25: memref<1x32xf32, #tpu.memory_space<vmem>>, %arg26: memref<1x32xf32, #tpu.memory_space<vmem>>, %arg27: memref<1x32xf32, #tpu.memory_space<vmem>>, %arg28: memref<1x32xf32, #tpu.memory_space<vmem>>, %arg29: memref<1x32xf32, #tpu.memory_space<vmem>>, %arg30: memref<1x32xf32, #tpu.memory_space<vmem>>, %arg31: memref<1x8x32xf32, #tpu.memory_space<vmem>>, %arg32: memref<16x32xbf16, #tpu.memory_space<vmem>>, %arg33: memref<16x32xbf16, #tpu.memory_space<vmem>>, %arg34: memref<8x32xbf16, #tpu.memory_space<vmem>>, %arg35: memref<8x32xbf16, #tpu.memory_space<vmem>>) attributes {dimension_semantics = [#tpu.dimension_semantics<parallel>, #tpu.dimension_semantics<arbitrary>], iteration_bounds = array<i64: 2, 2>, scalar_prefetch = 1 : i64, scratch_operands = 4 : i64, tpu.core_type = #tpu.core_type<tc>, window_params = [{transform_indices = @transform_0, window_bounds = array<i64: 1, 16, 32>}, {transform_indices = @transform_1, window_bounds = array<i64: 1, 8, 32>}, {pipeline_mode = #tpu.pipeline_mode<synchronous>, transform_indices = @transform_2, window_bounds = array<i64: 32, 32>}, {pipeline_mode = #tpu.pipeline_mode<synchronous>, transform_indices = @transform_3, window_bounds = array<i64: 32, 32>}, {pipeline_mode = #tpu.pipeline_mode<synchronous>, transform_indices = @transform_4, window_bounds = array<i64: 32, 32>}, {pipeline_mode = #tpu.pipeline_mode<synchronous>, transform_indices = @transform_5, window_bounds = array<i64: 32, 32>}, {pipeline_mode = #tpu.pipeline_mode<synchronous>, transform_indices = @transform_6, window_bounds = array<i64: 1, 32>}, {pipeline_mode = #tpu.pipeline_mode<synchronous>, transform_indices = @transform_7, window_bounds = array<i64: 1, 32>}, {pipeline_mode = #tpu.pipeline_mode<synchronous>, transform_indices = @transform_8, window_bounds = array<i64: 1, 32>}, {pipeline_mode = #tpu.pipeline_mode<synchronous>, transform_indices = @transform_9, window_bounds = array<i64: 1, 32>}, {pipeline_mode = #tpu.pipeline_mode<synchronous>, transform_indices = @transform_10, window_bounds = array<i64: 32, 32>}, {pipeline_mode = #tpu.pipeline_mode<synchronous>, transform_indices = @transform_11, window_bounds = array<i64: 32, 32>}, {pipeline_mode = #tpu.pipeline_mode<synchronous>, transform_indices = @transform_12, window_bounds = array<i64: 32, 32>}, {pipeline_mode = #tpu.pipeline_mode<synchronous>, transform_indices = @transform_13, window_bounds = array<i64: 32, 32>}, {pipeline_mode = #tpu.pipeline_mode<synchronous>, transform_indices = @transform_14, window_bounds = array<i64: 1, 32>}, {pipeline_mode = #tpu.pipeline_mode<synchronous>, transform_indices = @transform_15, window_bounds = array<i64: 1, 32>}, {pipeline_mode = #tpu.pipeline_mode<synchronous>, transform_indices = @transform_16, window_bounds = array<i64: 1, 32>}, {pipeline_mode = #tpu.pipeline_mode<synchronous>, transform_indices = @transform_17, window_bounds = array<i64: 1, 32>}, {pipeline_mode = #tpu.pipeline_mode<synchronous>, transform_indices = @transform_18, window_bounds = array<i64: 32, 64>}, {pipeline_mode = #tpu.pipeline_mode<synchronous>, transform_indices = @transform_19, window_bounds = array<i64: 1, 64>}, {pipeline_mode = #tpu.pipeline_mode<synchronous>, transform_indices = @transform_20, window_bounds = array<i64: 64, 32>}, {pipeline_mode = #tpu.pipeline_mode<synchronous>, transform_indices = @transform_21, window_bounds = array<i64: 1, 32>}, {pipeline_mode = #tpu.pipeline_mode<synchronous>, transform_indices = @transform_22, window_bounds = array<i64: 1, 32>}, {pipeline_mode = #tpu.pipeline_mode<synchronous>, transform_indices = @transform_23, window_bounds = array<i64: 1, 32>}, {pipeline_mode = #tpu.pipeline_mode<synchronous>, transform_indices = @transform_24, window_bounds = array<i64: 1, 32>}, {pipeline_mode = #tpu.pipeline_mode<synchronous>, transform_indices = @transform_25, window_bounds = array<i64: 1, 32>}, {pipeline_mode = #tpu.pipeline_mode<synchronous>, transform_indices = @transform_26, window_bounds = array<i64: 1, 32>}, {pipeline_mode = #tpu.pipeline_mode<synchronous>, transform_indices = @transform_27, window_bounds = array<i64: 1, 32>}, {transform_indices = @transform_28, window_bounds = array<i64: 1, 8, 32>}]} {
    %c0_i32 = arith.constant 0 : i32
    %0 = arith.cmpi eq, %arg1, %c0_i32 : i32
    %1 = arith.extui %0 : i1 to i32
    %c0_i32_0 = arith.constant 0 : i32
    %2 = arith.cmpi ne, %1, %c0_i32_0 : i32
    scf.if %2 {
      %c0_155 = arith.constant 0 : index
      %c0_156 = arith.constant 0 : index
      %c0_157 = arith.constant 0 : index
      %323 = vector.load %arg3[%c0_155, %c0_156, %c0_157] : memref<1x16x32xbf16, #tpu.memory_space<vmem>>, vector<1x16x32xbf16>
      %324 = vector.shape_cast %323 : vector<1x16x32xbf16> to vector<16x32xbf16>
      %325 = arith.extf %324 : vector<16x32xbf16> to vector<16x32xf32>
      %c0_158 = arith.constant 0 : index
      %c0_159 = arith.constant 0 : index
      %326 = vector.load %arg25[%c0_158, %c0_159] : memref<1x32xf32, #tpu.memory_space<vmem>>, vector<1x32xf32>
      %c0_160 = arith.constant 0 : index
      %c0_161 = arith.constant 0 : index
      %327 = vector.load %arg26[%c0_160, %c0_161] : memref<1x32xf32, #tpu.memory_space<vmem>>, vector<1x32xf32>
      %cst_162 = arith.constant dense<0.000000e+00> : vector<16xf32>
      %328 = vector.multi_reduction <add>, %325, %cst_162 [1] : vector<16x32xf32> to vector<16xf32>
      %329 = vector.shape_cast %328 : vector<16xf32> to vector<16x1xf32>
      %cst_163 = arith.constant 3.200000e+01 : f32
      %330 = vector.broadcast %cst_163 : f32 to vector<16x1xf32>
      %331 = arith.divf %329, %330 : vector<16x1xf32>
      %332 = vector.broadcast %331 : vector<16x1xf32> to vector<16x32xf32>
      %333 = arith.subf %325, %332 : vector<16x32xf32>
      %334 = arith.mulf %333, %333 : vector<16x32xf32>
      %cst_164 = arith.constant dense<0.000000e+00> : vector<16xf32>
      %335 = vector.multi_reduction <add>, %334, %cst_164 [1] : vector<16x32xf32> to vector<16xf32>
      %336 = vector.shape_cast %335 : vector<16xf32> to vector<16x1xf32>
      %cst_165 = arith.constant 3.200000e+01 : f32
      %337 = vector.broadcast %cst_165 : f32 to vector<16x1xf32>
      %338 = arith.divf %336, %337 : vector<16x1xf32>
      %339 = vector.broadcast %331 : vector<16x1xf32> to vector<16x32xf32>
      %340 = arith.subf %325, %339 : vector<16x32xf32>
      %cst_166 = arith.constant 9.99999997E-7 : f32
      %341 = vector.broadcast %cst_166 : f32 to vector<16x1xf32>
      %342 = arith.addf %338, %341 : vector<16x1xf32>
      %343 = math.rsqrt %342 : vector<16x1xf32>
      %344 = vector.broadcast %343 : vector<16x1xf32> to vector<16x32xf32>
      %345 = arith.mulf %340, %344 : vector<16x32xf32>
      %346 = vector.broadcast %326 : vector<1x32xf32> to vector<16x32xf32>
      %347 = arith.mulf %345, %346 : vector<16x32xf32>
      %348 = vector.broadcast %327 : vector<1x32xf32> to vector<16x32xf32>
      %349 = arith.addf %347, %348 : vector<16x32xf32>
      %350 = arith.truncf %349 : vector<16x32xf32> to vector<16x32xbf16>
      %c0_167 = arith.constant 0 : index
      %c0_168 = arith.constant 0 : index
      %351 = vector.load %arg6[%c0_167, %c0_168] : memref<32x32xbf16, #tpu.memory_space<vmem>>, vector<32x32xbf16>
      %cst_169 = arith.constant dense<0.000000e+00> : vector<16x32xf32>
      %352 = tpu.matmul %350, %351, %cst_169 {dimension_numbers = #tpu.dot_dimension_numbers<[1], [0], [0], [1], [0, 0, 1, 1], [], []>} : vector<16x32xbf16>, vector<32x32xbf16>, vector<16x32xf32> -> vector<16x32xf32>
      %c0_170 = arith.constant 0 : index
      %c0_171 = arith.constant 0 : index
      %353 = vector.load %arg10[%c0_170, %c0_171] : memref<1x32xf32, #tpu.memory_space<vmem>>, vector<1x32xf32>
      %354 = vector.broadcast %353 : vector<1x32xf32> to vector<16x32xf32>
      %355 = arith.addf %352, %354 : vector<16x32xf32>
      %356 = arith.truncf %355 : vector<16x32xf32> to vector<16x32xbf16>
      %c0_172 = arith.constant 0 : index
      %c0_173 = arith.constant 0 : index
      %357 = vector.load %arg32[%c0_172, %c0_173] : memref<16x32xbf16, #tpu.memory_space<vmem>>, vector<16x32xbf16>
      tpu.vector_store %arg32[%c0_172, %c0_173], %356 {strides = array<i32>} : memref<16x32xbf16, #tpu.memory_space<vmem>>, vector<16x32xbf16>,
      %c0_174 = arith.constant 0 : index
      %c0_175 = arith.constant 0 : index
      %358 = vector.load %arg7[%c0_174, %c0_175] : memref<32x32xbf16, #tpu.memory_space<vmem>>, vector<32x32xbf16>
      %cst_176 = arith.constant dense<0.000000e+00> : vector<16x32xf32>
      %359 = tpu.matmul %350, %358, %cst_176 {dimension_numbers = #tpu.dot_dimension_numbers<[1], [0], [0], [1], [0, 0, 1, 1], [], []>} : vector<16x32xbf16>, vector<32x32xbf16>, vector<16x32xf32> -> vector<16x32xf32>
      %c0_177 = arith.constant 0 : index
      %c0_178 = arith.constant 0 : index
      %360 = vector.load %arg11[%c0_177, %c0_178] : memref<1x32xf32, #tpu.memory_space<vmem>>, vector<1x32xf32>
      %361 = vector.broadcast %360 : vector<1x32xf32> to vector<16x32xf32>
      %362 = arith.addf %359, %361 : vector<16x32xf32>
      %363 = arith.truncf %362 : vector<16x32xf32> to vector<16x32xbf16>
      %c0_179 = arith.constant 0 : index
      %c0_180 = arith.constant 0 : index
      %364 = vector.load %arg33[%c0_179, %c0_180] : memref<16x32xbf16, #tpu.memory_space<vmem>>, vector<16x32xbf16>
      tpu.vector_store %arg33[%c0_179, %c0_180], %363 {strides = array<i32>} : memref<16x32xbf16, #tpu.memory_space<vmem>>, vector<16x32xbf16>,
      %c0_181 = arith.constant 0 : index
      %c0_182 = arith.constant 0 : index
      %c0_183 = arith.constant 0 : index
      %365 = vector.load %arg4[%c0_181, %c0_182, %c0_183] : memref<1x8x32xbf16, #tpu.memory_space<vmem>>, vector<1x8x32xbf16>
      %366 = vector.shape_cast %365 : vector<1x8x32xbf16> to vector<8x32xbf16>
      %c0_184 = arith.constant 0 : index
      %c0_185 = arith.constant 0 : index
      %367 = vector.load %arg14[%c0_184, %c0_185] : memref<32x32xbf16, #tpu.memory_space<vmem>>, vector<32x32xbf16>
      %cst_186 = arith.constant dense<0.000000e+00> : vector<8x32xf32>
      %368 = tpu.matmul %366, %367, %cst_186 {dimension_numbers = #tpu.dot_dimension_numbers<[1], [0], [0], [1], [0, 0, 1, 1], [], []>} : vector<8x32xbf16>, vector<32x32xbf16>, vector<8x32xf32> -> vector<8x32xf32>
      %c0_187 = arith.constant 0 : index
      %c0_188 = arith.constant 0 : index
      %369 = vector.load %arg18[%c0_187, %c0_188] : memref<1x32xf32, #tpu.memory_space<vmem>>, vector<1x32xf32>
      %370 = vector.broadcast %369 : vector<1x32xf32> to vector<8x32xf32>
      %371 = arith.addf %368, %370 : vector<8x32xf32>
      %372 = arith.truncf %371 : vector<8x32xf32> to vector<8x32xbf16>
      %c0_189 = arith.constant 0 : index
      %c0_190 = arith.constant 0 : index
      %373 = vector.load %arg34[%c0_189, %c0_190] : memref<8x32xbf16, #tpu.memory_space<vmem>>, vector<8x32xbf16>
      tpu.vector_store %arg34[%c0_189, %c0_190], %372 {strides = array<i32>} : memref<8x32xbf16, #tpu.memory_space<vmem>>, vector<8x32xbf16>,
      %c0_191 = arith.constant 0 : index
      %c0_192 = arith.constant 0 : index
      %374 = vector.load %arg15[%c0_191, %c0_192] : memref<32x32xbf16, #tpu.memory_space<vmem>>, vector<32x32xbf16>
      %cst_193 = arith.constant dense<0.000000e+00> : vector<8x32xf32>
      %375 = tpu.matmul %366, %374, %cst_193 {dimension_numbers = #tpu.dot_dimension_numbers<[1], [0], [0], [1], [0, 0, 1, 1], [], []>} : vector<8x32xbf16>, vector<32x32xbf16>, vector<8x32xf32> -> vector<8x32xf32>
      %c0_194 = arith.constant 0 : index
      %c0_195 = arith.constant 0 : index
      %376 = vector.load %arg19[%c0_194, %c0_195] : memref<1x32xf32, #tpu.memory_space<vmem>>, vector<1x32xf32>
      %377 = vector.broadcast %376 : vector<1x32xf32> to vector<8x32xf32>
      %378 = arith.addf %375, %377 : vector<8x32xf32>
      %379 = arith.truncf %378 : vector<8x32xf32> to vector<8x32xbf16>
      %c0_196 = arith.constant 0 : index
      %c0_197 = arith.constant 0 : index
      %380 = vector.load %arg35[%c0_196, %c0_197] : memref<8x32xbf16, #tpu.memory_space<vmem>>, vector<8x32xbf16>
      tpu.vector_store %arg35[%c0_196, %c0_197], %379 {strides = array<i32>} : memref<8x32xbf16, #tpu.memory_space<vmem>>, vector<8x32xbf16>,
    } else {
    }
    %c8_i32 = arith.constant 8 : i32
    %3 = arith.muli %arg1, %c8_i32 : i32
    %4 = tpu.assume_multiple %3, 8 : i32
    %c0 = arith.constant 0 : index
    %5 = arith.index_cast %4 : i32 to index
    %c0_1 = arith.constant 0 : index
    %6 = vector.load %arg3[%c0, %5, %c0_1] : memref<1x16x32xbf16, #tpu.memory_space<vmem>>, vector<1x8x32xbf16>
    %7 = vector.shape_cast %6 : vector<1x8x32xbf16> to vector<8x32xbf16>
    %8 = arith.extf %7 : vector<8x32xbf16> to vector<8x32xf32>
    %9 = tpu.iota {dimensions = array<i32: 0>} : vector<8x16xi32>
    %10 = vector.broadcast %4 : i32 to vector<8x16xi32>
    %11 = arith.addi %10, %9 : vector<8x16xi32>
    %12 = tpu.iota {dimensions = array<i32: 1>} : vector<8x16xi32>
    %13 = arith.cmpi sle, %12, %11 : vector<8x16xi32>
    %cst = arith.constant 0.000000e+00 : f32
    %cst_2 = arith.constant -1.000000e+09 : f32
    %14 = vector.broadcast %cst : f32 to vector<8x16xf32>
    %15 = vector.broadcast %cst_2 : f32 to vector<8x16xf32>
    %16 = arith.select %13, %14, %15 : vector<8x16xi1>, vector<8x16xf32>
    %17 = arith.index_cast %arg0 : i32 to index
    %18 = memref.load %arg2[%17] : memref<2xi32, #tpu.memory_space<smem>>
    %19 = tpu.iota {dimensions = array<i32: 1>} : vector<8x8xi32>
    %20 = vector.broadcast %18 : i32 to vector<8x8xi32>
    %21 = arith.cmpi slt, %19, %20 : vector<8x8xi32>
    %cst_3 = arith.constant 0.000000e+00 : f32
    %cst_4 = arith.constant -1.000000e+09 : f32
    %22 = vector.broadcast %cst_3 : f32 to vector<8x8xf32>
    %23 = vector.broadcast %cst_4 : f32 to vector<8x8xf32>
    %24 = arith.select %21, %22, %23 : vector<8x8xi1>, vector<8x8xf32>
    %c0_5 = arith.constant 0 : index
    %c0_6 = arith.constant 0 : index
    %25 = vector.load %arg25[%c0_5, %c0_6] : memref<1x32xf32, #tpu.memory_space<vmem>>, vector<1x32xf32>
    %c0_7 = arith.constant 0 : index
    %c0_8 = arith.constant 0 : index
    %26 = vector.load %arg26[%c0_7, %c0_8] : memref<1x32xf32, #tpu.memory_space<vmem>>, vector<1x32xf32>
    %cst_9 = arith.constant dense<0.000000e+00> : vector<8xf32>
    %27 = vector.multi_reduction <add>, %8, %cst_9 [1] : vector<8x32xf32> to vector<8xf32>
    %28 = vector.shape_cast %27 : vector<8xf32> to vector<8x1xf32>
    %cst_10 = arith.constant 3.200000e+01 : f32
    %29 = vector.broadcast %cst_10 : f32 to vector<8x1xf32>
    %30 = arith.divf %28, %29 : vector<8x1xf32>
    %31 = vector.broadcast %30 : vector<8x1xf32> to vector<8x32xf32>
    %32 = arith.subf %8, %31 : vector<8x32xf32>
    %33 = arith.mulf %32, %32 : vector<8x32xf32>
    %cst_11 = arith.constant dense<0.000000e+00> : vector<8xf32>
    %34 = vector.multi_reduction <add>, %33, %cst_11 [1] : vector<8x32xf32> to vector<8xf32>
    %35 = vector.shape_cast %34 : vector<8xf32> to vector<8x1xf32>
    %cst_12 = arith.constant 3.200000e+01 : f32
    %36 = vector.broadcast %cst_12 : f32 to vector<8x1xf32>
    %37 = arith.divf %35, %36 : vector<8x1xf32>
    %38 = vector.broadcast %30 : vector<8x1xf32> to vector<8x32xf32>
    %39 = arith.subf %8, %38 : vector<8x32xf32>
    %cst_13 = arith.constant 9.99999997E-7 : f32
    %40 = vector.broadcast %cst_13 : f32 to vector<8x1xf32>
    %41 = arith.addf %37, %40 : vector<8x1xf32>
    %42 = math.rsqrt %41 : vector<8x1xf32>
    %43 = vector.broadcast %42 : vector<8x1xf32> to vector<8x32xf32>
    %44 = arith.mulf %39, %43 : vector<8x32xf32>
    %45 = vector.broadcast %25 : vector<1x32xf32> to vector<8x32xf32>
    %46 = arith.mulf %44, %45 : vector<8x32xf32>
    %47 = vector.broadcast %26 : vector<1x32xf32> to vector<8x32xf32>
    %48 = arith.addf %46, %47 : vector<8x32xf32>
    %49 = arith.truncf %48 : vector<8x32xf32> to vector<8x32xbf16>
    %c0_14 = arith.constant 0 : index
    %c0_15 = arith.constant 0 : index
    %50 = vector.load %arg5[%c0_14, %c0_15] : memref<32x32xbf16, #tpu.memory_space<vmem>>, vector<32x32xbf16>
    %cst_16 = arith.constant dense<0.000000e+00> : vector<8x32xf32>
    %51 = tpu.matmul %49, %50, %cst_16 {dimension_numbers = #tpu.dot_dimension_numbers<[1], [0], [0], [1], [0, 0, 1, 1], [], []>} : vector<8x32xbf16>, vector<32x32xbf16>, vector<8x32xf32> -> vector<8x32xf32>
    %c0_17 = arith.constant 0 : index
    %c0_18 = arith.constant 0 : index
    %52 = vector.load %arg9[%c0_17, %c0_18] : memref<1x32xf32, #tpu.memory_space<vmem>>, vector<1x32xf32>
    %53 = vector.broadcast %52 : vector<1x32xf32> to vector<8x32xf32>
    %54 = arith.addf %51, %53 : vector<8x32xf32>
    %55 = arith.truncf %54 : vector<8x32xf32> to vector<8x32xbf16>
    %cst_19 = arith.constant 0.000000e+00 : f32
    %56 = vector.broadcast %cst_19 : f32 to vector<8x32xf32>
    %57 = vector.extract_strided_slice %55 {offsets = [0, 0], sizes = [8, 8], strides = [1, 1]} : vector<8x32xbf16> to vector<8x8xbf16>
    %c0_20 = arith.constant 0 : index
    %c0_21 = arith.constant 0 : index
    %58 = vector.load %arg32[%c0_20, %c0_21] : memref<16x32xbf16, #tpu.memory_space<vmem>>, vector<16x8xbf16>
    %c0_22 = arith.constant 0 : index
    %c0_23 = arith.constant 0 : index
    %59 = vector.load %arg33[%c0_22, %c0_23] : memref<16x32xbf16, #tpu.memory_space<vmem>>, vector<16x8xbf16>
    "tpu.trace_start"() <{level = 10 : i32, message = "td,sd->ts"}> : () -> ()
    %cst_24 = arith.constant dense<0.000000e+00> : vector<8x16xf32>
    %60 = tpu.matmul %57, %58, %cst_24 {dimension_numbers = #tpu.dot_dimension_numbers<[1], [1], [0], [0], [0, 0, 1, 0], [], []>} : vector<8x8xbf16>, vector<16x8xbf16>, vector<8x16xf32> -> vector<8x16xf32>
    "tpu.trace_stop"() : () -> ()
    %cst_25 = arith.constant 0.353553385 : f32
    %61 = vector.broadcast %cst_25 : f32 to vector<8x16xf32>
    %62 = arith.mulf %60, %61 : vector<8x16xf32>
    %63 = arith.addf %62, %16 : vector<8x16xf32>
    %cst_26 = arith.constant dense<0xFF800000> : vector<8xf32>
    %64 = vector.multi_reduction <maximumf>, %63, %cst_26 [1] : vector<8x16xf32> to vector<8xf32>
    %65 = vector.shape_cast %64 : vector<8xf32> to vector<8x1xf32>
    %66 = vector.broadcast %65 : vector<8x1xf32> to vector<8x16xf32>
    %67 = arith.subf %63, %66 : vector<8x16xf32>
    %68 = math.exp %67 : vector<8x16xf32>
    %cst_27 = arith.constant dense<0.000000e+00> : vector<8xf32>
    %69 = vector.multi_reduction <add>, %68, %cst_27 [1] : vector<8x16xf32> to vector<8xf32>
    %70 = vector.shape_cast %69 : vector<8xf32> to vector<8x1xf32>
    %71 = tpu.reciprocal %70 {approx = true} : vector<8x1xf32> -> vector<8x1xf32>
    %72 = arith.truncf %68 : vector<8x16xf32> to vector<8x16xbf16>
    %cst_28 = arith.constant dense<0.000000e+00> : vector<8x8xf32>
    %73 = tpu.matmul %72, %59, %cst_28 {dimension_numbers = #tpu.dot_dimension_numbers<[1], [0], [0], [1], [0, 0, 1, 1], [], []>} : vector<8x16xbf16>, vector<16x8xbf16>, vector<8x8xf32> -> vector<8x8xf32>
    %74 = vector.broadcast %71 : vector<8x1xf32> to vector<8x8xf32>
    %75 = arith.mulf %73, %74 : vector<8x8xf32>
    %76 = arith.truncf %75 : vector<8x8xf32> to vector<8x8xbf16>
    %c0_29 = arith.constant 0 : index
    %c0_30 = arith.constant 0 : index
    %77 = vector.load %arg8[%c0_29, %c0_30] : memref<32x32xbf16, #tpu.memory_space<vmem>>, vector<8x32xbf16>
    %cst_31 = arith.constant dense<0.000000e+00> : vector<8x32xf32>
    %78 = tpu.matmul %76, %77, %cst_31 {dimension_numbers = #tpu.dot_dimension_numbers<[1], [0], [0], [1], [0, 0, 1, 1], [], []>} : vector<8x8xbf16>, vector<8x32xbf16>, vector<8x32xf32> -> vector<8x32xf32>
    %79 = arith.addf %56, %78 : vector<8x32xf32>
    %80 = vector.extract_strided_slice %55 {offsets = [0, 8], sizes = [8, 8], strides = [1, 1]} : vector<8x32xbf16> to vector<8x8xbf16>
    %c0_32 = arith.constant 0 : index
    %c8 = arith.constant 8 : index
    %81 = vector.load %arg32[%c0_32, %c8] : memref<16x32xbf16, #tpu.memory_space<vmem>>, vector<16x8xbf16>
    %c0_33 = arith.constant 0 : index
    %c8_34 = arith.constant 8 : index
    %82 = vector.load %arg33[%c0_33, %c8_34] : memref<16x32xbf16, #tpu.memory_space<vmem>>, vector<16x8xbf16>
    "tpu.trace_start"() <{level = 10 : i32, message = "td,sd->ts"}> : () -> ()
    %cst_35 = arith.constant dense<0.000000e+00> : vector<8x16xf32>
    %83 = tpu.matmul %80, %81, %cst_35 {dimension_numbers = #tpu.dot_dimension_numbers<[1], [1], [0], [0], [0, 0, 1, 0], [], []>} : vector<8x8xbf16>, vector<16x8xbf16>, vector<8x16xf32> -> vector<8x16xf32>
    "tpu.trace_stop"() : () -> ()
    %cst_36 = arith.constant 0.353553385 : f32
    %84 = vector.broadcast %cst_36 : f32 to vector<8x16xf32>
    %85 = arith.mulf %83, %84 : vector<8x16xf32>
    %86 = arith.addf %85, %16 : vector<8x16xf32>
    %cst_37 = arith.constant dense<0xFF800000> : vector<8xf32>
    %87 = vector.multi_reduction <maximumf>, %86, %cst_37 [1] : vector<8x16xf32> to vector<8xf32>
    %88 = vector.shape_cast %87 : vector<8xf32> to vector<8x1xf32>
    %89 = vector.broadcast %88 : vector<8x1xf32> to vector<8x16xf32>
    %90 = arith.subf %86, %89 : vector<8x16xf32>
    %91 = math.exp %90 : vector<8x16xf32>
    %cst_38 = arith.constant dense<0.000000e+00> : vector<8xf32>
    %92 = vector.multi_reduction <add>, %91, %cst_38 [1] : vector<8x16xf32> to vector<8xf32>
    %93 = vector.shape_cast %92 : vector<8xf32> to vector<8x1xf32>
    %94 = tpu.reciprocal %93 {approx = true} : vector<8x1xf32> -> vector<8x1xf32>
    %95 = arith.truncf %91 : vector<8x16xf32> to vector<8x16xbf16>
    %cst_39 = arith.constant dense<0.000000e+00> : vector<8x8xf32>
    %96 = tpu.matmul %95, %82, %cst_39 {dimension_numbers = #tpu.dot_dimension_numbers<[1], [0], [0], [1], [0, 0, 1, 1], [], []>} : vector<8x16xbf16>, vector<16x8xbf16>, vector<8x8xf32> -> vector<8x8xf32>
    %97 = vector.broadcast %94 : vector<8x1xf32> to vector<8x8xf32>
    %98 = arith.mulf %96, %97 : vector<8x8xf32>
    %99 = arith.truncf %98 : vector<8x8xf32> to vector<8x8xbf16>
    %c8_40 = arith.constant 8 : index
    %c0_41 = arith.constant 0 : index
    %100 = vector.load %arg8[%c8_40, %c0_41] : memref<32x32xbf16, #tpu.memory_space<vmem>>, vector<8x32xbf16>
    %cst_42 = arith.constant dense<0.000000e+00> : vector<8x32xf32>
    %101 = tpu.matmul %99, %100, %cst_42 {dimension_numbers = #tpu.dot_dimension_numbers<[1], [0], [0], [1], [0, 0, 1, 1], [], []>} : vector<8x8xbf16>, vector<8x32xbf16>, vector<8x32xf32> -> vector<8x32xf32>
    %102 = arith.addf %79, %101 : vector<8x32xf32>
    %103 = vector.extract_strided_slice %55 {offsets = [0, 16], sizes = [8, 8], strides = [1, 1]} : vector<8x32xbf16> to vector<8x8xbf16>
    %c0_43 = arith.constant 0 : index
    %c16 = arith.constant 16 : index
    %104 = vector.load %arg32[%c0_43, %c16] : memref<16x32xbf16, #tpu.memory_space<vmem>>, vector<16x8xbf16>
    %c0_44 = arith.constant 0 : index
    %c16_45 = arith.constant 16 : index
    %105 = vector.load %arg33[%c0_44, %c16_45] : memref<16x32xbf16, #tpu.memory_space<vmem>>, vector<16x8xbf16>
    "tpu.trace_start"() <{level = 10 : i32, message = "td,sd->ts"}> : () -> ()
    %cst_46 = arith.constant dense<0.000000e+00> : vector<8x16xf32>
    %106 = tpu.matmul %103, %104, %cst_46 {dimension_numbers = #tpu.dot_dimension_numbers<[1], [1], [0], [0], [0, 0, 1, 0], [], []>} : vector<8x8xbf16>, vector<16x8xbf16>, vector<8x16xf32> -> vector<8x16xf32>
    "tpu.trace_stop"() : () -> ()
    %cst_47 = arith.constant 0.353553385 : f32
    %107 = vector.broadcast %cst_47 : f32 to vector<8x16xf32>
    %108 = arith.mulf %106, %107 : vector<8x16xf32>
    %109 = arith.addf %108, %16 : vector<8x16xf32>
    %cst_48 = arith.constant dense<0xFF800000> : vector<8xf32>
    %110 = vector.multi_reduction <maximumf>, %109, %cst_48 [1] : vector<8x16xf32> to vector<8xf32>
    %111 = vector.shape_cast %110 : vector<8xf32> to vector<8x1xf32>
    %112 = vector.broadcast %111 : vector<8x1xf32> to vector<8x16xf32>
    %113 = arith.subf %109, %112 : vector<8x16xf32>
    %114 = math.exp %113 : vector<8x16xf32>
    %cst_49 = arith.constant dense<0.000000e+00> : vector<8xf32>
    %115 = vector.multi_reduction <add>, %114, %cst_49 [1] : vector<8x16xf32> to vector<8xf32>
    %116 = vector.shape_cast %115 : vector<8xf32> to vector<8x1xf32>
    %117 = tpu.reciprocal %116 {approx = true} : vector<8x1xf32> -> vector<8x1xf32>
    %118 = arith.truncf %114 : vector<8x16xf32> to vector<8x16xbf16>
    %cst_50 = arith.constant dense<0.000000e+00> : vector<8x8xf32>
    %119 = tpu.matmul %118, %105, %cst_50 {dimension_numbers = #tpu.dot_dimension_numbers<[1], [0], [0], [1], [0, 0, 1, 1], [], []>} : vector<8x16xbf16>, vector<16x8xbf16>, vector<8x8xf32> -> vector<8x8xf32>
    %120 = vector.broadcast %117 : vector<8x1xf32> to vector<8x8xf32>
    %121 = arith.mulf %119, %120 : vector<8x8xf32>
    %122 = arith.truncf %121 : vector<8x8xf32> to vector<8x8xbf16>
    %c16_51 = arith.constant 16 : index
    %c0_52 = arith.constant 0 : index
    %123 = vector.load %arg8[%c16_51, %c0_52] : memref<32x32xbf16, #tpu.memory_space<vmem>>, vector<8x32xbf16>
    %cst_53 = arith.constant dense<0.000000e+00> : vector<8x32xf32>
    %124 = tpu.matmul %122, %123, %cst_53 {dimension_numbers = #tpu.dot_dimension_numbers<[1], [0], [0], [1], [0, 0, 1, 1], [], []>} : vector<8x8xbf16>, vector<8x32xbf16>, vector<8x32xf32> -> vector<8x32xf32>
    %125 = arith.addf %102, %124 : vector<8x32xf32>
    %126 = vector.extract_strided_slice %55 {offsets = [0, 24], sizes = [8, 8], strides = [1, 1]} : vector<8x32xbf16> to vector<8x8xbf16>
    %c0_54 = arith.constant 0 : index
    %c24 = arith.constant 24 : index
    %127 = vector.load %arg32[%c0_54, %c24] : memref<16x32xbf16, #tpu.memory_space<vmem>>, vector<16x8xbf16>
    %c0_55 = arith.constant 0 : index
    %c24_56 = arith.constant 24 : index
    %128 = vector.load %arg33[%c0_55, %c24_56] : memref<16x32xbf16, #tpu.memory_space<vmem>>, vector<16x8xbf16>
    "tpu.trace_start"() <{level = 10 : i32, message = "td,sd->ts"}> : () -> ()
    %cst_57 = arith.constant dense<0.000000e+00> : vector<8x16xf32>
    %129 = tpu.matmul %126, %127, %cst_57 {dimension_numbers = #tpu.dot_dimension_numbers<[1], [1], [0], [0], [0, 0, 1, 0], [], []>} : vector<8x8xbf16>, vector<16x8xbf16>, vector<8x16xf32> -> vector<8x16xf32>
    "tpu.trace_stop"() : () -> ()
    %cst_58 = arith.constant 0.353553385 : f32
    %130 = vector.broadcast %cst_58 : f32 to vector<8x16xf32>
    %131 = arith.mulf %129, %130 : vector<8x16xf32>
    %132 = arith.addf %131, %16 : vector<8x16xf32>
    %cst_59 = arith.constant dense<0xFF800000> : vector<8xf32>
    %133 = vector.multi_reduction <maximumf>, %132, %cst_59 [1] : vector<8x16xf32> to vector<8xf32>
    %134 = vector.shape_cast %133 : vector<8xf32> to vector<8x1xf32>
    %135 = vector.broadcast %134 : vector<8x1xf32> to vector<8x16xf32>
    %136 = arith.subf %132, %135 : vector<8x16xf32>
    %137 = math.exp %136 : vector<8x16xf32>
    %cst_60 = arith.constant dense<0.000000e+00> : vector<8xf32>
    %138 = vector.multi_reduction <add>, %137, %cst_60 [1] : vector<8x16xf32> to vector<8xf32>
    %139 = vector.shape_cast %138 : vector<8xf32> to vector<8x1xf32>
    %140 = tpu.reciprocal %139 {approx = true} : vector<8x1xf32> -> vector<8x1xf32>
    %141 = arith.truncf %137 : vector<8x16xf32> to vector<8x16xbf16>
    %cst_61 = arith.constant dense<0.000000e+00> : vector<8x8xf32>
    %142 = tpu.matmul %141, %128, %cst_61 {dimension_numbers = #tpu.dot_dimension_numbers<[1], [0], [0], [1], [0, 0, 1, 1], [], []>} : vector<8x16xbf16>, vector<16x8xbf16>, vector<8x8xf32> -> vector<8x8xf32>
    %143 = vector.broadcast %140 : vector<8x1xf32> to vector<8x8xf32>
    %144 = arith.mulf %142, %143 : vector<8x8xf32>
    %145 = arith.truncf %144 : vector<8x8xf32> to vector<8x8xbf16>
    %c24_62 = arith.constant 24 : index
    %c0_63 = arith.constant 0 : index
    %146 = vector.load %arg8[%c24_62, %c0_63] : memref<32x32xbf16, #tpu.memory_space<vmem>>, vector<8x32xbf16>
    %cst_64 = arith.constant dense<0.000000e+00> : vector<8x32xf32>
    %147 = tpu.matmul %145, %146, %cst_64 {dimension_numbers = #tpu.dot_dimension_numbers<[1], [0], [0], [1], [0, 0, 1, 1], [], []>} : vector<8x8xbf16>, vector<8x32xbf16>, vector<8x32xf32> -> vector<8x32xf32>
    %148 = arith.addf %125, %147 : vector<8x32xf32>
    %c0_65 = arith.constant 0 : index
    %c0_66 = arith.constant 0 : index
    %149 = vector.load %arg12[%c0_65, %c0_66] : memref<1x32xf32, #tpu.memory_space<vmem>>, vector<1x32xf32>
    %150 = vector.broadcast %149 : vector<1x32xf32> to vector<8x32xf32>
    %151 = arith.addf %148, %150 : vector<8x32xf32>
    %152 = arith.addf %8, %151 : vector<8x32xf32>
    %c0_67 = arith.constant 0 : index
    %c0_68 = arith.constant 0 : index
    %153 = vector.load %arg27[%c0_67, %c0_68] : memref<1x32xf32, #tpu.memory_space<vmem>>, vector<1x32xf32>
    %c0_69 = arith.constant 0 : index
    %c0_70 = arith.constant 0 : index
    %154 = vector.load %arg28[%c0_69, %c0_70] : memref<1x32xf32, #tpu.memory_space<vmem>>, vector<1x32xf32>
    %cst_71 = arith.constant dense<0.000000e+00> : vector<8xf32>
    %155 = vector.multi_reduction <add>, %152, %cst_71 [1] : vector<8x32xf32> to vector<8xf32>
    %156 = vector.shape_cast %155 : vector<8xf32> to vector<8x1xf32>
    %cst_72 = arith.constant 3.200000e+01 : f32
    %157 = vector.broadcast %cst_72 : f32 to vector<8x1xf32>
    %158 = arith.divf %156, %157 : vector<8x1xf32>
    %159 = vector.broadcast %158 : vector<8x1xf32> to vector<8x32xf32>
    %160 = arith.subf %152, %159 : vector<8x32xf32>
    %161 = arith.mulf %160, %160 : vector<8x32xf32>
    %cst_73 = arith.constant dense<0.000000e+00> : vector<8xf32>
    %162 = vector.multi_reduction <add>, %161, %cst_73 [1] : vector<8x32xf32> to vector<8xf32>
    %163 = vector.shape_cast %162 : vector<8xf32> to vector<8x1xf32>
    %cst_74 = arith.constant 3.200000e+01 : f32
    %164 = vector.broadcast %cst_74 : f32 to vector<8x1xf32>
    %165 = arith.divf %163, %164 : vector<8x1xf32>
    %166 = vector.broadcast %158 : vector<8x1xf32> to vector<8x32xf32>
    %167 = arith.subf %152, %166 : vector<8x32xf32>
    %cst_75 = arith.constant 9.99999997E-7 : f32
    %168 = vector.broadcast %cst_75 : f32 to vector<8x1xf32>
    %169 = arith.addf %165, %168 : vector<8x1xf32>
    %170 = math.rsqrt %169 : vector<8x1xf32>
    %171 = vector.broadcast %170 : vector<8x1xf32> to vector<8x32xf32>
    %172 = arith.mulf %167, %171 : vector<8x32xf32>
    %173 = vector.broadcast %153 : vector<1x32xf32> to vector<8x32xf32>
    %174 = arith.mulf %172, %173 : vector<8x32xf32>
    %175 = vector.broadcast %154 : vector<1x32xf32> to vector<8x32xf32>
    %176 = arith.addf %174, %175 : vector<8x32xf32>
    %177 = arith.truncf %176 : vector<8x32xf32> to vector<8x32xbf16>
    %c0_76 = arith.constant 0 : index
    %c0_77 = arith.constant 0 : index
    %178 = vector.load %arg13[%c0_76, %c0_77] : memref<32x32xbf16, #tpu.memory_space<vmem>>, vector<32x32xbf16>
    %cst_78 = arith.constant dense<0.000000e+00> : vector<8x32xf32>
    %179 = tpu.matmul %177, %178, %cst_78 {dimension_numbers = #tpu.dot_dimension_numbers<[1], [0], [0], [1], [0, 0, 1, 1], [], []>} : vector<8x32xbf16>, vector<32x32xbf16>, vector<8x32xf32> -> vector<8x32xf32>
    %c0_79 = arith.constant 0 : index
    %c0_80 = arith.constant 0 : index
    %180 = vector.load %arg17[%c0_79, %c0_80] : memref<1x32xf32, #tpu.memory_space<vmem>>, vector<1x32xf32>
    %181 = vector.broadcast %180 : vector<1x32xf32> to vector<8x32xf32>
    %182 = arith.addf %179, %181 : vector<8x32xf32>
    %183 = arith.truncf %182 : vector<8x32xf32> to vector<8x32xbf16>
    %cst_81 = arith.constant 0.000000e+00 : f32
    %184 = vector.broadcast %cst_81 : f32 to vector<8x32xf32>
    %185 = vector.extract_strided_slice %183 {offsets = [0, 0], sizes = [8, 8], strides = [1, 1]} : vector<8x32xbf16> to vector<8x8xbf16>
    %c0_82 = arith.constant 0 : index
    %c0_83 = arith.constant 0 : index
    %186 = vector.load %arg34[%c0_82, %c0_83] : memref<8x32xbf16, #tpu.memory_space<vmem>>, vector<8x8xbf16>
    %c0_84 = arith.constant 0 : index
    %c0_85 = arith.constant 0 : index
    %187 = vector.load %arg35[%c0_84, %c0_85] : memref<8x32xbf16, #tpu.memory_space<vmem>>, vector<8x8xbf16>
    "tpu.trace_start"() <{level = 10 : i32, message = "td,sd->ts"}> : () -> ()
    %cst_86 = arith.constant dense<0.000000e+00> : vector<8x8xf32>
    %188 = tpu.matmul %185, %186, %cst_86 {dimension_numbers = #tpu.dot_dimension_numbers<[1], [1], [0], [0], [0, 0, 1, 0], [], []>} : vector<8x8xbf16>, vector<8x8xbf16>, vector<8x8xf32> -> vector<8x8xf32>
    "tpu.trace_stop"() : () -> ()
    %cst_87 = arith.constant 0.353553385 : f32
    %189 = vector.broadcast %cst_87 : f32 to vector<8x8xf32>
    %190 = arith.mulf %188, %189 : vector<8x8xf32>
    %191 = arith.addf %190, %24 : vector<8x8xf32>
    %cst_88 = arith.constant dense<0xFF800000> : vector<8xf32>
    %192 = vector.multi_reduction <maximumf>, %191, %cst_88 [1] : vector<8x8xf32> to vector<8xf32>
    %193 = vector.shape_cast %192 : vector<8xf32> to vector<8x1xf32>
    %194 = vector.broadcast %193 : vector<8x1xf32> to vector<8x8xf32>
    %195 = arith.subf %191, %194 : vector<8x8xf32>
    %196 = math.exp %195 : vector<8x8xf32>
    %cst_89 = arith.constant dense<0.000000e+00> : vector<8xf32>
    %197 = vector.multi_reduction <add>, %196, %cst_89 [1] : vector<8x8xf32> to vector<8xf32>
    %198 = vector.shape_cast %197 : vector<8xf32> to vector<8x1xf32>
    %199 = tpu.reciprocal %198 {approx = true} : vector<8x1xf32> -> vector<8x1xf32>
    %200 = arith.truncf %196 : vector<8x8xf32> to vector<8x8xbf16>
    %cst_90 = arith.constant dense<0.000000e+00> : vector<8x8xf32>
    %201 = tpu.matmul %200, %187, %cst_90 {dimension_numbers = #tpu.dot_dimension_numbers<[1], [0], [0], [1], [0, 0, 1, 1], [], []>} : vector<8x8xbf16>, vector<8x8xbf16>, vector<8x8xf32> -> vector<8x8xf32>
    %202 = vector.broadcast %199 : vector<8x1xf32> to vector<8x8xf32>
    %203 = arith.mulf %201, %202 : vector<8x8xf32>
    %204 = arith.truncf %203 : vector<8x8xf32> to vector<8x8xbf16>
    %c0_91 = arith.constant 0 : index
    %c0_92 = arith.constant 0 : index
    %205 = vector.load %arg16[%c0_91, %c0_92] : memref<32x32xbf16, #tpu.memory_space<vmem>>, vector<8x32xbf16>
    %cst_93 = arith.constant dense<0.000000e+00> : vector<8x32xf32>
    %206 = tpu.matmul %204, %205, %cst_93 {dimension_numbers = #tpu.dot_dimension_numbers<[1], [0], [0], [1], [0, 0, 1, 1], [], []>} : vector<8x8xbf16>, vector<8x32xbf16>, vector<8x32xf32> -> vector<8x32xf32>
    %207 = arith.addf %184, %206 : vector<8x32xf32>
    %208 = vector.extract_strided_slice %183 {offsets = [0, 8], sizes = [8, 8], strides = [1, 1]} : vector<8x32xbf16> to vector<8x8xbf16>
    %c0_94 = arith.constant 0 : index
    %c8_95 = arith.constant 8 : index
    %209 = vector.load %arg34[%c0_94, %c8_95] : memref<8x32xbf16, #tpu.memory_space<vmem>>, vector<8x8xbf16>
    %c0_96 = arith.constant 0 : index
    %c8_97 = arith.constant 8 : index
    %210 = vector.load %arg35[%c0_96, %c8_97] : memref<8x32xbf16, #tpu.memory_space<vmem>>, vector<8x8xbf16>
    "tpu.trace_start"() <{level = 10 : i32, message = "td,sd->ts"}> : () -> ()
    %cst_98 = arith.constant dense<0.000000e+00> : vector<8x8xf32>
    %211 = tpu.matmul %208, %209, %cst_98 {dimension_numbers = #tpu.dot_dimension_numbers<[1], [1], [0], [0], [0, 0, 1, 0], [], []>} : vector<8x8xbf16>, vector<8x8xbf16>, vector<8x8xf32> -> vector<8x8xf32>
    "tpu.trace_stop"() : () -> ()
    %cst_99 = arith.constant 0.353553385 : f32
    %212 = vector.broadcast %cst_99 : f32 to vector<8x8xf32>
    %213 = arith.mulf %211, %212 : vector<8x8xf32>
    %214 = arith.addf %213, %24 : vector<8x8xf32>
    %cst_100 = arith.constant dense<0xFF800000> : vector<8xf32>
    %215 = vector.multi_reduction <maximumf>, %214, %cst_100 [1] : vector<8x8xf32> to vector<8xf32>
    %216 = vector.shape_cast %215 : vector<8xf32> to vector<8x1xf32>
    %217 = vector.broadcast %216 : vector<8x1xf32> to vector<8x8xf32>
    %218 = arith.subf %214, %217 : vector<8x8xf32>
    %219 = math.exp %218 : vector<8x8xf32>
    %cst_101 = arith.constant dense<0.000000e+00> : vector<8xf32>
    %220 = vector.multi_reduction <add>, %219, %cst_101 [1] : vector<8x8xf32> to vector<8xf32>
    %221 = vector.shape_cast %220 : vector<8xf32> to vector<8x1xf32>
    %222 = tpu.reciprocal %221 {approx = true} : vector<8x1xf32> -> vector<8x1xf32>
    %223 = arith.truncf %219 : vector<8x8xf32> to vector<8x8xbf16>
    %cst_102 = arith.constant dense<0.000000e+00> : vector<8x8xf32>
    %224 = tpu.matmul %223, %210, %cst_102 {dimension_numbers = #tpu.dot_dimension_numbers<[1], [0], [0], [1], [0, 0, 1, 1], [], []>} : vector<8x8xbf16>, vector<8x8xbf16>, vector<8x8xf32> -> vector<8x8xf32>
    %225 = vector.broadcast %222 : vector<8x1xf32> to vector<8x8xf32>
    %226 = arith.mulf %224, %225 : vector<8x8xf32>
    %227 = arith.truncf %226 : vector<8x8xf32> to vector<8x8xbf16>
    %c8_103 = arith.constant 8 : index
    %c0_104 = arith.constant 0 : index
    %228 = vector.load %arg16[%c8_103, %c0_104] : memref<32x32xbf16, #tpu.memory_space<vmem>>, vector<8x32xbf16>
    %cst_105 = arith.constant dense<0.000000e+00> : vector<8x32xf32>
    %229 = tpu.matmul %227, %228, %cst_105 {dimension_numbers = #tpu.dot_dimension_numbers<[1], [0], [0], [1], [0, 0, 1, 1], [], []>} : vector<8x8xbf16>, vector<8x32xbf16>, vector<8x32xf32> -> vector<8x32xf32>
    %230 = arith.addf %207, %229 : vector<8x32xf32>
    %231 = vector.extract_strided_slice %183 {offsets = [0, 16], sizes = [8, 8], strides = [1, 1]} : vector<8x32xbf16> to vector<8x8xbf16>
    %c0_106 = arith.constant 0 : index
    %c16_107 = arith.constant 16 : index
    %232 = vector.load %arg34[%c0_106, %c16_107] : memref<8x32xbf16, #tpu.memory_space<vmem>>, vector<8x8xbf16>
    %c0_108 = arith.constant 0 : index
    %c16_109 = arith.constant 16 : index
    %233 = vector.load %arg35[%c0_108, %c16_109] : memref<8x32xbf16, #tpu.memory_space<vmem>>, vector<8x8xbf16>
    "tpu.trace_start"() <{level = 10 : i32, message = "td,sd->ts"}> : () -> ()
    %cst_110 = arith.constant dense<0.000000e+00> : vector<8x8xf32>
    %234 = tpu.matmul %231, %232, %cst_110 {dimension_numbers = #tpu.dot_dimension_numbers<[1], [1], [0], [0], [0, 0, 1, 0], [], []>} : vector<8x8xbf16>, vector<8x8xbf16>, vector<8x8xf32> -> vector<8x8xf32>
    "tpu.trace_stop"() : () -> ()
    %cst_111 = arith.constant 0.353553385 : f32
    %235 = vector.broadcast %cst_111 : f32 to vector<8x8xf32>
    %236 = arith.mulf %234, %235 : vector<8x8xf32>
    %237 = arith.addf %236, %24 : vector<8x8xf32>
    %cst_112 = arith.constant dense<0xFF800000> : vector<8xf32>
    %238 = vector.multi_reduction <maximumf>, %237, %cst_112 [1] : vector<8x8xf32> to vector<8xf32>
    %239 = vector.shape_cast %238 : vector<8xf32> to vector<8x1xf32>
    %240 = vector.broadcast %239 : vector<8x1xf32> to vector<8x8xf32>
    %241 = arith.subf %237, %240 : vector<8x8xf32>
    %242 = math.exp %241 : vector<8x8xf32>
    %cst_113 = arith.constant dense<0.000000e+00> : vector<8xf32>
    %243 = vector.multi_reduction <add>, %242, %cst_113 [1] : vector<8x8xf32> to vector<8xf32>
    %244 = vector.shape_cast %243 : vector<8xf32> to vector<8x1xf32>
    %245 = tpu.reciprocal %244 {approx = true} : vector<8x1xf32> -> vector<8x1xf32>
    %246 = arith.truncf %242 : vector<8x8xf32> to vector<8x8xbf16>
    %cst_114 = arith.constant dense<0.000000e+00> : vector<8x8xf32>
    %247 = tpu.matmul %246, %233, %cst_114 {dimension_numbers = #tpu.dot_dimension_numbers<[1], [0], [0], [1], [0, 0, 1, 1], [], []>} : vector<8x8xbf16>, vector<8x8xbf16>, vector<8x8xf32> -> vector<8x8xf32>
    %248 = vector.broadcast %245 : vector<8x1xf32> to vector<8x8xf32>
    %249 = arith.mulf %247, %248 : vector<8x8xf32>
    %250 = arith.truncf %249 : vector<8x8xf32> to vector<8x8xbf16>
    %c16_115 = arith.constant 16 : index
    %c0_116 = arith.constant 0 : index
    %251 = vector.load %arg16[%c16_115, %c0_116] : memref<32x32xbf16, #tpu.memory_space<vmem>>, vector<8x32xbf16>
    %cst_117 = arith.constant dense<0.000000e+00> : vector<8x32xf32>
    %252 = tpu.matmul %250, %251, %cst_117 {dimension_numbers = #tpu.dot_dimension_numbers<[1], [0], [0], [1], [0, 0, 1, 1], [], []>} : vector<8x8xbf16>, vector<8x32xbf16>, vector<8x32xf32> -> vector<8x32xf32>
    %253 = arith.addf %230, %252 : vector<8x32xf32>
    %254 = vector.extract_strided_slice %183 {offsets = [0, 24], sizes = [8, 8], strides = [1, 1]} : vector<8x32xbf16> to vector<8x8xbf16>
    %c0_118 = arith.constant 0 : index
    %c24_119 = arith.constant 24 : index
    %255 = vector.load %arg34[%c0_118, %c24_119] : memref<8x32xbf16, #tpu.memory_space<vmem>>, vector<8x8xbf16>
    %c0_120 = arith.constant 0 : index
    %c24_121 = arith.constant 24 : index
    %256 = vector.load %arg35[%c0_120, %c24_121] : memref<8x32xbf16, #tpu.memory_space<vmem>>, vector<8x8xbf16>
    "tpu.trace_start"() <{level = 10 : i32, message = "td,sd->ts"}> : () -> ()
    %cst_122 = arith.constant dense<0.000000e+00> : vector<8x8xf32>
    %257 = tpu.matmul %254, %255, %cst_122 {dimension_numbers = #tpu.dot_dimension_numbers<[1], [1], [0], [0], [0, 0, 1, 0], [], []>} : vector<8x8xbf16>, vector<8x8xbf16>, vector<8x8xf32> -> vector<8x8xf32>
    "tpu.trace_stop"() : () -> ()
    %cst_123 = arith.constant 0.353553385 : f32
    %258 = vector.broadcast %cst_123 : f32 to vector<8x8xf32>
    %259 = arith.mulf %257, %258 : vector<8x8xf32>
    %260 = arith.addf %259, %24 : vector<8x8xf32>
    %cst_124 = arith.constant dense<0xFF800000> : vector<8xf32>
    %261 = vector.multi_reduction <maximumf>, %260, %cst_124 [1] : vector<8x8xf32> to vector<8xf32>
    %262 = vector.shape_cast %261 : vector<8xf32> to vector<8x1xf32>
    %263 = vector.broadcast %262 : vector<8x1xf32> to vector<8x8xf32>
    %264 = arith.subf %260, %263 : vector<8x8xf32>
    %265 = math.exp %264 : vector<8x8xf32>
    %cst_125 = arith.constant dense<0.000000e+00> : vector<8xf32>
    %266 = vector.multi_reduction <add>, %265, %cst_125 [1] : vector<8x8xf32> to vector<8xf32>
    %267 = vector.shape_cast %266 : vector<8xf32> to vector<8x1xf32>
    %268 = tpu.reciprocal %267 {approx = true} : vector<8x1xf32> -> vector<8x1xf32>
    %269 = arith.truncf %265 : vector<8x8xf32> to vector<8x8xbf16>
    %cst_126 = arith.constant dense<0.000000e+00> : vector<8x8xf32>
    %270 = tpu.matmul %269, %256, %cst_126 {dimension_numbers = #tpu.dot_dimension_numbers<[1], [0], [0], [1], [0, 0, 1, 1], [], []>} : vector<8x8xbf16>, vector<8x8xbf16>, vector<8x8xf32> -> vector<8x8xf32>
    %271 = vector.broadcast %268 : vector<8x1xf32> to vector<8x8xf32>
    %272 = arith.mulf %270, %271 : vector<8x8xf32>
    %273 = arith.truncf %272 : vector<8x8xf32> to vector<8x8xbf16>
    %c24_127 = arith.constant 24 : index
    %c0_128 = arith.constant 0 : index
    %274 = vector.load %arg16[%c24_127, %c0_128] : memref<32x32xbf16, #tpu.memory_space<vmem>>, vector<8x32xbf16>
    %cst_129 = arith.constant dense<0.000000e+00> : vector<8x32xf32>
    %275 = tpu.matmul %273, %274, %cst_129 {dimension_numbers = #tpu.dot_dimension_numbers<[1], [0], [0], [1], [0, 0, 1, 1], [], []>} : vector<8x8xbf16>, vector<8x32xbf16>, vector<8x32xf32> -> vector<8x32xf32>
    %276 = arith.addf %253, %275 : vector<8x32xf32>
    %c0_130 = arith.constant 0 : index
    %c0_131 = arith.constant 0 : index
    %277 = vector.load %arg20[%c0_130, %c0_131] : memref<1x32xf32, #tpu.memory_space<vmem>>, vector<1x32xf32>
    %278 = vector.broadcast %277 : vector<1x32xf32> to vector<8x32xf32>
    %279 = arith.addf %276, %278 : vector<8x32xf32>
    %280 = arith.addf %152, %279 : vector<8x32xf32>
    %c0_132 = arith.constant 0 : index
    %c0_133 = arith.constant 0 : index
    %281 = vector.load %arg29[%c0_132, %c0_133] : memref<1x32xf32, #tpu.memory_space<vmem>>, vector<1x32xf32>
    %c0_134 = arith.constant 0 : index
    %c0_135 = arith.constant 0 : index
    %282 = vector.load %arg30[%c0_134, %c0_135] : memref<1x32xf32, #tpu.memory_space<vmem>>, vector<1x32xf32>
    %cst_136 = arith.constant dense<0.000000e+00> : vector<8xf32>
    %283 = vector.multi_reduction <add>, %280, %cst_136 [1] : vector<8x32xf32> to vector<8xf32>
    %284 = vector.shape_cast %283 : vector<8xf32> to vector<8x1xf32>
    %cst_137 = arith.constant 3.200000e+01 : f32
    %285 = vector.broadcast %cst_137 : f32 to vector<8x1xf32>
    %286 = arith.divf %284, %285 : vector<8x1xf32>
    %287 = vector.broadcast %286 : vector<8x1xf32> to vector<8x32xf32>
    %288 = arith.subf %280, %287 : vector<8x32xf32>
    %289 = arith.mulf %288, %288 : vector<8x32xf32>
    %cst_138 = arith.constant dense<0.000000e+00> : vector<8xf32>
    %290 = vector.multi_reduction <add>, %289, %cst_138 [1] : vector<8x32xf32> to vector<8xf32>
    %291 = vector.shape_cast %290 : vector<8xf32> to vector<8x1xf32>
    %cst_139 = arith.constant 3.200000e+01 : f32
    %292 = vector.broadcast %cst_139 : f32 to vector<8x1xf32>
    %293 = arith.divf %291, %292 : vector<8x1xf32>
    %294 = vector.broadcast %286 : vector<8x1xf32> to vector<8x32xf32>
    %295 = arith.subf %280, %294 : vector<8x32xf32>
    %cst_140 = arith.constant 9.99999997E-7 : f32
    %296 = vector.broadcast %cst_140 : f32 to vector<8x1xf32>
    %297 = arith.addf %293, %296 : vector<8x1xf32>
    %298 = math.rsqrt %297 : vector<8x1xf32>
    %299 = vector.broadcast %298 : vector<8x1xf32> to vector<8x32xf32>
    %300 = arith.mulf %295, %299 : vector<8x32xf32>
    %301 = vector.broadcast %281 : vector<1x32xf32> to vector<8x32xf32>
    %302 = arith.mulf %300, %301 : vector<8x32xf32>
    %303 = vector.broadcast %282 : vector<1x32xf32> to vector<8x32xf32>
    %304 = arith.addf %302, %303 : vector<8x32xf32>
    %305 = arith.truncf %304 : vector<8x32xf32> to vector<8x32xbf16>
    %c0_141 = arith.constant 0 : index
    %c0_142 = arith.constant 0 : index
    %306 = vector.load %arg21[%c0_141, %c0_142] : memref<32x64xbf16, #tpu.memory_space<vmem>>, vector<32x64xbf16>
    %cst_143 = arith.constant dense<0.000000e+00> : vector<8x64xf32>
    %307 = tpu.matmul %305, %306, %cst_143 {dimension_numbers = #tpu.dot_dimension_numbers<[1], [0], [0], [1], [0, 0, 1, 1], [], []>} : vector<8x32xbf16>, vector<32x64xbf16>, vector<8x64xf32> -> vector<8x64xf32>
    %c0_144 = arith.constant 0 : index
    %c0_145 = arith.constant 0 : index
    %308 = vector.load %arg22[%c0_144, %c0_145] : memref<1x64xf32, #tpu.memory_space<vmem>>, vector<1x64xf32>
    %309 = vector.broadcast %308 : vector<1x64xf32> to vector<8x64xf32>
    %310 = arith.addf %307, %309 : vector<8x64xf32>
    %cst_146 = arith.constant 0.000000e+00 : f32
    %311 = vector.broadcast %cst_146 : f32 to vector<8x64xf32>
    %312 = arith.maximumf %310, %311 : vector<8x64xf32>
    %313 = arith.truncf %312 : vector<8x64xf32> to vector<8x64xbf16>
    %c0_147 = arith.constant 0 : index
    %c0_148 = arith.constant 0 : index
    %314 = vector.load %arg23[%c0_147, %c0_148] : memref<64x32xbf16, #tpu.memory_space<vmem>>, vector<64x32xbf16>
    %cst_149 = arith.constant dense<0.000000e+00> : vector<8x32xf32>
    %315 = tpu.matmul %313, %314, %cst_149 {dimension_numbers = #tpu.dot_dimension_numbers<[1], [0], [0], [1], [0, 0, 1, 1], [], []>} : vector<8x64xbf16>, vector<64x32xbf16>, vector<8x32xf32> -> vector<8x32xf32>
    %316 = arith.addf %280, %315 : vector<8x32xf32>
    %c0_150 = arith.constant 0 : index
    %c0_151 = arith.constant 0 : index
    %317 = vector.load %arg24[%c0_150, %c0_151] : memref<1x32xf32, #tpu.memory_space<vmem>>, vector<1x32xf32>
    %318 = vector.broadcast %317 : vector<1x32xf32> to vector<8x32xf32>
    %319 = arith.addf %316, %318 : vector<8x32xf32>
    %c0_152 = arith.constant 0 : index
    %c0_153 = arith.constant 0 : index
    %c0_154 = arith.constant 0 : index
    %320 = vector.load %arg31[%c0_152, %c0_153, %c0_154] : memref<1x8x32xf32, #tpu.memory_space<vmem>>, vector<1x8x32xf32>
    %321 = vector.shape_cast %320 : vector<1x8x32xf32> to vector<8x32xf32>
    %322 = vector.shape_cast %319 : vector<8x32xf32> to vector<1x8x32xf32>
    tpu.vector_store %arg31[%c0_152, %c0_153, %c0_154], %322 {strides = array<i32>} : memref<1x8x32xf32, #tpu.memory_space<vmem>>, vector<1x8x32xf32>,
    return
  }
  func.func @transform_0(%arg0: i32, %arg1: i32, %arg2: memref<2xi32, #tpu.memory_space<smem>>) -> (i32, i32, i32) {
    %c0_i32 = arith.constant 0 : i32
    %c0_i32_0 = arith.constant 0 : i32
    %c0_i32_1 = arith.constant 0 : i32
    return %arg0, %c0_i32, %c0_i32_0 : i32, i32, i32
  }
  func.func @transform_1(%arg0: i32, %arg1: i32, %arg2: memref<2xi32, #tpu.memory_space<smem>>) -> (i32, i32, i32) {
    %c0_i32 = arith.constant 0 : i32
    %c0_i32_0 = arith.constant 0 : i32
    %c0_i32_1 = arith.constant 0 : i32
    return %arg0, %c0_i32, %c0_i32_0 : i32, i32, i32
  }
  func.func @transform_2(%arg0: i32, %arg1: i32, %arg2: memref<2xi32, #tpu.memory_space<smem>>) -> (i32, i32) {
    %c0_i32 = arith.constant 0 : i32
    %c0_i32_0 = arith.constant 0 : i32
    %c0_i32_1 = arith.constant 0 : i32
    return %c0_i32, %c0_i32_0 : i32, i32
  }
  func.func @transform_3(%arg0: i32, %arg1: i32, %arg2: memref<2xi32, #tpu.memory_space<smem>>) -> (i32, i32) {
    %c0_i32 = arith.constant 0 : i32
    %c0_i32_0 = arith.constant 0 : i32
    %c0_i32_1 = arith.constant 0 : i32
    return %c0_i32, %c0_i32_0 : i32, i32
  }
  func.func @transform_4(%arg0: i32, %arg1: i32, %arg2: memref<2xi32, #tpu.memory_space<smem>>) -> (i32, i32) {
    %c0_i32 = arith.constant 0 : i32
    %c0_i32_0 = arith.constant 0 : i32
    %c0_i32_1 = arith.constant 0 : i32
    return %c0_i32, %c0_i32_0 : i32, i32
  }
  func.func @transform_5(%arg0: i32, %arg1: i32, %arg2: memref<2xi32, #tpu.memory_space<smem>>) -> (i32, i32) {
    %c0_i32 = arith.constant 0 : i32
    %c0_i32_0 = arith.constant 0 : i32
    %c0_i32_1 = arith.constant 0 : i32
    return %c0_i32, %c0_i32_0 : i32, i32
  }
  func.func @transform_6(%arg0: i32, %arg1: i32, %arg2: memref<2xi32, #tpu.memory_space<smem>>) -> (i32, i32) {
    %c0_i32 = arith.constant 0 : i32
    %c0_i32_0 = arith.constant 0 : i32
    %c0_i32_1 = arith.constant 0 : i32
    return %c0_i32, %c0_i32_0 : i32, i32
  }
  func.func @transform_7(%arg0: i32, %arg1: i32, %arg2: memref<2xi32, #tpu.memory_space<smem>>) -> (i32, i32) {
    %c0_i32 = arith.constant 0 : i32
    %c0_i32_0 = arith.constant 0 : i32
    %c0_i32_1 = arith.constant 0 : i32
    return %c0_i32, %c0_i32_0 : i32, i32
  }
  func.func @transform_8(%arg0: i32, %arg1: i32, %arg2: memref<2xi32, #tpu.memory_space<smem>>) -> (i32, i32) {
    %c0_i32 = arith.constant 0 : i32
    %c0_i32_0 = arith.constant 0 : i32
    %c0_i32_1 = arith.constant 0 : i32
    return %c0_i32, %c0_i32_0 : i32, i32
  }
  func.func @transform_9(%arg0: i32, %arg1: i32, %arg2: memref<2xi32, #tpu.memory_space<smem>>) -> (i32, i32) {
    %c0_i32 = arith.constant 0 : i32
    %c0_i32_0 = arith.constant 0 : i32
    %c0_i32_1 = arith.constant 0 : i32
    return %c0_i32, %c0_i32_0 : i32, i32
  }
  func.func @transform_10(%arg0: i32, %arg1: i32, %arg2: memref<2xi32, #tpu.memory_space<smem>>) -> (i32, i32) {
    %c0_i32 = arith.constant 0 : i32
    %c0_i32_0 = arith.constant 0 : i32
    %c0_i32_1 = arith.constant 0 : i32
    return %c0_i32, %c0_i32_0 : i32, i32
  }
  func.func @transform_11(%arg0: i32, %arg1: i32, %arg2: memref<2xi32, #tpu.memory_space<smem>>) -> (i32, i32) {
    %c0_i32 = arith.constant 0 : i32
    %c0_i32_0 = arith.constant 0 : i32
    %c0_i32_1 = arith.constant 0 : i32
    return %c0_i32, %c0_i32_0 : i32, i32
  }
  func.func @transform_12(%arg0: i32, %arg1: i32, %arg2: memref<2xi32, #tpu.memory_space<smem>>) -> (i32, i32) {
    %c0_i32 = arith.constant 0 : i32
    %c0_i32_0 = arith.constant 0 : i32
    %c0_i32_1 = arith.constant 0 : i32
    return %c0_i32, %c0_i32_0 : i32, i32
  }
  func.func @transform_13(%arg0: i32, %arg1: i32, %arg2: memref<2xi32, #tpu.memory_space<smem>>) -> (i32, i32) {
    %c0_i32 = arith.constant 0 : i32
    %c0_i32_0 = arith.constant 0 : i32
    %c0_i32_1 = arith.constant 0 : i32
    return %c0_i32, %c0_i32_0 : i32, i32
  }
  func.func @transform_14(%arg0: i32, %arg1: i32, %arg2: memref<2xi32, #tpu.memory_space<smem>>) -> (i32, i32) {
    %c0_i32 = arith.constant 0 : i32
    %c0_i32_0 = arith.constant 0 : i32
    %c0_i32_1 = arith.constant 0 : i32
    return %c0_i32, %c0_i32_0 : i32, i32
  }
  func.func @transform_15(%arg0: i32, %arg1: i32, %arg2: memref<2xi32, #tpu.memory_space<smem>>) -> (i32, i32) {
    %c0_i32 = arith.constant 0 : i32
    %c0_i32_0 = arith.constant 0 : i32
    %c0_i32_1 = arith.constant 0 : i32
    return %c0_i32, %c0_i32_0 : i32, i32
  }
  func.func @transform_16(%arg0: i32, %arg1: i32, %arg2: memref<2xi32, #tpu.memory_space<smem>>) -> (i32, i32) {
    %c0_i32 = arith.constant 0 : i32
    %c0_i32_0 = arith.constant 0 : i32
    %c0_i32_1 = arith.constant 0 : i32
    return %c0_i32, %c0_i32_0 : i32, i32
  }
  func.func @transform_17(%arg0: i32, %arg1: i32, %arg2: memref<2xi32, #tpu.memory_space<smem>>) -> (i32, i32) {
    %c0_i32 = arith.constant 0 : i32
    %c0_i32_0 = arith.constant 0 : i32
    %c0_i32_1 = arith.constant 0 : i32
    return %c0_i32, %c0_i32_0 : i32, i32
  }
  func.func @transform_18(%arg0: i32, %arg1: i32, %arg2: memref<2xi32, #tpu.memory_space<smem>>) -> (i32, i32) {
    %c0_i32 = arith.constant 0 : i32
    %c0_i32_0 = arith.constant 0 : i32
    %c0_i32_1 = arith.constant 0 : i32
    return %c0_i32, %c0_i32_0 : i32, i32
  }
  func.func @transform_19(%arg0: i32, %arg1: i32, %arg2: memref<2xi32, #tpu.memory_space<smem>>) -> (i32, i32) {
    %c0_i32 = arith.constant 0 : i32
    %c0_i32_0 = arith.constant 0 : i32
    %c0_i32_1 = arith.constant 0 : i32
    return %c0_i32, %c0_i32_0 : i32, i32
  }
  func.func @transform_20(%arg0: i32, %arg1: i32, %arg2: memref<2xi32, #tpu.memory_space<smem>>) -> (i32, i32) {
    %c0_i32 = arith.constant 0 : i32
    %c0_i32_0 = arith.constant 0 : i32
    %c0_i32_1 = arith.constant 0 : i32
    return %c0_i32, %c0_i32_0 : i32, i32
  }
  func.func @transform_21(%arg0: i32, %arg1: i32, %arg2: memref<2xi32, #tpu.memory_space<smem>>) -> (i32, i32) {
    %c0_i32 = arith.constant 0 : i32
    %c0_i32_0 = arith.constant 0 : i32
    %c0_i32_1 = arith.constant 0 : i32
    return %c0_i32, %c0_i32_0 : i32, i32
  }
  func.func @transform_22(%arg0: i32, %arg1: i32, %arg2: memref<2xi32, #tpu.memory_space<smem>>) -> (i32, i32) {
    %c0_i32 = arith.constant 0 : i32
    %c0_i32_0 = arith.constant 0 : i32
    %c0_i32_1 = arith.constant 0 : i32
    return %c0_i32, %c0_i32_0 : i32, i32
  }
  func.func @transform_23(%arg0: i32, %arg1: i32, %arg2: memref<2xi32, #tpu.memory_space<smem>>) -> (i32, i32) {
    %c0_i32 = arith.constant 0 : i32
    %c0_i32_0 = arith.constant 0 : i32
    %c0_i32_1 = arith.constant 0 : i32
    return %c0_i32, %c0_i32_0 : i32, i32
  }
  func.func @transform_24(%arg0: i32, %arg1: i32, %arg2: memref<2xi32, #tpu.memory_space<smem>>) -> (i32, i32) {
    %c0_i32 = arith.constant 0 : i32
    %c0_i32_0 = arith.constant 0 : i32
    %c0_i32_1 = arith.constant 0 : i32
    return %c0_i32, %c0_i32_0 : i32, i32
  }
  func.func @transform_25(%arg0: i32, %arg1: i32, %arg2: memref<2xi32, #tpu.memory_space<smem>>) -> (i32, i32) {
    %c0_i32 = arith.constant 0 : i32
    %c0_i32_0 = arith.constant 0 : i32
    %c0_i32_1 = arith.constant 0 : i32
    return %c0_i32, %c0_i32_0 : i32, i32
  }
  func.func @transform_26(%arg0: i32, %arg1: i32, %arg2: memref<2xi32, #tpu.memory_space<smem>>) -> (i32, i32) {
    %c0_i32 = arith.constant 0 : i32
    %c0_i32_0 = arith.constant 0 : i32
    %c0_i32_1 = arith.constant 0 : i32
    return %c0_i32, %c0_i32_0 : i32, i32
  }
  func.func @transform_27(%arg0: i32, %arg1: i32, %arg2: memref<2xi32, #tpu.memory_space<smem>>) -> (i32, i32) {
    %c0_i32 = arith.constant 0 : i32
    %c0_i32_0 = arith.constant 0 : i32
    %c0_i32_1 = arith.constant 0 : i32
    return %c0_i32, %c0_i32_0 : i32, i32
  }
  func.func @transform_28(%arg0: i32, %arg1: i32, %arg2: memref<2xi32, #tpu.memory_space<smem>>) -> (i32, i32, i32) {
    %c0_i32 = arith.constant 0 : i32
    %c0_i32_0 = arith.constant 0 : i32
    return %arg0, %arg1, %c0_i32 : i32, i32, i32
  }
}

</mosaic_0001>

<bundles_post_ra>
// kernel: tpu_custom_call.1
= control target key start
LH: loop header
LB: loop body
LE: loop exit
PB: predicated region body
PF: predicated region fallthrough
CT: control target
= control target key end

     0   :  { %s3781_s6 = smov 1   ;;  %s3782_s10 = smov 2   ;;  %s4570_s0 = inlined_call_operand.smem [shape: u32[30], index: -1, kind: input, shape index: {}] }
   0x1   :  { %s3840_s5 = sld [smem:[%s4570_s0]]   ;;  %s3783_s14 = smov 3  }
   0x2   :  { %s3845_s9 = sld [smem:[%s4570_s0 + %s3781_s6]]   ;;  %s3784_s18 = smov 4  }
   0x3   :  { %s3850_s13 = sld [smem:[%s4570_s0 + %s3782_s10]]   ;;  %s3785_s22 = smov 5  }
   0x4   :  { %s3855_s17 = sld [smem:[%s4570_s0 + %s3783_s14]]   ;;  %s3786_s26 = smov 6  }
   0x5   :  { %s3860_s21 = sld [smem:[%s4570_s0 + %s3784_s18]]   ;;  %s3787_s30 = smov 7  }
   0x6   :  { %s3865_s25 = sld [smem:[%s4570_s0 + %s3785_s22]]   ;;  %s3788_s4 = smov 8  }
   0x7   :  { %s3870_s29 = sld [smem:[%s4570_s0 + %s3786_s26]]   ;;  %s3789_s10 = smov 9  }
   0x8   :  { %4600 = sst [smem:[#allocation42_spill]] %s3845_s9  ;;  %s3790_s15 = smov 10  }
   0x9   :  { %4601 = sst [smem:[#allocation43_spill]] %s3850_s13  ;;  %s3791_s20 = smov 11  }
   0xa   :  { %4602 = sst [smem:[#allocation44_spill]] %s3855_s17  ;;  %s3792_s26 = smov 12  }
   0xb   :  { %4603 = sst [smem:[#allocation45_spill]] %s3860_s21  ;;  %s3793_s1 = smov 13  }
   0xc   :  { %4604 = sst [smem:[#allocation46_spill]] %s3865_s25  ;;  %s3794_s7 = smov 14  }
   0xd   :  { %s3875_s3 = sld [smem:[%s4570_s0 + %s3787_s30]]   ;;  %s3796_s22 = smov 16  }
   0xe   :  { %s3880_s8 = sld [smem:[%s4570_s0 + %s3788_s4]]   ;;  %s3797_s28 = smov 17  }
   0xf   :  { %s3885_s14 = sld [smem:[%s4570_s0 + %s3789_s10]]   ;;  %s3805_s17 = smov 25  }
  0x10   :  { %s3890_s19 = sld [smem:[%s4570_s0 + %s3790_s15]]   ;;  %s3795_s15 = smov 15  }
  0x11   :  { %s3895_s24 = sld [smem:[%s4570_s0 + %s3791_s20]]   ;;  %s3809_s2 = smov 29  }
  0x12   :  { %s3900_s30 = sld [smem:[%s4570_s0 + %s3792_s26]]   ;;  %s3808_s26 = smov 28  }
  0x13   :  { %4605 = sst [smem:[#allocation47_spill]] %s3875_s3 }
  0x14   :  { %4606 = sst [smem:[#allocation48_spill]] %s3880_s8 }
  0x15   :  { %4607 = sst [smem:[#allocation49_spill]] %s3885_s14 }
  0x16   :  { %4608 = sst [smem:[#allocation50_spill]] %s3890_s19 }
  0x17   :  { %s3905_s6 = sld [smem:[%s4570_s0 + %s3793_s1]]  }
  0x18   :  { %s3910_s12 = sld [smem:[%s4570_s0 + %s3794_s7]]   ;;  %s3798_s7 = smov 18  }
  0x19   :  { %s3915_s20 = sld [smem:[%s4570_s0 + %s3795_s15]]   ;;  %s3799_s15 = smov 19  }
  0x1a   :  { %s3920_s27 = sld [smem:[%s4570_s0 + %s3796_s22]]   ;;  %s3800_s22 = smov 20  }
  0x1b   :  { %s3925_s4 = sld [smem:[%s4570_s0 + %s3797_s28]]   ;;  %s3801_s28 = smov 21  }
  0x1c   :  { %s3930_s19 = sld [smem:[%s4570_s0 + %s3798_s7]]   ;;  %s3802_s7 = smov 22  }
  0x1d   :  { %4609 = sst [smem:[#allocation51_spill]] %s3905_s6 }
  0x1e   :  { %4610 = sst [smem:[#allocation52_spill]] %s3910_s12 }
  0x1f   :  { %s3935_s3 = sld [smem:[%s4570_s0 + %s3799_s15]]   ;;  %s3803_s15 = smov 23  }
  0x20   :  { %s3940_s1 = sld [smem:[%s4570_s0 + %s3800_s22]]   ;;  %s3804_s22 = smov 24  }
  0x21   :  { %4611 = sst [smem:[#allocation53_spill]] %s3925_s4 }
  0x22   :  { %4612 = sst [smem:[#allocation54_spill]] %s3930_s19 }
  0x23   :  { %s3945_s10 = sld [smem:[%s4570_s0 + %s3801_s28]]  }
  0x24   :  { %s3950_s16 = sld [smem:[%s4570_s0 + %s3802_s7]]   ;;  %s3806_s7 = smov 26  }
  0x25   :  { %4613 = sst [smem:[#allocation55_spill]] %s3935_s3 }
  0x26   :  { %4614 = sst [smem:[#allocation56_spill]] %s3940_s1 }
  0x27   :  { %s3955_s23 = sld [smem:[%s4570_s0 + %s3803_s15]]   ;;  %s3807_s15 = smov 27  }
  0x28   :  { %s3960_s9 = sld [smem:[%s4570_s0 + %s3804_s22]]   ;;  %s65_s22 = sshll.u32 %s3840_s5, 4  ;;  %s66_s22 = int_to_ptr.hbm [resolvable:$true] %s65_s22 }
  0x29   :  { %4615 = sst [smem:[#allocation57_spill]] %s3945_s10  ;;  %s3199_s10 = scalar_lea.hbm %s3840_s5, 1 }
  0x2a   :  { %4616 = sst [smem:[#allocation58_spill]] %s3950_s16 }
  0x2b   :  { %s3965_s14 = sld [smem:[%s4570_s0 + %s3805_s17]]  }
  0x2c   :  { %s3970_s8 = sld [smem:[%s4570_s0 + %s3806_s7]]   ;;  %s3195_s7 = sshra.s32 %s66_s22, 4  ;;  %s3196_s7 = int_to_ptr.hbm [resolvable:$true] %s3195_s7 }
  0x2d   :  { %4617 = sst [smem:[#allocation59_spill]] %s3955_s23  ;;  %s3197_s11 = scalar_lea.hbm %s3196_s7, 1 }
  0x2e   :  { %4618 = sst [smem:[#allocation60_spill]] %s3960_s9  ;;  %p3198_p0 = scmp.ne.s32.totalorder %s3196_s7, %s3197_s11 }
  0x2f   :  { %s3975_s21 = sld [smem:[%s4570_s0 + %s3807_s15]]   ;;  %p3200_p1 = scmp.lt.s32.totalorder %s3196_s7, %s3840_s5 }
  0x30   :  { %s3981_s17 = sld [smem:[%s4570_s0 + %s3808_s26]]   ;;  %p3201_p2 = scmp.lt.s32.totalorder %s3199_s10, %s3197_s11 }
  0x31   :  { %4619 = sst [smem:[#allocation61_spill]] %s3965_s14 }
  0x32   :  { %4620 = sst [smem:[#allocation62_spill]] %s3970_s8  ;;  %p3202_p3 = por %p3201_p2, %p3200_p1 }
  0x33   :  { %s3986_s16 = sld [smem:[%s4570_s0 + %s3809_s2]]  }
  0x34   :  { %p3203_p4 = pnand %p3202_p3, %p3198_p0 }
  0x35   :  { %4621 = sst [smem:[#allocation63_spill]] %s3975_s21 }
  0x36   :  { %4622 = sst [smem:[#allocation64_spill]] %s3981_s17 }
  0x39   :  { %4623 = sst [smem:[#allocation65_spill]] %s3986_s16 }
  0x3a   :  { %3206 = shalt.err (!%p3203_p4)  }
  0x3b   :  { %s3810_s9 = smov [#allocation7]  }
  0x3c   :  { %68 = dma.hbm_to_smem %s66_s22, 16, %s3810_s9, [#allocation6] }
  0x3d   :  { %3699 = dma.done.wait [#allocation6], 16 }
  0x3e   :  { %3700 = vsyncadd [#allocation6], 4294967280 }
  0x3f   :  { %71 = sfence }
  0x40   :  { %72 = vsyncpa [#allocation9], 0 }
  0x41   :  { %74 = vsyncpa [#allocation9 + $0x1], 0 }
  0x42   :  { %75 = vsyncpa [#allocation12], 0 }
  0x43   :  { %76 = vsyncpa [#allocation15], 0 }
  0x44   :  { %77 = vsyncpa [#allocation18], 0 }
  0x45   :  { %78 = vsyncpa [#allocation21], 0 }
  0x46   :  { %79 = vsyncpa [#allocation24], 0 }
  0x47   :  { %80 = vsyncpa [#allocation27], 0 }
  0x48   :  { %81 = vsyncpa [#allocation30], 0 }
  0x49   :  { %82 = vsyncpa [#allocation10], 0 }
  0x4a   :  { %84 = vsyncpa [#allocation10 + $0x1], 0  ;;  %s3990_s0 = smov 0   ;;  %s3992_s5 = smov 0  }
  0x4b   :  { %s3994_s23 = smov 0   ;;  %s3996_s14 = smov 0  }
  0x4c   :  { %s3998_s15 = smov 0   ;;  %s4000_s18 = smov 0  }
  0x4d   :  { %s4002_s22 = smov 0   ;;  %s4004_s26 = smov 0  }
  0x4e   :  { %s4006_s28 = smov 0   ;;  %s4008_s2 = smov 0  }
  0x4f   :  { %s4010_s7 = smov 0  }
  0x50 LB: > { %s4624_s19 = sld [smem:[#allocation54_spill]]  ;;  %s4575_s11 = sadd.s32 4294967295, %s3779_s7   ;;  %s3767_s26 = sphi %s4004_s26, %s4698_s26   ;;  %s3763_s22 = sphi %s4002_s22, %s4697_s22   ;;  %s3759_s18 = sphi %s4000_s18, %s4696_s18   ;;  %s3755_s15 = sphi %s3998_s15, %s4695_s15   ;;  %s3751_s14 = sphi %s3996_s14, %s4694_s14   ;;  %s3747_s23 = sphi %s3994_s23, %s4693_s23   ;;  %s3743_s5 = sphi %s3992_s5, %s4692_s5   ;;  %s3739_s0 = sphi %s3990_s0, %s4691_s0   ;;  %s3779_s7 = sphi %s4010_s7, %s90_s7   ;;  %s3775_s2 = sphi %s4008_s2, %s4700_s2   ;;  %s3771_s28 = sphi %s4006_s28, %s4699_s28  }
  0x51   : > { %s4625_s12 = sld [smem:[#allocation52_spill]]  ;;  %p2650_p5 = scmp.ge.s32.totalorder %s3779_s7, 1 }
  0x52   : > { %s4626_s8 = sld [smem:[#allocation62_spill]]  ;;  %p4049_p6 = scmp.eq.s32.totalorder %s4575_s11, 0 }
  0x53   : > { %s4627_s6 = sld [smem:[#allocation51_spill]]  ;;  %p733_p7 = scmp.lt.s32.totalorder %s3779_s7, 5 }
  0x54   : > { %s4628_s4 = sld [smem:[#allocation53_spill]]  ;;  %s3811_s17 = smov [#allocation11]  }
  0x55   : > { %s4629_s3 = sld [smem:[#allocation55_spill]]  ;;  %p4055_p8 = pnand %p2650_p5, %p733_p7 }
  0x56   : > { %s4630_s1 = sld [smem:[#allocation56_spill]]  ;;  %s752_s21 = sshll.u32 %s3811_s17, 4  ;;  %s753_s21 = int_to_ptr.vmem [resolvable:$true] %s752_s21 }
  0x57   : > { %s4631_s25 = sld [smem:[#allocation46_spill]]  ;;  %p2916_p9 = pneg %p4055_p8 }
  0x58   : > { %4632 = sst [smem:[#allocation66_spill]] %s3739_s0 }
  0x59   : > { %4633 = sst [smem:[#allocation67_spill]] %s3743_s5  ;;  %p4063_p10 = pnand %p2916_p9, %p4049_p6 }
  0x5a   : > { %4634 = sst [smem:[#allocation68_spill]] %s3747_s23 }
  0x5b   : > { %4635 = sst [smem:[#allocation69_spill]] %s3763_s22  ;;  %s790_s22 = sshll.u32 %s3895_s24, 4  ;;  %s4068_s22 = int_to_ptr.hbm [resolvable:$true] %s790_s22 }
  0x5c   : > { %4636 = sst [smem:[#allocation70_spill]] %s3767_s26  ;;  %p4072_p12 = pneg %p4063_p10 }
  0x5d   : > { %s4637_s10 = scalar_select %p4049_p6, 1, 0 }
  0x5e   : > { %s750_s9 = sshll.u32 %s4631_s25, 4  ;;  %s3214_s17 = scalar_lea.hbm %s4631_s25, 16  ;;  %s751_s9 = int_to_ptr.hbm [resolvable:$true] %s750_s9 }
  0x5f   : > { %4638 = sst [smem:[#allocation71_spill]] %s4637_s10  ;;  %s3207_s26 = sshra.s32 %s751_s9, 4  ;;  %s3208_s26 = int_to_ptr.hbm [resolvable:$true] %s3207_s26 }
  0x60   : > { %s4639_s16 = scalar_select %p4055_p8, 1, 0 }
  0x61   : > { %s3209_s13 = scalar_lea.hbm %s3208_s26, 16  ;;  %p3215_p1 = scmp.lt.s32.totalorder %s3208_s26, %s4631_s25 }
  0x62   : > { %4640 = sst [smem:[#allocation72_spill]] %s4639_s16  ;;  %p3210_p11 = scmp.ne.s32.totalorder %s3208_s26, %s3209_s13 }
  0x63   : > { %p3216_p2 = scmp.lt.s32.totalorder %s3214_s17, %s3209_s13 }
  0x64   : > { %p3212_p13 = pnand %p4072_p12, %p3210_p11 }
  0x65   : > { %p3217_p3 = por %p3216_p2, %p3215_p1 }
  0x66   : > { %p3213_p0 = pneg %p3212_p13 }
  0x68   : > { %p3218_p4 = pnand %p3217_p3, %p3213_p0 }
  0x6a   : > { %3221 = shalt.err (!%p3218_p4)
}
  0x6b   : > { %s3812_s0 = smov 64   ;;  %s3813_s5 = smov 4  }
  0x6c   : > { %2919 = dma.hbm_to_vmem [thread:$0]  (!%p4063_p10), %s751_s9, 256, %s753_s21, [#allocation12], %s3812_s0, %s3812_s0, %s3813_s5  }
  0x6d   : > { %s3814_s23 = smov [#allocation14]   ;;  %s818_s26 = sshll.u32 %s4627_s6, 4  ;;  %s4086_s26 = int_to_ptr.hbm [resolvable:$true] %s818_s26 }
  0x6e   : > { %s792_s10 = sshll.u32 %s3814_s23, 4  ;;  %s3237_s13 = sshra.s32 %s4068_s22, 4  ;;  %s793_s10 = int_to_ptr.vmem [resolvable:$true] %s792_s10  ;;  %s3238_s13 = int_to_ptr.hbm [resolvable:$true] %s3237_s13 }
  0x6f   : > { %s3239_s17 = scalar_lea.hbm %s3238_s13, 16  ;;  %s3244_s25 = scalar_lea.hbm %s3895_s24, 16 }
  0x70   : > { %p3240_p5 = scmp.ne.s32.totalorder %s3238_s13, %s3239_s17  ;;  %p3245_p11 = scmp.lt.s32.totalorder %s3238_s13, %s3895_s24 }
  0x71   : > { %p3246_p13 = scmp.lt.s32.totalorder %s3244_s25, %s3239_s17 }
  0x72   : > { %p3242_p7 = pnand %p3240_p5, %p4072_p12 }
  0x73   : > { %p3247_p0 = por %p3246_p13, %p3245_p11 }
  0x74   : > { %p3243_p9 = pneg %p3242_p7 }
  0x76   : > { %p3248_p1 = pnand %p3247_p0, %p3243_p9 }
  0x78   : > { %3251 = shalt.err (!%p3248_p1)
}
  0x79   : > { %2925 = dma.hbm_to_vmem [thread:$0]  (!%p4063_p10), %s4068_s22, 256, %s793_s10, [#allocation15], %s3812_s0, %s3812_s0, %s3813_s5  }
  0x7a   : > { %s847_s21 = sshll.u32 %s3915_s20, 4  ;;  %s3815_s23 = smov [#allocation17]   ;;  %s4100_s21 = int_to_ptr.hbm [resolvable:$true] %s847_s21 }
  0x7b   : > { %s820_s9 = sshll.u32 %s3815_s23, 4  ;;  %s3267_s25 = sshra.s32 %s4086_s26, 4  ;;  %s821_s9 = int_to_ptr.vmem [resolvable:$true] %s820_s9  ;;  %s3268_s25 = int_to_ptr.hbm [resolvable:$true] %s3267_s25 }
  0x7c   : > { %s3269_s13 = scalar_lea.hbm %s3268_s25, 16  ;;  %s3274_s17 = scalar_lea.hbm %s4627_s6, 16 }
  0x7d   : > { %p3270_p2 = scmp.ne.s32.totalorder %s3268_s25, %s3269_s13  ;;  %p3275_p5 = scmp.lt.s32.totalorder %s3268_s25, %s4627_s6 }
  0x7e   : > { %p3276_p7 = scmp.lt.s32.totalorder %s3274_s17, %s3269_s13 }
  0x7f   : > { %p3272_p3 = pnand %p3270_p2, %p4072_p12 }
  0x80   : > { %p3277_p9 = por %p3276_p7, %p3275_p5 }
  0x81   : > { %p3273_p4 = pneg %p3272_p3 }
  0x83   : > { %p3278_p11 = pnand %p3277_p9, %p3273_p4 }
  0x85   : > { %3281 = shalt.err (!%p3278_p11)
}
  0x86   : > { %2931 = dma.hbm_to_vmem [thread:$0]  (!%p4063_p10), %s4086_s26, 256, %s821_s9, [#allocation18], %s3812_s0, %s3812_s0, %s3813_s5  }
  0x87   : > { %s3816_s22 = smov [#allocation20]   ;;  %s871_s23 = sshll.u32 %s4628_s4, 4  ;;  %s4114_s23 = int_to_ptr.hbm [resolvable:$true] %s871_s23 }
  0x88   : > { %s849_s10 = sshll.u32 %s3816_s22, 4  ;;  %s3297_s25 = sshra.s32 %s4100_s21, 4  ;;  %s850_s10 = int_to_ptr.vmem [resolvable:$true] %s849_s10  ;;  %s3298_s25 = int_to_ptr.hbm [resolvable:$true] %s3297_s25 }
  0x89   : > { %s3299_s13 = scalar_lea.hbm %s3298_s25, 1  ;;  %s3304_s17 = scalar_lea.hbm %s3915_s20, 1 }
  0x8a   : > { %p3300_p13 = scmp.ne.s32.totalorder %s3298_s25, %s3299_s13  ;;  %p3305_p2 = scmp.lt.s32.totalorder %s3298_s25, %s3915_s20 }
  0x8b   : > { %p3306_p3 = scmp.lt.s32.totalorder %s3304_s17, %s3299_s13 }
  0x8c   : > { %p3302_p0 = pnand %p3300_p13, %p4072_p12 }
  0x8d   : > { %p3307_p4 = por %p3306_p3, %p3305_p2 }
  0x8e   : > { %p3303_p1 = pneg %p3302_p0 }
  0x90   : > { %p3308_p5 = pnand %p3307_p4, %p3303_p1 }
  0x92   : > { %3311 = shalt.err (!%p3308_p5)
}
  0x93   : > { %2937 = dma.hbm_to_vmem [thread:$0]  (!%p4063_p10), %s4100_s21, 16, %s850_s10, [#allocation21]  }
  0x94   : > { %s894_s26 = sshll.u32 %s4629_s3, 4  ;;  %s3817_s9 = smov [#allocation23]   ;;  %s4125_s26 = int_to_ptr.hbm [resolvable:$true] %s894_s26 }
  0x95   : > { %s873_s22 = sshll.u32 %s3817_s9, 4  ;;  %s3327_s25 = sshra.s32 %s4114_s23, 4  ;;  %s874_s22 = int_to_ptr.vmem [resolvable:$true] %s873_s22  ;;  %s3328_s25 = int_to_ptr.hbm [resolvable:$true] %s3327_s25 }
  0x96   : > { %s3329_s13 = scalar_lea.hbm %s3328_s25, 1  ;;  %s3334_s17 = scalar_lea.hbm %s4628_s4, 1 }
  0x97   : > { %p3330_p7 = scmp.ne.s32.totalorder %s3328_s25, %s3329_s13  ;;  %p3335_p13 = scmp.lt.s32.totalorder %s3328_s25, %s4628_s4 }
  0x98   : > { %p3336_p0 = scmp.lt.s32.totalorder %s3334_s17, %s3329_s13 }
  0x99   : > { %p3332_p9 = pnand %p3330_p7, %p4072_p12 }
  0x9a   : > { %p3337_p1 = por %p3336_p0, %p3335_p13 }
  0x9b   : > { %p3333_p11 = pneg %p3332_p9 }
  0x9d   : > { %p3338_p2 = pnand %p3337_p1, %p3333_p11 }
  0x9f   : > { %3341 = shalt.err (!%p3338_p2)
}
  0xa0   : > { %2943 = dma.hbm_to_vmem [thread:$0]  (!%p4063_p10), %s4114_s23, 16, %s874_s22, [#allocation24]  }
  0xa1   : > { %s3818_s21 = smov [#allocation26]   ;;  %s764_s9 = sshll.u32 %s3870_s29, 4  ;;  %s4136_s9 = int_to_ptr.hbm [resolvable:$true] %s764_s9 }
  0xa2   : > { %s896_s10 = sshll.u32 %s3818_s21, 4  ;;  %s3357_s25 = sshra.s32 %s4125_s26, 4  ;;  %s897_s10 = int_to_ptr.vmem [resolvable:$true] %s896_s10  ;;  %s3358_s25 = int_to_ptr.hbm [resolvable:$true] %s3357_s25 }
  0xa3   : > { %s3359_s13 = scalar_lea.hbm %s3358_s25, 16  ;;  %s3364_s17 = scalar_lea.hbm %s4629_s3, 16 }
  0xa4   : > { %p3360_p3 = scmp.ne.s32.totalorder %s3358_s25, %s3359_s13  ;;  %p3365_p7 = scmp.lt.s32.totalorder %s3358_s25, %s4629_s3 }
  0xa5   : > { %p3366_p9 = scmp.lt.s32.totalorder %s3364_s17, %s3359_s13 }
  0xa6   : > { %p3362_p4 = pnand %p3360_p3, %p4072_p12 }
  0xa7   : > { %p3367_p11 = por %p3366_p9, %p3365_p7 }
  0xa8   : > { %p3363_p5 = pneg %p3362_p4 }
  0xaa   : > { %p3368_p13 = pnand %p3367_p11, %p3363_p5 }
  0xac   : > { %3371 = shalt.err (!%p3368_p13)
}
  0xad   : > { %2949 = dma.hbm_to_vmem [thread:$0]  (!%p4063_p10), %s4125_s26, 256, %s897_s10, [#allocation27], %s3812_s0, %s3812_s0, %s3813_s5  }
  0xae   : > { %s804_s23 = sshll.u32 %s3900_s30, 4  ;;  %s3819_s22 = smov [#allocation13]   ;;  %s4150_s23 = int_to_ptr.hbm [resolvable:$true] %s804_s23 }
  0xaf   : > { %s766_s21 = sshll.u32 %s3819_s22, 4  ;;  %s3387_s25 = sshra.s32 %s4136_s9, 4  ;;  %s767_s21 = int_to_ptr.vmem [resolvable:$true] %s766_s21  ;;  %s3388_s25 = int_to_ptr.hbm [resolvable:$true] %s3387_s25 }
  0xb0   : > { %s3389_s13 = scalar_lea.hbm %s3388_s25, 16  ;;  %s3394_s17 = scalar_lea.hbm %s3870_s29, 16 }
  0xb1   : > { %p3390_p0 = scmp.ne.s32.totalorder %s3388_s25, %s3389_s13  ;;  %p3395_p3 = scmp.lt.s32.totalorder %s3388_s25, %s3870_s29 }
  0xb2   : > { %p3396_p4 = scmp.lt.s32.totalorder %s3394_s17, %s3389_s13 }
  0xb3   : > { %p3392_p1 = pnand %p3390_p0, %p4072_p12 }
  0xb4   : > { %p3397_p5 = por %p3396_p4, %p3395_p3 }
  0xb5   : > { %p3393_p2 = pneg %p3392_p1 }
  0xb7   : > { %p3398_p7 = pnand %p3397_p5, %p3393_p2 }
  0xb9   : > { %3401 = shalt.err (!%p3398_p7)
}
  0xba   : > { %2922 = dma.hbm_to_vmem [thread:$0]  (!%p4063_p10), %s4136_s9, 256, %s767_s21, [#allocation12], %s3812_s0, %s3812_s0, %s3813_s5  }
  0xbb   : > { %s3820_s26 = smov [#allocation16]   ;;  %s832_s22 = sshll.u32 %s4625_s12, 4  ;;  %s4164_s22 = int_to_ptr.hbm [resolvable:$true] %s832_s22 }
  0xbc   : > { %s806_s10 = sshll.u32 %s3820_s26, 4  ;;  %s3417_s25 = sshra.s32 %s4150_s23, 4  ;;  %s807_s10 = int_to_ptr.vmem [resolvable:$true] %s806_s10  ;;  %s3418_s25 = int_to_ptr.hbm [resolvable:$true] %s3417_s25 }
  0xbd   : > { %s3419_s13 = scalar_lea.hbm %s3418_s25, 16  ;;  %s3424_s17 = scalar_lea.hbm %s3900_s30, 16 }
  0xbe   : > { %p3420_p9 = scmp.ne.s32.totalorder %s3418_s25, %s3419_s13  ;;  %p3425_p0 = scmp.lt.s32.totalorder %s3418_s25, %s3900_s30 }
  0xbf   : > { %p3426_p1 = scmp.lt.s32.totalorder %s3424_s17, %s3419_s13 }
  0xc0   : > { %p3422_p11 = pnand %p3420_p9, %p4072_p12 }
  0xc1   : > { %p3427_p2 = por %p3426_p1, %p3425_p0 }
  0xc2   : > { %p3423_p13 = pneg %p3422_p11 }
  0xc4   : > { %p3428_p3 = pnand %p3427_p2, %p3423_p13 }
  0xc6   : > { %3431 = shalt.err (!%p3428_p3)
}
  0xc7   : > { %2928 = dma.hbm_to_vmem [thread:$0]  (!%p4063_p10), %s4150_s23, 256, %s807_s10, [#allocation15], %s3812_s0, %s3812_s0, %s3813_s5  }
  0xc8   : > { %s859_s9 = sshll.u32 %s3920_s27, 4  ;;  %s3821_s21 = smov [#allocation19]   ;;  %s4178_s9 = int_to_ptr.hbm [resolvable:$true] %s859_s9 }
  0xc9   : > { %s834_s26 = sshll.u32 %s3821_s21, 4  ;;  %s3447_s25 = sshra.s32 %s4164_s22, 4  ;;  %s835_s26 = int_to_ptr.vmem [resolvable:$true] %s834_s26  ;;  %s3448_s25 = int_to_ptr.hbm [resolvable:$true] %s3447_s25 }
  0xca   : > { %s3449_s13 = scalar_lea.hbm %s3448_s25, 16  ;;  %s3454_s17 = scalar_lea.hbm %s4625_s12, 16 }
  0xcb   : > { %p3450_p4 = scmp.ne.s32.totalorder %s3448_s25, %s3449_s13  ;;  %p3455_p9 = scmp.lt.s32.totalorder %s3448_s25, %s4625_s12 }
  0xcc   : > { %p3456_p11 = scmp.lt.s32.totalorder %s3454_s17, %s3449_s13 }
  0xcd   : > { %p3452_p5 = pnand %p3450_p4, %p4072_p12 }
  0xce   : > { %p3457_p13 = por %p3456_p11, %p3455_p9 }
  0xcf   : > { %p3453_p7 = pneg %p3452_p5 }
  0xd1   : > { %p3458_p0 = pnand %p3457_p13, %p3453_p7 }
  0xd3   : > { %3461 = shalt.err (!%p3458_p0)
}
  0xd4   : > { %2934 = dma.hbm_to_vmem [thread:$0]  (!%p4063_p10), %s4164_s22, 256, %s835_s26, [#allocation18], %s3812_s0, %s3812_s0, %s3813_s5  }
  0xd5   : > { %s3822_s23 = smov [#allocation22]   ;;  %s883_s21 = sshll.u32 %s4624_s19, 4  ;;  %s4192_s21 = int_to_ptr.hbm [resolvable:$true] %s883_s21 }
  0xd6   : > { %s861_s10 = sshll.u32 %s3822_s23, 4  ;;  %s3477_s25 = sshra.s32 %s4178_s9, 4  ;;  %s862_s10 = int_to_ptr.vmem [resolvable:$true] %s861_s10  ;;  %s3478_s25 = int_to_ptr.hbm [resolvable:$true] %s3477_s25 }
  0xd7   : > { %s3479_s13 = scalar_lea.hbm %s3478_s25, 1  ;;  %s3484_s17 = scalar_lea.hbm %s3920_s27, 1 }
  0xd8   : > { %p3480_p1 = scmp.ne.s32.totalorder %s3478_s25, %s3479_s13  ;;  %p3485_p4 = scmp.lt.s32.totalorder %s3478_s25, %s3920_s27 }
  0xd9   : > { %p3486_p5 = scmp.lt.s32.totalorder %s3484_s17, %s3479_s13 }
  0xda   : > { %p3482_p2 = pnand %p3480_p1, %p4072_p12 }
  0xdb   : > { %p3487_p7 = por %p3486_p5, %p3485_p4 }
  0xdc   : > { %p3483_p3 = pneg %p3482_p2 }
  0xde   : > { %p3488_p9 = pnand %p3487_p7, %p3483_p3 }
  0xe0   : > { %3491 = shalt.err (!%p3488_p9)
}
  0xe1   : > { %2940 = dma.hbm_to_vmem [thread:$0]  (!%p4063_p10), %s4178_s9, 16, %s862_s10, [#allocation21]  }
  0xe2   : > { %s909_s0 = sshll.u32 %s4630_s1, 4  ;;  %s3823_s5 = smov [#allocation25]   ;;  %s4203_s0 = int_to_ptr.hbm [resolvable:$true] %s909_s0 }
  0xe3   : > { %s885_s22 = sshll.u32 %s3823_s5, 4  ;;  %s3507_s26 = sshra.s32 %s4192_s21, 4  ;;  %s886_s22 = int_to_ptr.vmem [resolvable:$true] %s885_s22  ;;  %s3508_s26 = int_to_ptr.hbm [resolvable:$true] %s3507_s26 }
  0xe4   : > { %s3509_s23 = scalar_lea.hbm %s3508_s26, 1  ;;  %s3514_s25 = scalar_lea.hbm %s4624_s19, 1 }
  0xe5   : > { %p3510_p11 = scmp.ne.s32.totalorder %s3508_s26, %s3509_s23  ;;  %p3515_p1 = scmp.lt.s32.totalorder %s3508_s26, %s4624_s19 }
  0xe6   : > { %p3516_p2 = scmp.lt.s32.totalorder %s3514_s25, %s3509_s23 }
  0xe7   : > { %p3512_p13 = pnand %p3510_p11, %p4072_p12 }
  0xe8   : > { %p3517_p3 = por %p3516_p2, %p3515_p1 }
  0xe9   : > { %p3513_p0 = pneg %p3512_p13 }
  0xeb   : > { %p3518_p4 = pnand %p3517_p3, %p3513_p0 }
  0xed   : > { %3521 = shalt.err (!%p3518_p4)
}
  0xee   : > { %2946 = dma.hbm_to_vmem [thread:$0]  (!%p4063_p10), %s4192_s21, 16, %s886_s22, [#allocation24]  }
  0xef   : > { %s3824_s9 = smov [#allocation28]   ;;  %s936_s13 = sshll.u32 %s4626_s8, 4  ;;  %s4214_s13 = int_to_ptr.hbm [resolvable:$true] %s936_s13 }
  0xf0   : > { %s911_s10 = sshll.u32 %s3824_s9, 4  ;;  %s3537_s17 = sshra.s32 %s4203_s0, 4  ;;  %s912_s10 = int_to_ptr.vmem [resolvable:$true] %s911_s10  ;;  %s3538_s17 = int_to_ptr.hbm [resolvable:$true] %s3537_s17 }
  0xf1   : > { %s3539_s5 = scalar_lea.hbm %s3538_s17, 1  ;;  %s3544_s26 = scalar_lea.hbm %s4630_s1, 1 }
  0xf2   : > { %p3540_p5 = scmp.ne.s32.totalorder %s3538_s17, %s3539_s5  ;;  %p3545_p11 = scmp.lt.s32.totalorder %s3538_s17, %s4630_s1 }
  0xf3   : > { %p3546_p13 = scmp.lt.s32.totalorder %s3544_s26, %s3539_s5 }
  0xf4   : > { %p3542_p7 = pnand %p3540_p5, %p4072_p12 }
  0xf5   : > { %p3547_p0 = por %p3546_p13, %p3545_p11 }
  0xf6   : > { %p3543_p9 = pneg %p3542_p7 }
  0xf8   : > { %p3548_p1 = pnand %p3547_p0, %p3543_p9 }
  0xfa   : > { %3551 = shalt.err (!%p3548_p1)
}
  0xfb   : > { %2952 = dma.hbm_to_vmem [thread:$0]  (!%p4063_p10), %s4203_s0, 16, %s912_s10, [#allocation27]  }
  0xfc   : > { %s3825_s21 = smov [#allocation29]   ;;  %s3567_s23 = sshra.s32 %s4214_s13, 4  ;;  %s3568_s23 = int_to_ptr.hbm [resolvable:$true] %s3567_s23 }
  0xfd   : > { %s938_s22 = sshll.u32 %s3825_s21, 4  ;;  %s3569_s25 = scalar_lea.hbm %s3568_s23, 1  ;;  %s939_s22 = int_to_ptr.vmem [resolvable:$true] %s938_s22 }
  0xfe   : > { %p3570_p2 = scmp.ne.s32.totalorder %s3568_s23, %s3569_s25  ;;  %s3574_s9 = scalar_lea.hbm %s4626_s8, 1 }
  0xff   : > { %p3575_p5 = scmp.lt.s32.totalorder %s3568_s23, %s4626_s8  ;;  %p3576_p7 = scmp.lt.s32.totalorder %s3574_s9, %s3569_s25 }
 0x100   : > { %p3572_p3 = pnand %p3570_p2, %p4072_p12 }
 0x101   : > { %p3577_p9 = por %p3576_p7, %p3575_p5 }
 0x102   : > { %p3573_p4 = pneg %p3572_p3 }
 0x104   : > { %p3578_p11 = pnand %p3577_p9, %p3573_p4 }
 0x106   : > { %3581 = shalt.err (!%p3578_p11)
}
 0x107   : > { %s4644_s0 = sld [smem:[#allocation68_spill]]  ;;  %s2649_s10 = sadd.s32 4294967294, %s3779_s7  }
 0x108   : > { %2955 = dma.hbm_to_vmem [thread:$0]  (!%p4063_p10), %s4214_s13, 16, %s939_s22, [#allocation30]  }
 0x109   : > { %s4645_s17 = sld [smem:[#allocation67_spill]]  ;;  %s99_s5 = sadd.s32 1, %s3771_s28 }
 0x10a   : > { %s102_s11 = sadd.s32 1, %s3775_s2  ;;  %p100_p12 = scmp.ge.s32.totalorder %s99_s5, 2 }
 0x10b   : > { %s4646_s26 = sld [smem:[#allocation66_spill]]  ;;  %s135_s21 = sadd.s32 1, %s3759_s18 }
 0x10c   : > { %p142_p13 = scmp.ne.s32.totalorder %s3759_s18, %s3755_s15  ;;  %p143_p0 = scmp.eq.s32.totalorder %s3779_s7, 0 }
 0x10d   : > { %s4702_s5 = smov (%p100_p12, %s99_s5), 0  ;;  %s4704_s11 = smov (!%p100_p12, %s102_s11), %s3775_s2 }
 0x10e   : > { %p4242_p1 = por %p143_p0, %p142_p13  ;;  %p148_p10 = scmp.ne.s32.totalorder %s3755_s15, %s3751_s14 }
 0x10f   : > { %p104_p2 = scmp.ge.s32.totalorder %s4704_s11, 2  ;;  %s705_s22 = ssub.s32 %s3771_s28, %s4702_s5 }
 0x110   : > { %p4252_p3 = por %p4049_p6, %p148_p10  ;;  %s709_s25 = sadd.s32 1, %s4644_s0 }
 0x111   : > { %s4706_s11 = smov (%p104_p2, %s4704_s11), 0  ;;  %p719_p4 = scmp.ne.s32.totalorder %s4644_s0, %s4645_s17 }
 0x112   : > { %s4649_s9 = sadd.s32 4294967295, %s3779_s7   ;;  %s4650_s1 = sld [smem:[#allocation43_spill]] }
 0x113   : > { %p720_p5 = scmp.eq.s32.totalorder %s4649_s9, 3  ;;  %s132_s3 = ssub.s32 %s3775_s2, %s4706_s11 }
 0x114   : > { %p725_p7 = scmp.ne.s32.totalorder %s4645_s17, %s4646_s26  ;;  %p133_p9 = scmp.eq.s32.totalorder %s132_s3, 0 }
 0x115   : > { %s706_s14 = sor.u32 %s705_s22, %s132_s3  ;;  %p4267_p12 = por %p720_p5, %p719_p4 }
 0x116   : > { %p707_p11 = scmp.eq.s32.totalorder %s706_s14, 0  ;;  %p726_p13 = scmp.eq.s32.totalorder %s2649_s10, 3 }
 0x117   : > { %s4651_s16 = scalar_select %p4267_p12, 1, 0 }
 0x118   : > { %s4272_s4 = scalar_select %p133_p9, %s3759_s18, %s135_s21  }
 0x119   : > { %s4708_s0 = smov (!%p707_p11, %s4644_s0), %s709_s25  ;;  %p2977_p0 = scmp.lt.s32.totalorder %s3779_s7, 4 }
 0x11a   : > { %s963_s6 = sand.u32 1, %s3759_s18   ;;  %s2666_s8 = sshll.u32 %s3775_s2, 2 }
 0x11b   : > { %p4280_p10 = por %p726_p13, %p725_p7  ;;  %s2665_s17 = sshll.u32 %s963_s6, 2 }
 0x11c   : > { %s971_s3 = scalar_lea.hbm %s4650_s1, %s2666_s8  ;;  %s967_s22 = scalar_lea.vmem [#allocation8], %s2665_s17 }
 0x11d   : > { %s4652_s9 = scalar_select %p4280_p10, 1, 0 }
 0x11e   : > { %s973_s26 = sshll.u32 %s971_s3, 4  ;;  %s975_s14 = sshll.u32 %s967_s22, 4  ;;  %s974_s26 = int_to_ptr.hbm [resolvable:$true] %s973_s26  ;;  %s976_s14 = int_to_ptr.vmem [resolvable:$true] %s975_s14 }
 0x11f   : > { %p4287_p2 = pnand %p2977_p0, %p4242_p1  ;;  %s964_s10 = scalar_lea.sflag [#allocation9], %s963_s6 }
 0x120   : > { %s3597_s25 = sshra.s32 %s974_s26, 4  ;;  %s3604_s8 = scalar_lea.hbm %s4650_s1, 8  ;;  %s3598_s25 = int_to_ptr.hbm [resolvable:$true] %s3597_s25 }
 0x121   : > { %s3599_s12 = scalar_lea.hbm %s3598_s25, 4  ;;  %p3601_p5 = pneg %p4287_p2 }
 0x122   : > { %p3600_p4 = scmp.ne.s32.totalorder %s3598_s25, %s3599_s12  ;;  %p3605_p11 = scmp.lt.s32.totalorder %s3598_s25, %s4650_s1 }
 0x123   : > { %p3606_p13 = scmp.lt.s32.totalorder %s3604_s8, %s3599_s12 }
 0x124   : > { %p3602_p7 = pnand %p3601_p5, %p3600_p4 }
 0x125   : > { %p3607_p10 = por %p3606_p13, %p3605_p11 }
 0x126   : > { %p3603_p9 = pneg %p3602_p7 }
 0x128   : > { %p3608_p12 = pnand %p3607_p10, %p3603_p9 }
 0x12a   : > { %3611 = shalt.err (!%p3608_p12)
}
 0x12b   : > { %2959 = dma.hbm_to_vmem [thread:$0]  (!%p4287_p2), %s974_s26, 64, %s976_s14, %s964_s10  }
 0x12c   : > { %984 = sbr.rel (%p4055_p8) target bundleno = 4025 (0xfb9), region = 132  ;;  %s986_s6 = sand.u32 (!%p4055_p8), 1, %s3755_s15  }
 0x12d   : > { %s4300_s17 = sshll.u32 (!%p4055_p8), %s986_s6, 2  ;;  %s987_s3 = scalar_lea.sflag (!%p4055_p8), [#allocation9], %s986_s6 }
 0x12e   : > { %s990_s22 = scalar_lea.vmem (!%p4055_p8), [#allocation8], %s4300_s17 }
 0x131   : > { %3702 = dma.done.wait (%p4252_p3), %s987_s3, 64  }
 0x132   : > { %3704 = vsyncadd (%p4252_p3), %s987_s3, 4294967232 }
 0x133   : > { %3706 = dma.done.wait (%p4049_p6), [#allocation12], 512  }
 0x134   : > { %3708 = vsyncadd (%p4049_p6), [#allocation12], 4294966784 }
 0x135   : > { %3710 = dma.done.wait (%p4049_p6), [#allocation15], 512  }
 0x136   : > { %3712 = vsyncadd (%p4049_p6), [#allocation15], 4294966784 }
 0x137   : > { %3714 = dma.done.wait (%p4049_p6), [#allocation18], 512  }
 0x138   : > { %3716 = vsyncadd (%p4049_p6), [#allocation18], 4294966784 }
 0x139   : > { %3718 = dma.done.wait (%p4049_p6), [#allocation21], 32  }
 0x13a   : > { %3720 = vsyncadd (%p4049_p6), [#allocation21], 4294967264 }
 0x13b   : > { %3722 = dma.done.wait (%p4049_p6), [#allocation24], 32  }
 0x13c   : > { %3724 = vsyncadd (%p4049_p6), [#allocation24], 4294967264 }
 0x13d   : > { %3726 = dma.done.wait (%p4049_p6), [#allocation27], 272  }
 0x13e   : > { %3728 = vsyncadd (%p4049_p6), [#allocation27], 4294967024 }
 0x13f   : > { %3730 = dma.done.wait (%p4049_p6), [#allocation30], 16  }
 0x140   : > { %3732 = vsyncadd (%p4049_p6), [#allocation30], 4294967280  ;;  %s4656_s23 = sld [smem:[#allocation67_spill]] }
 0x141   : > { %s4657_s26 = sld [smem:[#allocation70_spill]] }
 0x142   : > { %s4658_s14 = sld [smem:[#allocation42_spill]] }
 0x143   : > { %s4659_s6 = sld [smem:[#allocation69_spill]] }
 0x146   : > { %s4594_s21 = sand.u32 1, %s4656_s23  }
 0x147   : > { %p1134_p8 = scmp.lt.s32.totalorder %s4657_s26, 1  ;;  %s4339_s10 = sshll.u32 %s4594_s21, 3 }
 0x149   : > { %s4710_s26 = smov (!%p1134_p8, %s4657_s26), 1  ;;  %p2685_p1 = scmp.ne.s32.totalorder %s4659_s6, 0 }
 0x14a   : > { %s2829_s25 = sshll.u32 %s4710_s26, 3  ;;  %s4660_s3 = sld [smem:[#allocation45_spill]] (!%p2685_p1) }
 0x14b   : > { %s4343_s8 = scalar_lea.vmem %s4658_s14, %s2829_s25  ;;  %1143 = sbr.rel (%p2685_p1) target bundleno = 757 (0x2f5), region = 192 }
 0x14c   : > { %s4661_s17 = sld [smem:[#allocation59_spill]] (!%p2685_p1) }
 0x14d   : > { %s4663_s12 = sld [smem:[#allocation48_spill]] (!%p2685_p1) }
 0x14e   : > { %s4664_s23 = sld [smem:[#allocation49_spill]] (!%p2685_p1) }
 0x150   : > { %v2857_v0 = vld [vmem:[%s4343_s8] sm:$0xff]   ;;  %vm1150_vm0 = vcmask 261120   ;;  %v3826_v5 = vmov 32.0   ;;  %v2835_v22 = vld [vmem:[#allocation16 + $0x8] sm:$0xff]  ;;  %v2837_v23 = vld [vmem:[#allocation17 + $0x8] sm:$0xff]  ;;  %vm1252_vm8 = vcmask 257024  }
 0x151   : > { %v2858_v1 = vunpack.c.l.bf16 %v2857_v0  ;;  %v2859_v3 = vunpack.c.h.bf16 %v2857_v0  ;;  %3137 = vrcp.f32 %v3826_v5  ;;  %1323 = vmatpush.bf16.msra.mxu2 %v2835_v22  ;;  %1358 = vmatpush.bf16.msra.mxu3 %v2837_v23  ;;  %v2834_v24 = vld [vmem:[#allocation16] sm:$0xff]  ;;  %v2836_v25 = vld [vmem:[#allocation17] sm:$0xff]  ;;  %v1293_v26 = vld [vmem:[%s990_s22] sm:$0xf]  ;;  %s4662_s22 = sld [smem:[#allocation60_spill]] }
 0x152   : > { %v2831_v27 = vld [vmem:[%s4660_s3 + $0x8] sm:$0xff]  ;;  %v2830_v30 = vld [vmem:[%s4660_s3] sm:$0xff] }
 0x153   : > { %v1151_v2 = vsel %vm1150_vm0, %v2858_v1, 0.0  ;;  %v1154_v4 = vsel %vm1150_vm0, %v2859_v3, 0.0  ;;  %v2833_v28 = vld [vmem:[#allocation11 + $0x8] sm:$0xff]  ;;  %1242 = vmatpush.bf16.msra.mxu0 %v2831_v27  ;;  %v2832_v31 = vld [vmem:[#allocation11] sm:$0xff] }
 0x154   : > { %1152 = vadd.xlane.f32.xlu0 %v1151_v2  ;;  %1281 = vmatpush.bf16.msra.mxu1 %v2833_v28  ;;  %v3131_v50 = vld [vmem:[%s4661_s17] ss:$0 sm:$0xff]  ;;  %v3133_v60 = vld [vmem:[#allocation22] ss:$0 sm:$0xff]  ;;  %v3134_v61 = vld [vmem:[#allocation23] ss:$0 sm:$0xff] }
 0x155   : > { %1324 = vmatpush.bf16.msra.mxu2 %v2834_v24  ;;  %1359 = vmatpush.bf16.msra.mxu3 %v2836_v25 }
 0x157   : > { %v3138_v6 = vpop.eup %3137  ;;  %1243 = vmatpush.bf16.msra.mxu0 %v2830_v30  ;;  %v3132_v55 = vld [vmem:[%s4662_s22] ss:$0 sm:$0xff] }
 0x158   : > { %v1158_v7 = vmul.f32 32.0, %v3138_v6  ;;  %vm1162_vm1 = vweird.f32 %v3138_v6  ;;  %2712 = vmatmul.msk.bf16.vlgmr.msra.gmra.mxu2 %vm1150_vm0, %v1293_v26  ;;  %2721 = vmatmul.msk.bf16.vlgmr.msra.gmra.mxu3 %vm1150_vm0, %v1293_v26 }
 0x159   : > { %1282 = vmatpush.bf16.msra.mxu1 %v2832_v31 }
 0x15a   : > { %v1159_v8 = vsub.f32 1.0, %v1158_v7  ;;  %v3136_v7 = vld [vmem:[%s4664_s23] ss:$0 sm:$0xff] }
 0x15c   : > { %1155 = vadd.xlane.f32.xlu0 %v1154_v4  ;;  %v1160_v9 = vmul.f32 %v3138_v6, %v1159_v8 }
 0x15e   : > { %v1161_v10 = vadd.f32 %v3138_v6, %v1160_v9 }
 0x160   : > { %v1163_v11 = vsel %vm1162_vm1, %v3138_v6, %v1161_v10  ;;  %v3135_v6 = vld [vmem:[%s4663_s12] ss:$0 sm:$0xff] }
 0x1c7   : > { %v1153_v12 = vpop.xlane.xlu0 %1152 }
 0x1c8   : > { %v1164_v13 = vmul.f32 %v1163_v11, %v1153_v12 }
 0x1ca   : > { %v1166_v14 = vsub.f32 %v2858_v1, %v1164_v13 }
 0x1cc   : > { %v1168_v15 = vmul.f32 %v1166_v14, %v1166_v14 }
 0x1ce   : > { %v1170_v16 = vsel %vm1150_vm0, %v1168_v15, 0.0 }
 0x1cf   : > { %1171 = vadd.xlane.f32.xlu1 %v1170_v16  ;;  %v1156_v17 = vpop.xlane.xlu0 %1155 }
 0x1d0   : > { %v1165_v18 = vmul.f32 %v1163_v11, %v1156_v17 }
 0x1d2   : > { %v1167_v19 = vsub.f32 %v2859_v3, %v1165_v18 }
 0x1d4   : > { %v1169_v20 = vmul.f32 %v1167_v19, %v1167_v19 }
 0x1d6   : > { %v1173_v21 = vsel %vm1150_vm0, %v1169_v20, 0.0 }
 0x1d7   : > { %1174 = vadd.xlane.f32.xlu1 %v1173_v21 }
 0x1db   : > { %v1326_v62 = vpop.f32.mrf.mxu2  ;;  %v1361_v63 = vpop.f32.mrf.mxu3 }
 0x1dc   : > { %v1327_v0 = vadd.f32 %v3133_v60, %v1326_v62  ;;  %v1362_v1 = vadd.f32 %v3134_v61, %v1361_v63 }
 0x1de   : > { %v1330_v2 = vpack.c.bf16 %v1327_v0, %v1327_v0  ;;  %v1365_v3 = vpack.c.bf16 %v1362_v1, %v1362_v1 }
 0x1e0   : > { %1331 = vst.msk [vmem:[#allocation4] sm:$0xf] %vm1252_vm8, %v1330_v2 }
 0x1e1   : > { %1366 = vst.msk [vmem:[#allocation5] sm:$0xf] %vm1252_vm8, %v1365_v3 }
 0x1e3   : > { %v1328_v4 = vpop.f32.mrf.mxu2  ;;  %v1363_v5 = vpop.f32.mrf.mxu3 }
 0x242   : > { %v1172_v29 = vpop.xlane.xlu1 %1171 }
 0x243   : > { %v1176_v32 = vmul.f32 %v1172_v29, %v1163_v11 }
 0x245   : > { %v1178_v33 = vadd.f32 1e-06, %v1176_v32 }
 0x247   : > { %3139 = vrsqrt.f32 %v1178_v33  ;;  %vm1186_vm3 = vweird.f32 %v1178_v33 }
 0x24a   : > { %v1175_v34 = vpop.xlane.xlu1 %1174 }
 0x24b   : > { %v1177_v35 = vmul.f32 %v1175_v34, %v1163_v11 }
 0x24d   : > { %v3140_v36 = vpop.eup %3139  ;;  %v1179_v37 = vadd.f32 1e-06, %v1177_v35 }
 0x24e   : > { %v1181_v38 = vmul.f32 %v3140_v36, %v1178_v33  ;;  %vm1187_vm2 = vweird.f32 %v3140_v36 }
 0x24f   : > { %3141 = vrsqrt.f32 %v1179_v37  ;;  %vm1188_vm4 = vmor %vm1186_vm3, %vm1187_vm2  ;;  %vm1196_vm6 = vweird.f32 %v1179_v37 }
 0x250   : > { %v1182_v39 = vmul.f32 %v3140_v36, %v1181_v38 }
 0x252   : > { %v1183_v40 = vmul.f32 0.5, %v1182_v39 }
 0x254   : > { %v1184_v41 = vsub.f32 1.5, %v1183_v40 }
 0x255   : > { %v3142_v42 = vpop.eup %3141 }
 0x256   : > { %v1185_v43 = vmul.f32 %v3140_v36, %v1184_v41  ;;  %v1191_v44 = vmul.f32 %v3142_v42, %v1179_v37  ;;  %vm1197_vm5 = vweird.f32 %v3142_v42 }
 0x257   : > { %vm1198_vm7 = vmor %vm1196_vm6, %vm1197_vm5 }
 0x258   : > { %v1192_v45 = vmul.f32 %v3142_v42, %v1191_v44  ;;  %v1189_v46 = vsel %vm1188_vm4, %v3140_v36, %v1185_v43 }
 0x259   : > { %v1200_v49 = vmul.f32 %v1189_v46, %v1166_v14 }
 0x25a   : > { %v1193_v47 = vmul.f32 0.5, %v1192_v45 }
 0x25b   : > { %v1205_v54 = vmul.f32 %v3131_v50, %v1200_v49 }
 0x25c   : > { %v1194_v48 = vsub.f32 1.5, %v1193_v47 }
 0x25d   : > { %v1210_v57 = vadd.f32 %v3132_v55, %v1205_v54 }
 0x25e   : > { %v1195_v51 = vmul.f32 %v3142_v42, %v1194_v48 }
 0x260   : > { %v1199_v52 = vsel %vm1198_vm7, %v3142_v42, %v1195_v51 }
 0x261   : > { %v1201_v53 = vmul.f32 %v1199_v52, %v1167_v19 }
 0x263   : > { %v1206_v56 = vmul.f32 %v3131_v50, %v1201_v53 }
 0x265   : > { %v1211_v58 = vadd.f32 %v3132_v55, %v1206_v56 }
 0x267   : > { %v1212_v59 = vpack.c.bf16 %v1211_v58, %v1210_v57 }
 0x269   : > { %2694 = vmatmul.msk.bf16.vlgmr.msra.gmra.mxu0 %vm1150_vm0, %v1212_v59  ;;  %2703 = vmatmul.msk.bf16.vlgmr.msra.gmra.mxu1 %vm1150_vm0, %v1212_v59 }
 0x2e6   : > { %v1245_v8 = vpop.f32.mrf.mxu0  ;;  %v1284_v9 = vpop.f32.mrf.mxu1 }
 0x2e7   : > { %v1246_v10 = vadd.f32 %v3135_v6, %v1245_v8  ;;  %v1285_v11 = vadd.f32 %v3136_v7, %v1284_v9 }
 0x2e9   : > { %v1250_v12 = vpack.c.bf16 %v1246_v10, %v1246_v10  ;;  %v1289_v13 = vpack.c.bf16 %v1285_v11, %v1285_v11 }
 0x2eb   : > { %1253 = vst.msk [vmem:[#allocation2] sm:$0xf] %vm1252_vm8, %v1250_v12 }
 0x2ec   : > { %1291 = vst.msk [vmem:[#allocation3] sm:$0xf] %vm1252_vm8, %v1289_v13 }
 0x2ee   : > { %v1247_v14 = vpop.f32.mrf.mxu0  ;;  %v1286_v15 = vpop.f32.mrf.mxu1 }
 0x2ef   : > { %v1248_v16 = vadd.f32 %v3135_v6, %v1247_v14  ;;  %v1287_v17 = vadd.f32 %v3136_v7, %v1286_v15 }
 0x2f1   : > { %v1251_v18 = vpack.c.bf16 %v1248_v16, %v1248_v16  ;;  %v1290_v19 = vpack.c.bf16 %v1287_v17, %v1287_v17 }
 0x2f3   : > { %1254 = vst.msk [vmem:[#allocation2 + $0x4] sm:$0xf] %vm1252_vm8, %v1251_v18 }
 0x2f4   : > { %1292 = vst.msk [vmem:[#allocation3 + $0x4] sm:$0xf] %vm1252_vm8, %v1290_v19 }
 0x2f5 PF: > { %s4665_s26 = sld [smem:[#allocation69_spill]]  ;;  %vm1388_vm9 = vcmask 261120   ;;  %v3827_v23 = vmov 32.0   ;;  %vm1473_vm11 = vcmask 64512   ;;  %s3828_s23 = smov 112   ;;  %v1374_v6 = vlaneseq }
 0x2f6   : > { %s4666_s22 = sld [smem:[#allocation44_spill]]  ;;  %3155 = vrcp.f32 %v3827_v23  ;;  %v3831_v13 = vmov -1e+09   ;;  %vm1495_vm0 = vcmask 130048   ;;  %vm1610_vm1 = vcmask 1043456   ;;  %s4681_s1 = scalar_lea.vmem [#allocation31], %s4339_s10 }
 0x2f7   : > { %v1375_v8 = vshrl.u32 %v1374_v6, 7  ;;  %v4404_v11 = vand.u32 127, %v1374_v6  ;;  %s2395_s3 = sshll.u32 %s4681_s1, 4  ;;  %p4684_p3 = scmp.ne.s32.totalorder %s4651_s16, 0  ;;  %s2396_s3 = int_to_ptr.vmem [resolvable:$true] %s2395_s3 }
 0x2fa   : > { %v2844_v37 = vld [vmem:[#allocation2] sm:$0xff] }
 0x2fb   : > { %s2722_s14 = sshll.u32 %s4665_s26, 3  ;;  %v2840_v38 = vld [vmem:[#allocation2] sm:$0xff]  ;;  %v2843_v5 = vld [vmem:[#allocation3] sm:$0xff] }
 0x2fc   : > { %s1368_s25 = sshra.s32 %s2722_s14, 3  ;;  %s4667_s12 = smov %s4666_s22  ;;  %v3156_v24 = vpop.eup %3155  ;;  %v2839_v35 = vld [vmem:[%s4666_s22 + $0x8] sm:$0xff]  ;;  %v1478_v41 = vsel %vm1473_vm11, %v2840_v38, 0  ;;  %v2842_v56 = vld [vmem:[#allocation2] sm:$0xff]  ;;  %v1376_v9 = vstv %s2722_s14 }
 0x2fd   : > { %s2723_s6 = sshll.u32 %s1368_s25, 2  ;;  %v1393_v25 = vmul.f32 32.0, %v3156_v24  ;;  %vm1397_vm10 = vweird.f32 %v3156_v24  ;;  %1456 = vmatpush.bf16.msra.mxu0 %v2839_v35  ;;  %v2838_v36 = vld [vmem:[%s4667_s12] sm:$0xff]  ;;  %s4669_s25 = sld [smem:[#allocation60_spill]]  ;;  %1487 = vmatpush.bf16.xpose.msra.mxu1 %v1478_v41  ;;  %v1377_v10 = vadd.s32 %v1376_v9, %v1375_v8  ;;  %v2841_v19 = vld [vmem:[#allocation3] sm:$0xff] }
 0x2fe   : > { %s1371_s17 = scalar_lea.vmem %s4343_s8, %s2723_s6  ;;  %s4668_s8 = sld [smem:[#allocation59_spill]]  ;;  %1523 = vmatpush.bf16.msra.mxu2 %v2841_v19  ;;  %v2847_v35 = vld [vmem:[#allocation3] sm:$0xff] }
 0x2ff   : > { %v1372_v20 = vld [vmem:[%s1371_s17] sm:$0xf]  ;;  %v1394_v26 = vsub.f32 1.0, %v1393_v25  ;;  %s4670_s6 = sld [smem:[#allocation47_spill]]  ;;  %s3829_s17 = smov 120   ;;  %vm1380_vm15 = vcmp.le.s32.totalorder %v4404_v11, %v1377_v10 }
 0x300   : > { %v4374_v21 = vunpack.c.l.bf16 %v1372_v20  ;;  %1546 = vrot.lane.b32.xlu2 %v2842_v56, %s3829_s17  ;;  %s3830_s22 = smov 104   ;;  %v4408_v14 = vsel %vm1380_vm15, 0.0, %v3831_v13  ;;  %s4671_s14 = sld [smem:[#allocation50_spill]] }
 0x301   : > { %v1395_v27 = vmul.f32 %v3156_v24, %v1394_v26  ;;  %1457 = vmatpush.bf16.msra.mxu0 %v2838_v36 }
 0x302   : > { %v1389_v22 = vsel %vm1388_vm9, %v4374_v21, 0.0 }
 0x303   : > { %1390 = vadd.xlane.f32.xlu0 %v1389_v22  ;;  %v1396_v28 = vadd.f32 %v3156_v24, %v1395_v27  ;;  %v3144_v52 = vld [vmem:[%s4669_s25] ss:$0 sm:$0xff]  ;;  %s4673_s25 = sld [smem:[#allocation70_spill]] }
 0x304   : > { %v3143_v49 = vld [vmem:[%s4668_s8] ss:$0 sm:$0xff]  ;;  %s4672_s8 = sld [smem:[#allocation61_spill]] }
 0x305   : > { %v4378_v29 = vsel %vm1397_vm10, %v3156_v24, %v1396_v28  ;;  %v3145_v57 = vld [vmem:[%s4670_s6] ss:$0 sm:$0xff]  ;;  %vm2356_vm10 = vcmask 523264  }
 0x309   : > { %s1382_s6 = sld [smem:[#allocation7 + %s4673_s25]] }
 0x35a   : > { %v1547_v0 = vpop.permute.xlu2 %1546 }
 0x35b   : > { %v1552_v1 = vsel %vm1473_vm11, %v1547_v0, 0  ;;  %v1606_v0 = vld [vmem:[#allocation13 + $0x4] sm:$0xf] }
 0x35c   : > { %1561 = vmatpush.bf16.xpose.msra.mxu3 %v1552_v1  ;;  %v1612_v1 = vsel %vm1610_vm1, %v1606_v0, 0 }
 0x35d   : > { %1621 = vmatpush.bf16.msrb.mxu0 %v1612_v1 }
 0x376   : > { %v1391_v30 = vpop.xlane.xlu0 %1390 }
 0x377   : > { %v1399_v31 = vmul.f32 %v4378_v29, %v1391_v30 }
 0x379   : > { %v1400_v32 = vsub.f32 %v4374_v21, %v1399_v31 }
 0x37b   : > { %v1401_v33 = vmul.f32 %v1400_v32, %v1400_v32 }
 0x37d   : > { %v1402_v34 = vsel %vm1388_vm9, %v1401_v33, 0.0 }
 0x37e   : > { %1403 = vadd.xlane.f32.xlu0 %v1402_v34 }
 0x392   : > { %1657 = vrot.lane.b32.xlu0 %v2844_v37, %s3828_s23 }
 0x39a   : > { %1585 = vrot.lane.b32.xlu0 %v2843_v5, %s3829_s17 }
 0x3f1   : > { %v1404_v39 = vpop.xlane.xlu0 %1403 }
 0x3f2   : > { %v1405_v40 = vmul.f32 %v1404_v39, %v4378_v29  ;;  %v2846_v39 = vld [vmem:[#allocation2] sm:$0xff] }
 0x3f4   : > { %v1406_v42 = vadd.f32 1e-06, %v1405_v40 }
 0x3f6   : > { %3157 = vrsqrt.f32 %v1406_v42  ;;  %vm1413_vm13 = vweird.f32 %v1406_v42 }
 0x3fc   : > { %v3158_v43 = vpop.eup %3157 }
 0x3fd   : > { %v1408_v44 = vmul.f32 %v3158_v43, %v1406_v42  ;;  %vm1414_vm12 = vweird.f32 %v3158_v43 }
 0x3fe   : > { %vm1415_vm14 = vmor %vm1413_vm13, %vm1414_vm12 }
 0x3ff   : > { %v1409_v45 = vmul.f32 %v3158_v43, %v1408_v44 }
 0x401   : > { %v1410_v46 = vmul.f32 0.5, %v1409_v45 }
 0x403   : > { %v1411_v47 = vsub.f32 1.5, %v1410_v46 }
 0x404   : > { %v1658_v2 = vpop.permute.xlu0 %1657 }
 0x405   : > { %v1412_v48 = vmul.f32 %v3158_v43, %v1411_v47  ;;  %v1663_v3 = vsel %vm1473_vm11, %v1658_v2, 0 }
 0x406   : > { %1672 = vmatpush.bf16.xpose.msrb.mxu3 %v1663_v3 }
 0x407   : > { %v1416_v50 = vsel %vm1415_vm14, %v3158_v43, %v1412_v48  ;;  %v1531_v48 = vld [vmem:[#allocation13] sm:$0xf] }
 0x408   : > { %v1417_v51 = vmul.f32 %v1416_v50, %v1400_v32 }
 0x40a   : > { %v1421_v53 = vmul.f32 %v3143_v49, %v1417_v51  ;;  %v1631_v49 = vsel %vm1610_vm1, %v1531_v48, 0 }
 0x40b   : > { %1640 = vmatpush.bf16.msrb.mxu1 %v1631_v49 }
 0x40c   : > { %v1425_v54 = vadd.f32 %v3144_v52, %v1421_v53  ;;  %v1586_v40 = vpop.permute.xlu0 %1585 }
 0x40d   : > { %1598 = vmatpush.bf16.msrb.mxu2 %v1586_v40 }
 0x40e   : > { %v1426_v55 = vpack.c.bf16 %v1425_v54, %v1425_v54 }
 0x410   : > { %2732 = vmatmul.msk.bf16.vlgmr.msra.gmra.mxu0 %vm1388_vm9, %v1426_v55 }
 0x48d   : > { %v1459_v58 = vpop.f32.mrf.mxu0 }
 0x48e   : > { %v1460_v59 = vadd.f32 %v3145_v57, %v1459_v58 }
 0x490   : > { %v1463_v60 = vpack.c.bf16 %v1460_v59, %v1460_v59 }
 0x492   : > { %v1537_v61 = vunpack.c.l.b16 %v1463_v60  ;;  %2737 = vmatmul.msk.bf16.vlgmr.msra.gmra.mxu1 %vm1473_vm11, %v1463_v60 }
 0x494   : > { %v1538_v62 = vpack.c.b16 %v1537_v61, %v1537_v61 }
 0x495   : > { %v1461_v63 = vpop.f32.mrf.mxu0 }
 0x496   : > { %1539 = vrot.lane.b32.xlu2 %v1538_v62, %s3829_s17 }
 0x49e   : > { %1650 = vrot.lane.b32.xlu2 %v1538_v62, %s3828_s23 }
 0x4a6   : > { %1742 = vrot.lane.b32.xlu2 %v1538_v62, %s3830_s22 }
 0x4f0   : > { %v1540_v4 = vpop.permute.xlu2 %1539 }
 0x4f1   : > { %2747 = vmatmul.msk.bf16.vlgmr.msra.gmra.mxu3 %vm1473_vm11, %v1540_v4 }
 0x4f8   : > { %v1651_v7 = vpop.permute.xlu2 %1650 }
 0x500   : > { %v1743_v41 = vpop.permute.xlu2 %1742 }
 0x501   : > { %2759 = vmatmul.msk.bf16.vlgmr.msrb.gmra.mxu3 %vm1473_vm11, %v1651_v7 }
 0x50f   : > { %v1489_v12 = vpop.f32.mrf.mxu1 }
 0x510   : > { %v1493_v15 = vmul.f32 0.35355338, %v1489_v12 }
 0x512   : > { %v1494_v16 = vadd.f32 %v1493_v15, %v4408_v14 }
 0x514   : > { %v1496_v17 = vsel %vm1495_vm0, %v1494_v16, -inf }
 0x515   : > { %1497 = vmax.xlane.f32.xlu1 %v1496_v17 }
 0x517   : > { %v1491_v18 = vpop.f32.mrf.mxu1 }
 0x518   : > { %v2845_v18 = vld [vmem:[#allocation3] sm:$0xff] }
 0x574   : > { %v1563_v20 = vpop.f32.mrf.mxu3 }
 0x575   : > { %v1567_v22 = vmul.f32 0.35355338, %v1563_v20 }
 0x577   : > { %v1568_v23 = vadd.f32 %v1567_v22, %v4408_v14 }
 0x579   : > { %v1569_v24 = vsel %vm1495_vm0, %v1568_v23, -inf }
 0x57a   : > { %1570 = vmax.xlane.f32.xlu2 %v1569_v24 }
 0x57c   : > { %v1565_v25 = vpop.f32.mrf.mxu3 }
 0x584   : > { %v1674_v26 = vpop.f32.mrf.mxu3 }
 0x585   : > { %v1678_v27 = vmul.f32 0.35355338, %v1674_v26 }
 0x587   : > { %v1679_v28 = vadd.f32 %v1678_v27, %v4408_v14 }
 0x588   : > { %v1498_v30 = vpop.xlane.xlu1 %1497 }
 0x589   : > { %v1499_v31 = vsub.f32 %v1494_v16, %v1498_v30  ;;  %v1680_v32 = vsel %vm1495_vm0, %v1679_v28, -inf  ;;  %v1809_v30 = vld [vmem:[#allocation13 + $0xc] sm:$0xf] }
 0x58a   : > { %1681 = vmax.xlane.f32.xlu0 %v1680_v32  ;;  %v1717_v32 = vld [vmem:[#allocation13 + $0x8] sm:$0xf] }
 0x58b   : > { %v1500_v33 = vmul.f32 1.442695, %v1499_v31  ;;  %v1814_v31 = vsel %vm1610_vm1, %v1809_v30, 0 }
 0x58c   : > { %v1676_v34 = vpop.f32.mrf.mxu3 }
 0x58d   : > { %3159 = vpow2.f32 %v1500_v33  ;;  %v1722_v33 = vsel %vm1610_vm1, %v1717_v32, 0 }
 0x58e   : > { %1731 = vmatpush.bf16.msra.mxu0 %v1722_v33 }
 0x592   : > { %1788 = vrot.lane.b32.xlu2 %v2847_v35, %s3830_s22 }
 0x593   : > { %v3160_v36 = vpop.eup %3159 }
 0x594   : > { %v1502_v37 = vsel %vm1495_vm0, %v3160_v36, 0.0  ;;  %v1506_v38 = vpack.c.bf16 %v3160_v36, %v3160_v36 }
 0x595   : > { %1503 = vadd.xlane.f32.xlu1 %v1502_v37 }
 0x596   : > { %2742 = vmatmul.msk.bf16.vlgmr.msra.gmra.mxu2 %vm1495_vm0, %v1506_v38 }
 0x5ae   : > { %1749 = vrot.lane.b32.xlu1 %v2846_v39, %s3830_s22 }
 0x5ed   : > { %v1571_v42 = vpop.xlane.xlu2 %1570 }
 0x5ee   : > { %v1572_v43 = vsub.f32 %v1568_v23, %v1571_v42 }
 0x5f0   : > { %v1573_v44 = vmul.f32 1.442695, %v1572_v43 }
 0x5f2   : > { %3161 = vpow2.f32 %v1573_v44 }
 0x5f5   : > { %v1789_v63 = vpop.permute.xlu2 %1788 }
 0x5f6   : > { %1801 = vmatpush.bf16.msra.mxu3 %v1789_v63  ;;  %v2848_v63 = vld [vmem:[#allocation14] sm:$0xff] }
 0x5f8   : > { %v3162_v45 = vpop.eup %3161 }
 0x5f9   : > { %v1575_v46 = vsel %vm1495_vm0, %v3162_v45, 0.0  ;;  %v1579_v47 = vpack.c.bf16 %v3162_v45, %v3162_v45 }
 0x5fa   : > { %1576 = vadd.xlane.f32.xlu0 %v1575_v46 }
 0x5fb   : > { %2752 = vmatmul.msk.bf16.vlgmr.msrb.gmra.mxu2 %vm1495_vm0, %v1579_v47 }
 0x5fd   : > { %v1682_v50 = vpop.xlane.xlu0 %1681 }
 0x5fe   : > { %v1683_v51 = vsub.f32 %v1679_v28, %v1682_v50 }
 0x600   : > { %v1684_v52 = vmul.f32 1.442695, %v1683_v51  ;;  %v3146_v51 = vld [vmem:[%s4671_s14] ss:$0 sm:$0xff]  ;;  %s4677_s14 = sld [smem:[#allocation64_spill]] }
 0x602   : > { %3163 = vpow2.f32 %v1684_v52 }
 0x608   : > { %v3164_v53 = vpop.eup %3163  ;;  %v1504_v55 = vpop.xlane.xlu1 %1503 }
 0x609   : > { %v1686_v54 = vsel %vm1495_vm0, %v3164_v53, 0.0  ;;  %3165 = vrcp.f32 %v1504_v55  ;;  %v1690_v28 = vpack.c.bf16 %v3164_v53, %v3164_v53 }
 0x60a   : > { %1687 = vadd.xlane.f32.xlu2 %v1686_v54 }
 0x60f   : > { %v3166_v56 = vpop.eup %3165 }
 0x619   : > { %v1525_v57 = vpop.f32.mrf.mxu2 }
 0x61a   : > { %v1529_v58 = vmul.f32 %v3166_v56, %v1525_v57 }
 0x61c   : > { %v1530_v59 = vpack.c.bf16 %v1529_v58, %v1529_v58 }
 0x61e   : > { %2754 = vmatmul.msk.bf16.vlgmr.msrb.gmra.mxu1 %vm1473_vm11, %v1530_v59 }
 0x620   : > { %v1750_v60 = vpop.permute.xlu1 %1749 }
 0x621   : > { %v1527_v61 = vpop.f32.mrf.mxu2  ;;  %v1755_v62 = vsel %vm1473_vm11, %v1750_v60, 0 }
 0x622   : > { %1764 = vmatpush.bf16.xpose.msra.mxu1 %v1755_v62  ;;  %v2849_v62 = vld [vmem:[#allocation14 + $0x8] sm:$0xff] }
 0x62e   : > { %2770 = vmatmul.msk.bf16.vlgmr.msra.gmra.mxu1 %vm1473_vm11, %v1743_v41 }
 0x66d   : > { %v1577_v2 = vpop.xlane.xlu0 %1576 }
 0x66e   : > { %3167 = vrcp.f32 %v1577_v2 }
 0x674   : > { %v3168_v3 = vpop.eup %3167 }
 0x67d   : > { %v1688_v39 = vpop.xlane.xlu2 %1687 }
 0x67e   : > { %v1600_v4 = vpop.f32.mrf.mxu2 }
 0x67f   : > { %v1604_v5 = vmul.f32 %v3168_v3, %v1600_v4 }
 0x681   : > { %v1605_v6 = vpack.c.bf16 %v1604_v5, %v1604_v5 }
 0x683   : > { %2753 = vmatmul.msk.bf16.vlgmr.msrb.gmra.mxu0 %vm1473_vm11, %v1605_v6 }
 0x684   : > { %1898 = vmatpush.bf16.msrb.mxu0 %v2849_v62 }
 0x686   : > { %v1602_v7 = vpop.f32.mrf.mxu2 }
 0x688   : > { %1899 = vmatpush.bf16.msrb.mxu0 %v2848_v63 }
 0x69b   : > { %v1642_v8 = vpop.f32.mrf.mxu1 }
 0x6a3   : > { %v1644_v9 = vpop.f32.mrf.mxu1 }
 0x6ab   : > { %v1766_v10 = vpop.f32.mrf.mxu1 }
 0x6ac   : > { %v1770_v12 = vmul.f32 0.35355338, %v1766_v10  ;;  %v3147_v10 = vld [vmem:[%s4672_s8] ss:$0 sm:$0xff]  ;;  %s4678_s8 = sld [smem:[#allocation65_spill]] }
 0x6ae   : > { %v1771_v15 = vadd.f32 %v1770_v12, %v4408_v14 }
 0x6b0   : > { %v1772_v16 = vsel %vm1495_vm0, %v1771_v15, -inf }
 0x6b1   : > { %1773 = vmax.xlane.f32.xlu1 %v1772_v16  ;;  %v3148_v16 = vld [vmem:[#allocation29] ss:$0 sm:$0xff] }
 0x6b3   : > { %v1768_v17 = vpop.f32.mrf.mxu1 }
 0x6ca   : > { %1696 = vrot.lane.b32.xlu1 %v2845_v18, %s3828_s23 }
 0x700   : > { %v1623_v19 = vpop.f32.mrf.mxu0 }
 0x701   : > { %v1643_v47 = vadd.f32 %v1642_v8, %v1623_v19 }
 0x708   : > { %v1625_v20 = vpop.f32.mrf.mxu0 }
 0x709   : > { %v3149_v20 = vld [vmem:[#allocation20] ss:$0 sm:$0xff] }
 0x724   : > { %v1774_v22 = vpop.xlane.xlu1 %1773 }
 0x725   : > { %v1775_v23 = vsub.f32 %v1771_v15, %v1774_v22 }
 0x727   : > { %v1776_v24 = vmul.f32 1.442695, %v1775_v23 }
 0x729   : > { %3169 = vpow2.f32 %v1776_v24 }
 0x72f   : > { %v3170_v25 = vpop.eup %3169 }
 0x730   : > { %v1782_v26 = vpack.c.bf16 %v3170_v25, %v3170_v25  ;;  %v1778_v27 = vsel %vm1495_vm0, %v3170_v25, 0.0 }
 0x731   : > { %1779 = vadd.xlane.f32.xlu0 %v1778_v27 }
 0x732   : > { %2775 = vmatmul.msk.bf16.vlgmr.msra.gmra.mxu3 %vm1495_vm0, %v1782_v26 }
 0x73c   : > { %v1697_v14 = vpop.permute.xlu1 %1696 }
 0x73d   : > { %1709 = vmatpush.bf16.msra.mxu2 %v1697_v14  ;;  %v1383_v14 = vstv %s1382_s6  ;;  %s4679_s6 = sld [smem:[#allocation58_spill]] }
 0x73e   : > { %vm1384_vm5 = vcmp.lt.s32.totalorder %v4404_v11, %v1383_v14  ;;  %v1907_v11 = vld [vmem:[#allocation5] sm:$0xf] }
 0x73f   : > { %v4457_v30 = vsel %vm1384_vm5, 0.0, %v3831_v13  ;;  %v1944_v13 = vsel %vm1610_vm1, %v1907_v11, 0 }
 0x740   : > { %2764 = vmatmul.msk.bf16.vlgmr.msra.gmra.mxu2 %vm1495_vm0, %v1690_v28  ;;  %1953 = vmatpush.bf16.msrb.mxu3 %v1944_v13  ;;  %v2032_v13 = vld [vmem:[#allocation19 + $0x4] sm:$0xf] }
 0x741   : > { %1823 = vmatpush.bf16.msrb.mxu2 %v1814_v31 }
 0x7a4   : > { %v1780_v34 = vpop.xlane.xlu0 %1779 }
 0x7a5   : > { %3171 = vrcp.f32 %v1780_v34 }
 0x7a6   : > { %3173 = vrcp.f32 %v1688_v39 }
 0x7ab   : > { %v3172_v35 = vpop.eup %3171 }
 0x7ac   : > { %v3174_v41 = vpop.eup %3173 }
 0x7b5   : > { %v1803_v36 = vpop.f32.mrf.mxu3 }
 0x7b6   : > { %v1807_v37 = vmul.f32 %v3172_v35, %v1803_v36  ;;  %v1962_v35 = vld [vmem:[#allocation4] sm:$0xf] }
 0x7b7   : > { %v1970_v36 = vunpack.c.l.b16 %v1962_v35 }
 0x7b8   : > { %v1808_v38 = vpack.c.bf16 %v1807_v37, %v1807_v37 }
 0x7b9   : > { %v1971_v37 = vpack.c.b16 %v1970_v36, %v1970_v36 }
 0x7ba   : > { %2776 = vmatmul.msk.bf16.vlgmr.msrb.gmra.mxu2 %vm1473_vm11, %v1808_v38  ;;  %v2159_v38 = vld [vmem:[#allocation4] sm:$0xf] }
 0x7bb   : > { %v2164_v39 = vunpack.c.l.b16 %v2159_v38 }
 0x7bd   : > { %v1805_v40 = vpop.f32.mrf.mxu3 }
 0x7be   : > { %v2165_v40 = vpack.c.b16 %v2164_v39, %v2164_v39  ;;  %v2072_v39 = vld [vmem:[#allocation5] sm:$0xf] }
 0x7c3   : > { %v1711_v42 = vpop.f32.mrf.mxu2 }
 0x7c4   : > { %v1715_v43 = vmul.f32 %v3174_v41, %v1711_v42  ;;  %v2071_v41 = vld [vmem:[#allocation4] sm:$0xf] }
 0x7c5   : > { %v2076_v42 = vunpack.c.l.b16 %v2071_v41  ;;  %v2037_v41 = vsel %vm1610_vm1, %v2032_v13, 0 }
 0x7c6   : > { %v1716_v44 = vpack.c.bf16 %v1715_v43, %v1715_v43 }
 0x7c7   : > { %v2077_v43 = vpack.c.b16 %v2076_v42, %v2076_v42 }
 0x7c8   : > { %2765 = vmatmul.msk.bf16.vlgmr.msra.gmra.mxu0 %vm1473_vm11, %v1716_v44 }
 0x7cb   : > { %v1713_v45 = vpop.f32.mrf.mxu2 }
 0x83d   : > { %v1825_v46 = vpop.f32.mrf.mxu2 }
 0x845   : > { %v1733_v48 = vpop.f32.mrf.mxu0  ;;  %v1827_v49 = vpop.f32.mrf.mxu2 }
 0x846   : > { %v1737_v50 = vadd.f32 %v1733_v48, %v1643_v47  ;;  %v1961_v47 = vld [vmem:[#allocation19] sm:$0xf] }
 0x847   : > { %v2056_v48 = vsel %vm1610_vm1, %v1961_v47, 0 }
 0x848   : > { %v1829_v52 = vadd.f32 %v1825_v46, %v1737_v50  ;;  %2065 = vmatpush.bf16.msra.mxu3 %v2056_v48 }
 0x84a   : > { %v1834_v53 = vadd.f32 %v3146_v51, %v1829_v52 }
 0x84c   : > { %v4441_v54 = vadd.f32 %v1834_v53, %v4374_v21  ;;  %v1906_v21 = vld [vmem:[#allocation4] sm:$0xf] }
 0x84d   : > { %v1735_v55 = vpop.f32.mrf.mxu0  ;;  %v1912_v1 = vsel %vm1473_vm11, %v1906_v21, 0 }
 0x84e   : > { %v1838_v56 = vsel %vm1388_vm9, %v4441_v54, 0.0  ;;  %1921 = vmatpush.bf16.xpose.msrb.mxu1 %v1912_v1 }
 0x84f   : > { %1839 = vadd.xlane.f32.xlu0 %v1838_v56 }
 0x856   : > { %2046 = vmatpush.bf16.msra.mxu1 %v2037_v41 }
 0x8c2   : > { %v1840_v57 = vpop.xlane.xlu0 %1839 }
 0x8c3   : > { %v1841_v58 = vmul.f32 %v1840_v57, %v4378_v29 }
 0x8c5   : > { %v1842_v59 = vsub.f32 %v4441_v54, %v1841_v58 }
 0x8c7   : > { %v1843_v60 = vmul.f32 %v1842_v59, %v1842_v59 }
 0x8c9   : > { %v1844_v61 = vsel %vm1388_vm9, %v1843_v60, 0.0 }
 0x8ca   : > { %1845 = vadd.xlane.f32.xlu1 %v1844_v61  ;;  %v1963_v61 = vld [vmem:[#allocation5] sm:$0xf] }
 0x8cb   : > { %v2007_v63 = vunpack.c.l.b16 %v1963_v61 }
 0x8cd   : > { %v2008_v21 = vpack.c.b16 %v2007_v63, %v2007_v63 }
 0x8e3   : > { %2078 = vrot.lane.b32.xlu1 %v2077_v43, %s3828_s23 }
 0x93d   : > { %v1846_v0 = vpop.xlane.xlu1 %1845 }
 0x93e   : > { %v1847_v2 = vmul.f32 %v1846_v0, %v4378_v29 }
 0x940   : > { %v1848_v3 = vadd.f32 1e-06, %v1847_v2 }
 0x942   : > { %3175 = vrsqrt.f32 %v1848_v3  ;;  %vm1855_vm3 = vweird.f32 %v1848_v3 }
 0x948   : > { %v3176_v4 = vpop.eup %3175 }
 0x949   : > { %v1850_v5 = vmul.f32 %v3176_v4, %v1848_v3  ;;  %vm1856_vm2 = vweird.f32 %v3176_v4 }
 0x94a   : > { %vm1857_vm4 = vmor %vm1855_vm3, %vm1856_vm2 }
 0x94b   : > { %v1851_v6 = vmul.f32 %v3176_v4, %v1850_v5 }
 0x94d   : > { %v1852_v7 = vmul.f32 0.5, %v1851_v6 }
 0x94f   : > { %v1853_v8 = vsub.f32 1.5, %v1852_v7 }
 0x951   : > { %v1854_v9 = vmul.f32 %v3176_v4, %v1853_v8 }
 0x953   : > { %v1858_v12 = vsel %vm1857_vm4, %v3176_v4, %v1854_v9 }
 0x954   : > { %v1859_v15 = vmul.f32 %v1858_v12, %v1842_v59 }
 0x955   : > { %v2079_v58 = vpop.permute.xlu1 %2078 }
 0x956   : > { %v1863_v17 = vmul.f32 %v3147_v10, %v1859_v15  ;;  %v2084_v59 = vsel %vm1473_vm11, %v2079_v58, 0 }
 0x958   : > { %v1867_v18 = vadd.f32 %v3148_v16, %v1863_v17 }
 0x95a   : > { %v1868_v19 = vpack.c.bf16 %v1867_v18, %v1867_v18 }
 0x95c   : > { %2785 = vmatmul.msk.bf16.vlgmr.msrb.gmra.mxu0 %vm1388_vm9, %v1868_v19 }
 0x9d9   : > { %v1901_v22 = vpop.f32.mrf.mxu0 }
 0x9da   : > { %v1902_v23 = vadd.f32 %v3149_v20, %v1901_v22 }
 0x9dc   : > { %v1905_v24 = vpack.c.bf16 %v1902_v23, %v1902_v23 }
 0x9de   : > { %v1965_v25 = vunpack.c.l.b16 %v1905_v24  ;;  %2786 = vmatmul.msk.bf16.vlgmr.msrb.gmra.mxu1 %vm1473_vm11, %v1905_v24 }
 0x9e0   : > { %v1966_v26 = vpack.c.b16 %v1965_v25, %v1965_v25 }
 0x9e1   : > { %v1903_v27 = vpop.f32.mrf.mxu0 }
 0x9e2   : > { %1967 = vrot.lane.b32.xlu2 %v1966_v26, %s3829_s17 }
 0xa3c   : > { %v1968_v55 = vpop.permute.xlu2 %1967 }
 0xa5b   : > { %v1923_v28 = vpop.f32.mrf.mxu1 }
 0xa5c   : > { %v1927_v31 = vmul.f32 0.35355338, %v1923_v28 }
 0xa5e   : > { %v1928_v32 = vadd.f32 %v1927_v31, %v4457_v30  ;;  %v2160_v31 = vld [vmem:[#allocation5] sm:$0xf] }
 0xa60   : > { %v1929_v33 = vsel %vm1473_vm11, %v1928_v32, -inf }
 0xa61   : > { %1930 = vmax.xlane.f32.xlu0 %v1929_v33  ;;  %v2201_v33 = vunpack.c.l.b16 %v2160_v31 }
 0xa63   : > { %v1925_v34 = vpop.f32.mrf.mxu1  ;;  %v2202_v35 = vpack.c.b16 %v2201_v33, %v2201_v33 }
 0xa75   : > { %1972 = vrot.lane.b32.xlu0 %v1971_v37, %s3829_s17 }
 0xa7d   : > { %2166 = vrot.lane.b32.xlu0 %v2165_v40, %s3830_s22  ;;  %v2113_v40 = vunpack.c.l.b16 %v2072_v39  ;;  %v2850_v39 = vld [vmem:[#allocation26] sm:$0xff] }
 0xa7f   : > { %v2114_v11 = vpack.c.b16 %v2113_v40, %v2113_v40 }
 0xa85   : > { %2161 = vrot.lane.b32.xlu0 %v1966_v26, %s3830_s22 }
 0xad4   : > { %v1931_v44 = vpop.xlane.xlu0 %1930 }
 0xad5   : > { %v1932_v45 = vsub.f32 %v1928_v32, %v1931_v44 }
 0xad7   : > { %v1933_v46 = vmul.f32 1.442695, %v1932_v45 }
 0xad9   : > { %3177 = vpow2.f32 %v1933_v46 }
 0xadf   : > { %v3178_v49 = vpop.eup %3177 }
 0xae0   : > { %v1939_v50 = vpack.c.bf16 %v3178_v49, %v3178_v49  ;;  %v1935_v51 = vsel %vm1473_vm11, %v3178_v49, 0.0 }
 0xae1   : > { %1936 = vadd.xlane.f32.xlu0 %v1935_v51 }
 0xae2   : > { %2787 = vmatmul.msk.bf16.vlgmr.msrb.gmra.mxu3 %vm1473_vm11, %v1939_v50 }
 0xae7   : > { %v1973_v52 = vpop.permute.xlu0 %1972 }
 0xae8   : > { %v1978_v53 = vsel %vm1473_vm11, %v1973_v52, 0 }
 0xae9   : > { %1987 = vmatpush.bf16.xpose.msra.mxu2 %v1978_v53 }
 0xaef   : > { %v2167_v56 = vpop.permute.xlu0 %2166 }
 0xaf0   : > { %v2172_v57 = vsel %vm1473_vm11, %v2167_v56, 0  ;;  %2788 = vmatmul.msk.bf16.vlgmr.msra.gmra.mxu2 %vm1473_vm11, %v1968_v55 }
 0xaf1   : > { %2181 = vmatpush.bf16.xpose.msrb.mxu3 %v2172_v57  ;;  %2093 = vmatpush.bf16.xpose.msrb.mxu2 %v2084_v59 }
 0xaf5   : > { %2073 = vrot.lane.b32.xlu0 %v1966_v26, %s3828_s23 }
 0xaf7   : > { %v2162_v60 = vpop.permute.xlu0 %2161 }
 0xafd   : > { %2009 = vrot.lane.b32.xlu0 %v2008_v21, %s3829_s17  ;;  %v2226_v21 = vld [vmem:[#allocation19 + $0xc] sm:$0xf] }
 0xb54   : > { %v1937_v62 = vpop.xlane.xlu0 %1936 }
 0xb55   : > { %3179 = vrcp.f32 %v1937_v62 }
 0xb5b   : > { %v3180_v0 = vpop.eup %3179 }
 0xb65   : > { %v1955_v1 = vpop.f32.mrf.mxu3 }
 0xb66   : > { %v1959_v2 = vmul.f32 %v3180_v0, %v1955_v1  ;;  %v2231_v0 = vsel %vm1610_vm1, %v2226_v21, 0  ;;  %v2138_v1 = vld [vmem:[#allocation19 + $0x8] sm:$0xf] }
 0xb67   : > { %v2074_v3 = vpop.permute.xlu0 %2073 }
 0xb68   : > { %v1960_v4 = vpack.c.bf16 %v1959_v2, %v1959_v2  ;;  %2792 = vmatmul.msk.bf16.vlgmr.msrb.gmra.mxu2 %vm1473_vm11, %v2074_v3  ;;  %v2143_v2 = vsel %vm1610_vm1, %v2138_v1, 0 }
 0xb69   : > { %2152 = vmatpush.bf16.msrb.mxu1 %v2143_v2 }
 0xb6a   : > { %2791 = vmatmul.msk.bf16.vlgmr.msra.gmra.mxu3 %vm1473_vm11, %v1960_v4 }
 0xb6d   : > { %v1957_v5 = vpop.f32.mrf.mxu3 }
 0xb6f   : > { %v2010_v12 = vpop.permute.xlu0 %2009 }
 0xb70   : > { %v2015_v15 = vsel %vm1610_vm1, %v2010_v12, 0 }
 0xb71   : > { %2024 = vmatpush.bf16.msra.mxu0 %v2015_v15 }
 0xb73   : > { %v1989_v6 = vpop.f32.mrf.mxu2 }
 0xb74   : > { %v1993_v7 = vmul.f32 0.35355338, %v1989_v6 }
 0xb76   : > { %v1994_v8 = vadd.f32 %v1993_v7, %v4457_v30 }
 0xb78   : > { %v1995_v9 = vsel %vm1473_vm11, %v1994_v8, -inf }
 0xb79   : > { %1996 = vmax.xlane.f32.xlu2 %v1995_v9 }
 0xb7a   : > { %2795 = vmatmul.msk.bf16.vlgmr.msrb.gmra.mxu3 %vm1473_vm11, %v2162_v60 }
 0xb7b   : > { %v1991_v10 = vpop.f32.mrf.mxu2 }
 0xb91   : > { %2203 = vrot.lane.b32.xlu2 %v2202_v35, %s3830_s22  ;;  %s4676_s22 = sld [smem:[#allocation63_spill]] }
 0xbeb   : > { %v2095_v16 = vpop.f32.mrf.mxu2 }
 0xbec   : > { %v2099_v17 = vmul.f32 0.35355338, %v2095_v16  ;;  %v1997_v18 = vpop.xlane.xlu2 %1996 }
 0xbed   : > { %v1998_v19 = vsub.f32 %v1994_v8, %v1997_v18  ;;  %v4481_v20 = vpop.f32.mrf.mxu3 }
 0xbee   : > { %v2100_v22 = vadd.f32 %v2099_v17, %v4457_v30 }
 0xbef   : > { %v1999_v23 = vmul.f32 1.442695, %v1998_v19 }
 0xbf0   : > { %v2101_v24 = vsel %vm1473_vm11, %v2100_v22, -inf }
 0xbf1   : > { %3181 = vpow2.f32 %v1999_v23  ;;  %2102 = vmax.xlane.f32.xlu0 %v2101_v24 }
 0xbf3   : > { %v2097_v25 = vpop.f32.mrf.mxu2 }
 0xbf4   : > { %v2204_v42 = vpop.permute.xlu2 %2203 }
 0xbf5   : > { %v2069_v26 = vpop.f32.mrf.mxu3  ;;  %v2209_v43 = vsel %vm1610_vm1, %v2204_v42, 0 }
 0xbf6   : > { %2218 = vmatpush.bf16.msra.mxu2 %v2209_v43 }
 0xbf7   : > { %v3182_v27 = vpop.eup %3181 }
 0xbf8   : > { %v2005_v14 = vpack.c.bf16 %v3182_v27, %v3182_v27  ;;  %v2001_v28 = vsel %vm1473_vm11, %v3182_v27, 0.0  ;;  %v3150_v27 = vld [vmem:[#allocation25] ss:$0 sm:$0xff] }
 0xbf9   : > { %2002 = vadd.xlane.f32.xlu0 %v2001_v28 }
 0xbfa   : > { %2789 = vmatmul.msk.bf16.vlgmr.msra.gmra.mxu0 %vm1473_vm11, %v2005_v14 }
 0xbfd   : > { %v2183_v32 = vpop.f32.mrf.mxu3 }
 0xbfe   : > { %v2187_v34 = vmul.f32 0.35355338, %v2183_v32 }
 0xc00   : > { %v2188_v36 = vadd.f32 %v2187_v34, %v4457_v30 }
 0xc02   : > { %v2189_v37 = vsel %vm1473_vm11, %v2188_v36, -inf }
 0xc03   : > { %2190 = vmax.xlane.f32.xlu1 %v2189_v37 }
 0xc05   : > { %v2185_v38 = vpop.f32.mrf.mxu3 }
 0xc06   : > { %v2851_v38 = vld [vmem:[#allocation26 + $0x8] sm:$0xff] }
 0xc1c   : > { %2115 = vrot.lane.b32.xlu1 %v2114_v11, %s3828_s23  ;;  %s4674_s23 = sld [smem:[#allocation57_spill]] }
 0xc22   : > { %s4675_s17 = smov %s4674_s23  ;;  %v2855_v40 = vld [vmem:[%s4674_s23 + $0x18] sm:$0xff]  ;;  %s4680_s23 = sld [smem:[#allocation67_spill]] }
 0xc23   : > { %2364 = vmatpush.bf16.msra.mxu3 %v2855_v40  ;;  %v2854_v13 = vld [vmem:[%s4675_s17 + $0x10] sm:$0xff] }
 0xc27   : > { %2365 = vmatpush.bf16.msra.mxu3 %v2854_v13 }
 0xc28   : > { %s4683_s19 = sand.u32 1, %s4680_s23  }
 0xc64   : > { %v2103_v30 = vpop.xlane.xlu0 %2102 }
 0xc65   : > { %v2104_v44 = vsub.f32 %v2100_v22, %v2103_v30 }
 0xc67   : > { %v2105_v45 = vmul.f32 1.442695, %v2104_v44 }
 0xc69   : > { %3183 = vpow2.f32 %v2105_v45 }
 0xc6c   : > { %v2003_v46 = vpop.xlane.xlu0 %2002 }
 0xc6d   : > { %3185 = vrcp.f32 %v2003_v46 }
 0xc6f   : > { %v3184_v47 = vpop.eup %3183 }
 0xc70   : > { %v2107_v48 = vsel %vm1473_vm11, %v3184_v47, 0.0  ;;  %v2111_v63 = vpack.c.bf16 %v3184_v47, %v3184_v47  ;;  %v3151_v47 = vld [vmem:[%s4676_s22] ss:$0 sm:$0xff]  ;;  %s2825_s22 = sshll.u32 %s4673_s25, 1  ;;  %s2381_s25 = scalar_lea.sflag [#allocation10], %s4683_s19 }
 0xc71   : > { %2108 = vadd.xlane.f32.xlu2 %v2107_v48 }
 0xc73   : > { %v3186_v50 = vpop.eup %3185 }
 0xc76   : > { %v2191_v49 = vpop.xlane.xlu1 %2190 }
 0xc77   : > { %v2192_v51 = vsub.f32 %v2188_v36, %v2191_v49  ;;  %v2026_v52 = vpop.f32.mrf.mxu0  ;;  %v3152_v49 = vld [vmem:[%s4677_s14] ss:$0 sm:$0xff]  ;;  %s2391_s14 = sadd.s32 %s4665_s26, %s2825_s22 }
 0xc78   : > { %v2030_v53 = vmul.f32 %v3186_v50, %v2026_v52  ;;  %s2826_s21 = sshll.u32 %s2391_s14, 3 }
 0xc79   : > { %v2193_v55 = vmul.f32 1.442695, %v2192_v51  ;;  %s2393_s13 = scalar_lea.hbm %s4678_s8, %s2826_s21  ;;  %s3647_s21 = scalar_lea.hbm %s4678_s8, 32 }
 0xc7a   : > { %v2031_v56 = vpack.c.bf16 %v2030_v53, %v2030_v53  ;;  %v2853_v53 = vld [vmem:[%s4675_s17 + $0x8] sm:$0xff]  ;;  %s2397_s12 = sshll.u32 %s2393_s13, 4  ;;  %s2398_s12 = int_to_ptr.hbm [resolvable:$true] %s2397_s12 }
 0xc7b   : > { %3187 = vpow2.f32 %v2193_v55  ;;  %2366 = vmatpush.bf16.msra.mxu3 %v2853_v53  ;;  %v2852_v55 = vld [vmem:[%s4675_s17] sm:$0xff]  ;;  %s4682_s17 = smov %s4681_s1  ;;  %s3641_s26 = sshra.s32 %s2398_s12, 4  ;;  %s3642_s26 = int_to_ptr.hbm [resolvable:$true] %s3641_s26 }
 0xc7c   : > { %2790 = vmatmul.msk.bf16.vlgmr.msra.gmra.mxu1 %vm1473_vm11, %v2031_v56  ;;  %v3153_v56 = vld [vmem:[#allocation28] ss:$0 sm:$0xff]  ;;  %s3643_s22 = scalar_lea.hbm %s3642_s26, 8  ;;  %p3648_p10 = scmp.lt.s32.totalorder %s3642_s26, %s4678_s8 }
 0xc7d   : > { %2315 = vmatpush.bf16.msra.mxu1 %v2851_v38  ;;  %p3644_p6 = scmp.ne.s32.totalorder %s3642_s26, %s3643_s22  ;;  %p3649_p2 = scmp.lt.s32.totalorder %s3647_s21, %s3643_s22 }
 0xc7f   : > { %v2028_v57 = vpop.f32.mrf.mxu0  ;;  %2367 = vmatpush.bf16.msra.mxu3 %v2852_v55  ;;  %p3645_p12 = pnand %p3644_p6, %p4684_p3  ;;  %p3650_p4 = por %p3649_p2, %p3648_p10 }
 0xc81   : > { %v3188_v58 = vpop.eup %3187  ;;  %2316 = vmatpush.bf16.msra.mxu1 %v2850_v39  ;;  %p3646_p0 = pneg %p3645_p12 }
 0xc82   : > { %v2199_v59 = vpack.c.bf16 %v3188_v58, %v3188_v58  ;;  %v2195_v60 = vsel %vm1473_vm11, %v3188_v58, 0.0 }
 0xc83   : > { %2196 = vadd.xlane.f32.xlu0 %v2195_v60  ;;  %p3651_p5 = pnand %p3650_p4, %p3646_p0 }
 0xc84   : > { %2796 = vmatmul.msk.bf16.vlgmr.msra.gmra.mxu2 %vm1473_vm11, %v2199_v59 }
 0xc8e   : > { %v2116_v61 = vpop.permute.xlu1 %2115 }
 0xc8f   : > { %v2121_v62 = vsel %vm1610_vm1, %v2116_v61, 0 }
 0xc90   : > { %2130 = vmatpush.bf16.msrb.mxu0 %v2121_v62  ;;  %v3154_v62 = vld [vmem:[%s4679_s6] ss:$0 sm:$0xff] }
 0xc93   : > { %2793 = vmatmul.msk.bf16.vlgmr.msrb.gmra.mxu0 %vm1473_vm11, %v2111_v63 }
 0xc94   : > { %2240 = vmatpush.bf16.msra.mxu0 %v2231_v0 }
 0xce4   : > { %v2109_v7 = vpop.xlane.xlu2 %2108 }
 0xcf6   : > { %v2197_v4 = vpop.xlane.xlu0 %2196 }
 0xcf7   : > { %3189 = vrcp.f32 %v2197_v4 }
 0xcf8   : > { %3191 = vrcp.f32 %v2109_v7 }
 0xcf9   : > { %v2048_v3 = vpop.f32.mrf.mxu1 }
 0xcfa   : > { %v2068_v23 = vadd.f32 %v4481_v20, %v2048_v3 }
 0xcfd   : > { %v3190_v6 = vpop.eup %3189 }
 0xcfe   : > { %v3192_v15 = vpop.eup %3191 }
 0xd01   : > { %v2050_v5 = vpop.f32.mrf.mxu1 }
 0xd07   : > { %v2220_v8 = vpop.f32.mrf.mxu2 }
 0xd08   : > { %v2224_v9 = vmul.f32 %v3190_v6, %v2220_v8 }
 0xd0a   : > { %v2225_v10 = vpack.c.bf16 %v2224_v9, %v2224_v9 }
 0xd0c   : > { %2797 = vmatmul.msk.bf16.vlgmr.msra.gmra.mxu0 %vm1473_vm11, %v2225_v10 }
 0xd0f   : > { %v2222_v12 = vpop.f32.mrf.mxu2 }
 0xd10   : > { %v2132_v16 = vpop.f32.mrf.mxu0 }
 0xd11   : > { %v2136_v17 = vmul.f32 %v3192_v15, %v2132_v16 }
 0xd13   : > { %v2137_v18 = vpack.c.bf16 %v2136_v17, %v2136_v17 }
 0xd15   : > { %2794 = vmatmul.msk.bf16.vlgmr.msrb.gmra.mxu1 %vm1473_vm11, %v2137_v18 }
 0xd18   : > { %v2134_v19 = vpop.f32.mrf.mxu0 }
 0xd89   : > { %v2242_v22 = vpop.f32.mrf.mxu0 }
 0xd91   : > { %v2244_v24 = vpop.f32.mrf.mxu0 }
 0xd92   : > { %v2154_v25 = vpop.f32.mrf.mxu1 }
 0xd93   : > { %v2158_v26 = vadd.f32 %v2154_v25, %v2068_v23 }
 0xd95   : > { %v2246_v14 = vadd.f32 %v2242_v22, %v2158_v26 }
 0xd97   : > { %v2251_v28 = vadd.f32 %v3150_v27, %v2246_v14 }
 0xd99   : > { %v2252_v31 = vadd.f32 %v2251_v28, %v4441_v54 }
 0xd9a   : > { %v2156_v32 = vpop.f32.mrf.mxu1 }
 0xd9b   : > { %v2255_v33 = vsel %vm1388_vm9, %v2252_v31, 0.0 }
 0xd9c   : > { %2256 = vadd.xlane.f32.xlu0 %v2255_v33 }
 0xe0f   : > { %v2257_v34 = vpop.xlane.xlu0 %2256 }
 0xe10   : > { %v2258_v35 = vmul.f32 %v2257_v34, %v4378_v29 }
 0xe12   : > { %v2259_v36 = vsub.f32 %v2252_v31, %v2258_v35 }
 0xe14   : > { %v2260_v37 = vmul.f32 %v2259_v36, %v2259_v36 }
 0xe16   : > { %v2261_v20 = vsel %vm1388_vm9, %v2260_v37, 0.0 }
 0xe17   : > { %2262 = vadd.xlane.f32.xlu1 %v2261_v20 }
 0xe8a   : > { %v2263_v54 = vpop.xlane.xlu1 %2262 }
 0xe8b   : > { %v2264_v11 = vmul.f32 %v2263_v54, %v4378_v29 }
 0xe8d   : > { %v2265_v41 = vadd.f32 1e-06, %v2264_v11 }
 0xe8f   : > { %3193 = vrsqrt.f32 %v2265_v41  ;;  %vm2272_vm7 = vweird.f32 %v2265_v41 }
 0xe95   : > { %v3194_v42 = vpop.eup %3193 }
 0xe96   : > { %v2267_v43 = vmul.f32 %v3194_v42, %v2265_v41  ;;  %vm2273_vm6 = vweird.f32 %v3194_v42 }
 0xe97   : > { %vm2274_vm8 = vmor %vm2272_vm7, %vm2273_vm6 }
 0xe98   : > { %v2268_v30 = vmul.f32 %v3194_v42, %v2267_v43 }
 0xe9a   : > { %v2269_v44 = vmul.f32 0.5, %v2268_v30 }
 0xe9c   : > { %v2270_v45 = vsub.f32 1.5, %v2269_v44 }
 0xe9e   : > { %v2271_v46 = vmul.f32 %v3194_v42, %v2270_v45 }
 0xea0   : > { %v2275_v48 = vsel %vm2274_vm8, %v3194_v42, %v2271_v46 }
 0xea1   : > { %v2276_v29 = vmul.f32 %v2275_v48, %v2259_v36 }
 0xea3   : > { %v2280_v50 = vmul.f32 %v3151_v47, %v2276_v29 }
 0xea5   : > { %v2284_v51 = vadd.f32 %v3152_v49, %v2280_v50 }
 0xea7   : > { %v2285_v52 = vpack.c.bf16 %v2284_v51, %v2284_v51 }
 0xea9   : > { %2806 = vmatmul.msk.bf16.vlgmr.msra.gmra.mxu1 %vm1388_vm9, %v2285_v52 }
 0xf26   : > { %v2318_v57 = vpop.f32.mrf.mxu1 }
 0xf27   : > { %v2319_v58 = vadd.f32 %v3153_v56, %v2318_v57 }
 0xf29   : > { %v2322_v59 = vmax.f32 %v2319_v58, 0.0 }
 0xf2b   : > { %v2323_v60 = vpack.c.bf16 %v2322_v59, %v2322_v59 }
 0xf2d   : > { %2823 = vmatmul.msk.bf16.vlgmr.msra.gmra.mxu3 %vm2356_vm10, %v2323_v60 }
 0xf2e   : > { %v2320_v61 = vpop.f32.mrf.mxu1 }
 0xfb0   : > { %v2369_v63 = vpop.f32.mrf.mxu3 }
 0xfb1   : > { %v2373_v21 = vadd.f32 %v2369_v63, %v2252_v31 }
 0xfb3   : > { %v2378_v0 = vadd.f32 %v3154_v62, %v2373_v21 }
 0xfb5   : > { %2379 = vst.msk [vmem:[%s4682_s17] sm:$0xff] %vm1388_vm9, %v2378_v0 }
 0xfb6   : > { %3654 = shalt.err (!%p3651_p5)
}
 0xfb7   : > { %2914 = dma.vmem_to_hbm [thread:$0]  (%p4684_p3), %s2396_s3, 128, %s2398_s12, %s2381_s25  }
 0xfb8   : > { %v2371_v1 = vpop.f32.mrf.mxu3 }
 0xfb9 PF: > { %s4685_s19 = sld [smem:[#allocation66_spill]]  ;;  %p2991_p7 = scmp.ge.s32.totalorder %s3779_s7, 2 }
 0xfba   : > { %p4686_p9 = scmp.ne.s32.totalorder %s4652_s9, 0 }
 0xfbc   : > { %p2961_p11 = pnand %p2991_p7, %p4686_p9 }
 0xfbe   : > { %p2962_p13 = pneg %p2961_p11 }
 0xfbf   : > { %s2409_s1 = sand.u32 1, %s4685_s19  }
 0xfc0   : > { %s2410_s10 = scalar_lea.sflag [#allocation10], %s2409_s1 }
 0xfc1   : > { %3734 = dma.done.wait (%p2962_p13), %s2410_s10, 128  }
 0xfc2   : > { %3736 = vsyncadd (%p2962_p13), %s2410_s10, 4294967168  ;;  %s90_s7 = sadd.s32 1, %s3779_s7   ;;  %s4687_s13 = sld [smem:[#allocation67_spill]] }
 0xfc3   : > { %p87_p8 = scmp.ge.s32.totalorder %s90_s7, 6   ;;  %s4688_s17 = sld [smem:[#allocation68_spill]] }
 0xfc4   : > { %s4689_s16 = smov %s4708_s0  ;;  %s4690_s3 = smov %s4702_s5 }
 0xfc5   : > { %s4693_s23 = smov %s4689_s16  ;;  %s4694_s14 = smov %s3755_s15 }
 0xfc6   : > { %s4695_s15 = smov %s3759_s18  ;;  %s4696_s18 = smov %s4272_s4 }
 0xfc7   : > { %s4697_s22 = smov %s3771_s28  ;;  %s4698_s26 = smov %s3775_s2 }
 0xfc8   : > { %s4691_s0 = smov %s4687_s13  ;;  %s4699_s28 = smov %s4690_s3 }
 0xfc9   : > { %s4692_s5 = smov %s4688_s17  ;;  %s4700_s2 = smov %s4706_s11 }
 0xfca   :  { %89 = sbr.rel (!%p87_p8) target bundleno = 80 (0x50), region = 266 }
 0xfcf   :  { %2416 = vsyncpa [#allocation9], 1 }
 0xfd0   :  { %2418 = vsyncpa [#allocation9 + $0x1], 1 }
 0xfd1   :  { %2419 = vsyncpa [#allocation12], 1 }
 0xfd2   :  { %2420 = vsyncpa [#allocation15], 1 }
 0xfd3   :  { %2421 = vsyncpa [#allocation18], 1 }
 0xfd4   :  { %2422 = vsyncpa [#allocation21], 1 }
 0xfd5   :  { %2423 = vsyncpa [#allocation24], 1 }
 0xfd6   :  { %2424 = vsyncpa [#allocation27], 1 }
 0xfd7   :  { %2425 = vsyncpa [#allocation30], 1 }
 0xfd8   :  { %2426 = vsyncpa [#allocation10], 1 }
 0xfd9   :  { %2428 = vsyncpa [#allocation10 + $0x1], 1 }

// kernel: tpu_custom_call.1
= control target key start
LH: loop header
LB: loop body
LE: loop exit
PB: predicated region body
PF: predicated region fallthrough
CT: control target
= control target key end

     0   :  { %s3781_s6 = smov 1   ;;  %s3782_s10 = smov 2   ;;  %s4570_s0 = inlined_call_operand.smem [shape: u32[30], index: -1, kind: input, shape index: {}] }
   0x1   :  { %s3840_s5 = sld [smem:[%s4570_s0]]   ;;  %s3783_s14 = smov 3  }
   0x2   :  { %s3845_s9 = sld [smem:[%s4570_s0 + %s3781_s6]]   ;;  %s3784_s18 = smov 4  }
   0x3   :  { %s3850_s13 = sld [smem:[%s4570_s0 + %s3782_s10]]   ;;  %s3785_s22 = smov 5  }
   0x4   :  { %s3855_s17 = sld [smem:[%s4570_s0 + %s3783_s14]]   ;;  %s3786_s26 = smov 6  }
   0x5   :  { %s3860_s21 = sld [smem:[%s4570_s0 + %s3784_s18]]   ;;  %s3787_s30 = smov 7  }
   0x6   :  { %s3865_s25 = sld [smem:[%s4570_s0 + %s3785_s22]]   ;;  %s3788_s4 = smov 8  }
   0x7   :  { %s3870_s29 = sld [smem:[%s4570_s0 + %s3786_s26]]   ;;  %s3789_s10 = smov 9  }
   0x8   :  { %4600 = sst [smem:[#allocation42_spill]] %s3845_s9  ;;  %s3790_s15 = smov 10  }
   0x9   :  { %4601 = sst [smem:[#allocation43_spill]] %s3850_s13  ;;  %s3791_s20 = smov 11  }
   0xa   :  { %4602 = sst [smem:[#allocation44_spill]] %s3855_s17  ;;  %s3792_s26 = smov 12  }
   0xb   :  { %4603 = sst [smem:[#allocation45_spill]] %s3860_s21  ;;  %s3793_s1 = smov 13  }
   0xc   :  { %4604 = sst [smem:[#allocation46_spill]] %s3865_s25  ;;  %s3794_s7 = smov 14  }
   0xd   :  { %s3875_s3 = sld [smem:[%s4570_s0 + %s3787_s30]]   ;;  %s3796_s22 = smov 16  }
   0xe   :  { %s3880_s8 = sld [smem:[%s4570_s0 + %s3788_s4]]   ;;  %s3797_s28 = smov 17  }
   0xf   :  { %s3885_s14 = sld [smem:[%s4570_s0 + %s3789_s10]]   ;;  %s3805_s17 = smov 25  }
  0x10   :  { %s3890_s19 = sld [smem:[%s4570_s0 + %s3790_s15]]   ;;  %s3795_s15 = smov 15  }
  0x11   :  { %s3895_s24 = sld [smem:[%s4570_s0 + %s3791_s20]]   ;;  %s3809_s2 = smov 29  }
  0x12   :  { %s3900_s30 = sld [smem:[%s4570_s0 + %s3792_s26]]   ;;  %s3808_s26 = smov 28  }
  0x13   :  { %4605 = sst [smem:[#allocation47_spill]] %s3875_s3 }
  0x14   :  { %4606 = sst [smem:[#allocation48_spill]] %s3880_s8 }
  0x15   :  { %4607 = sst [smem:[#allocation49_spill]] %s3885_s14 }
  0x16   :  { %4608 = sst [smem:[#allocation50_spill]] %s3890_s19 }
  0x17   :  { %s3905_s6 = sld [smem:[%s4570_s0 + %s3793_s1]]  }
  0x18   :  { %s3910_s12 = sld [smem:[%s4570_s0 + %s3794_s7]]   ;;  %s3798_s7 = smov 18  }
  0x19   :  { %s3915_s20 = sld [smem:[%s4570_s0 + %s3795_s15]]   ;;  %s3799_s15 = smov 19  }
  0x1a   :  { %s3920_s27 = sld [smem:[%s4570_s0 + %s3796_s22]]   ;;  %s3800_s22 = smov 20  }
  0x1b   :  { %s3925_s4 = sld [smem:[%s4570_s0 + %s3797_s28]]   ;;  %s3801_s28 = smov 21  }
  0x1c   :  { %s3930_s19 = sld [smem:[%s4570_s0 + %s3798_s7]]   ;;  %s3802_s7 = smov 22  }
  0x1d   :  { %4609 = sst [smem:[#allocation51_spill]] %s3905_s6 }
  0x1e   :  { %4610 = sst [smem:[#allocation52_spill]] %s3910_s12 }
  0x1f   :  { %s3935_s3 = sld [smem:[%s4570_s0 + %s3799_s15]]   ;;  %s3803_s15 = smov 23  }
  0x20   :  { %s3940_s1 = sld [smem:[%s4570_s0 + %s3800_s22]]   ;;  %s3804_s22 = smov 24  }
  0x21   :  { %4611 = sst [smem:[#allocation53_spill]] %s3925_s4 }
  0x22   :  { %4612 = sst [smem:[#allocation54_spill]] %s3930_s19 }
  0x23   :  { %s3945_s10 = sld [smem:[%s4570_s0 + %s3801_s28]]  }
  0x24   :  { %s3950_s16 = sld [smem:[%s4570_s0 + %s3802_s7]]   ;;  %s3806_s7 = smov 26  }
  0x25   :  { %4613 = sst [smem:[#allocation55_spill]] %s3935_s3 }
  0x26   :  { %4614 = sst [smem:[#allocation56_spill]] %s3940_s1 }
  0x27   :  { %s3955_s23 = sld [smem:[%s4570_s0 + %s3803_s15]]   ;;  %s3807_s15 = smov 27  }
  0x28   :  { %s3960_s9 = sld [smem:[%s4570_s0 + %s3804_s22]]   ;;  %s65_s22 = sshll.u32 %s3840_s5, 4  ;;  %s66_s22 = int_to_ptr.hbm [resolvable:$true] %s65_s22 }
  0x29   :  { %4615 = sst [smem:[#allocation57_spill]] %s3945_s10  ;;  %s3199_s10 = scalar_lea.hbm %s3840_s5, 1 }
  0x2a   :  { %4616 = sst [smem:[#allocation58_spill]] %s3950_s16 }
  0x2b   :  { %s3965_s14 = sld [smem:[%s4570_s0 + %s3805_s17]]  }
  0x2c   :  { %s3970_s8 = sld [smem:[%s4570_s0 + %s3806_s7]]   ;;  %s3195_s7 = sshra.s32 %s66_s22, 4  ;;  %s3196_s7 = int_to_ptr.hbm [resolvable:$true] %s3195_s7 }
  0x2d   :  { %4617 = sst [smem:[#allocation59_spill]] %s3955_s23  ;;  %s3197_s11 = scalar_lea.hbm %s3196_s7, 1 }
  0x2e   :  { %4618 = sst [smem:[#allocation60_spill]] %s3960_s9  ;;  %p3198_p0 = scmp.ne.s32.totalorder %s3196_s7, %s3197_s11 }
  0x2f   :  { %s3975_s21 = sld [smem:[%s4570_s0 + %s3807_s15]]   ;;  %p3200_p1 = scmp.lt.s32.totalorder %s3196_s7, %s3840_s5 }
  0x30   :  { %s3981_s17 = sld [smem:[%s4570_s0 + %s3808_s26]]   ;;  %p3201_p2 = scmp.lt.s32.totalorder %s3199_s10, %s3197_s11 }
  0x31   :  { %4619 = sst [smem:[#allocation61_spill]] %s3965_s14 }
  0x32   :  { %4620 = sst [smem:[#allocation62_spill]] %s3970_s8  ;;  %p3202_p3 = por %p3201_p2, %p3200_p1 }
  0x33   :  { %s3986_s16 = sld [smem:[%s4570_s0 + %s3809_s2]]  }
  0x34   :  { %p3203_p4 = pnand %p3202_p3, %p3198_p0 }
  0x35   :  { %4621 = sst [smem:[#allocation63_spill]] %s3975_s21 }
  0x36   :  { %4622 = sst [smem:[#allocation64_spill]] %s3981_s17 }
  0x39   :  { %4623 = sst [smem:[#allocation65_spill]] %s3986_s16 }
  0x3a   :  { %3206 = shalt.err (!%p3203_p4)  }
  0x3b   :  { %s3810_s9 = smov [#allocation7]  }
  0x3c   :  { %68 = dma.hbm_to_smem %s66_s22, 16, %s3810_s9, [#allocation6] }
  0x3d   :  { %3699 = dma.done.wait [#allocation6], 16 }
  0x3e   :  { %3700 = vsyncadd [#allocation6], 4294967280 }
  0x3f   :  { %71 = sfence }
  0x40   :  { %72 = vsyncpa [#allocation9], 0 }
  0x41   :  { %74 = vsyncpa [#allocation9 + $0x1], 0 }
  0x42   :  { %75 = vsyncpa [#allocation12], 0 }
  0x43   :  { %76 = vsyncpa [#allocation15], 0 }
  0x44   :  { %77 = vsyncpa [#allocation18], 0 }
  0x45   :  { %78 = vsyncpa [#allocation21], 0 }
  0x46   :  { %79 = vsyncpa [#allocation24], 0 }
  0x47   :  { %80 = vsyncpa [#allocation27], 0 }
  0x48   :  { %81 = vsyncpa [#allocation30], 0 }
  0x49   :  { %82 = vsyncpa [#allocation10], 0 }
  0x4a   :  { %84 = vsyncpa [#allocation10 + $0x1], 0  ;;  %s3990_s0 = smov 0   ;;  %s3992_s5 = smov 0  }
  0x4b   :  { %s3994_s23 = smov 0   ;;  %s3996_s14 = smov 0  }
  0x4c   :  { %s3998_s15 = smov 0   ;;  %s4000_s18 = smov 0  }
  0x4d   :  { %s4002_s22 = smov 0   ;;  %s4004_s26 = smov 0  }
  0x4e   :  { %s4006_s28 = smov 0   ;;  %s4008_s2 = smov 0  }
  0x4f   :  { %s4010_s7 = smov 0  }
  0x50 LB: > { %s4624_s19 = sld [smem:[#allocation54_spill]]  ;;  %s4575_s11 = sadd.s32 4294967295, %s3779_s7   ;;  %s3767_s26 = sphi %s4004_s26, %s4698_s26   ;;  %s3763_s22 = sphi %s4002_s22, %s4697_s22   ;;  %s3759_s18 = sphi %s4000_s18, %s4696_s18   ;;  %s3755_s15 = sphi %s3998_s15, %s4695_s15   ;;  %s3751_s14 = sphi %s3996_s14, %s4694_s14   ;;  %s3747_s23 = sphi %s3994_s23, %s4693_s23   ;;  %s3743_s5 = sphi %s3992_s5, %s4692_s5   ;;  %s3739_s0 = sphi %s3990_s0, %s4691_s0   ;;  %s3779_s7 = sphi %s4010_s7, %s90_s7   ;;  %s3775_s2 = sphi %s4008_s2, %s4700_s2   ;;  %s3771_s28 = sphi %s4006_s28, %s4699_s28  }
  0x51   : > { %s4625_s12 = sld [smem:[#allocation52_spill]]  ;;  %p2650_p5 = scmp.ge.s32.totalorder %s3779_s7, 1 }
  0x52   : > { %s4626_s8 = sld [smem:[#allocation62_spill]]  ;;  %p4049_p6 = scmp.eq.s32.totalorder %s4575_s11, 0 }
  0x53   : > { %s4627_s6 = sld [smem:[#allocation51_spill]]  ;;  %p733_p7 = scmp.lt.s32.totalorder %s3779_s7, 5 }
  0x54   : > { %s4628_s4 = sld [smem:[#allocation53_spill]]  ;;  %s3811_s17 = smov [#allocation11]  }
  0x55   : > { %s4629_s3 = sld [smem:[#allocation55_spill]]  ;;  %p4055_p8 = pnand %p2650_p5, %p733_p7 }
  0x56   : > { %s4630_s1 = sld [smem:[#allocation56_spill]]  ;;  %s752_s21 = sshll.u32 %s3811_s17, 4  ;;  %s753_s21 = int_to_ptr.vmem [resolvable:$true] %s752_s21 }
  0x57   : > { %s4631_s25 = sld [smem:[#allocation46_spill]]  ;;  %p2916_p9 = pneg %p4055_p8 }
  0x58   : > { %4632 = sst [smem:[#allocation66_spill]] %s3739_s0 }
  0x59   : > { %4633 = sst [smem:[#allocation67_spill]] %s3743_s5  ;;  %p4063_p10 = pnand %p2916_p9, %p4049_p6 }
  0x5a   : > { %4634 = sst [smem:[#allocation68_spill]] %s3747_s23 }
  0x5b   : > { %4635 = sst [smem:[#allocation69_spill]] %s3763_s22  ;;  %s790_s22 = sshll.u32 %s3895_s24, 4  ;;  %s4068_s22 = int_to_ptr.hbm [resolvable:$true] %s790_s22 }
  0x5c   : > { %4636 = sst [smem:[#allocation70_spill]] %s3767_s26  ;;  %p4072_p12 = pneg %p4063_p10 }
  0x5d   : > { %s4637_s10 = scalar_select %p4049_p6, 1, 0 }
  0x5e   : > { %s750_s9 = sshll.u32 %s4631_s25, 4  ;;  %s3214_s17 = scalar_lea.hbm %s4631_s25, 16  ;;  %s751_s9 = int_to_ptr.hbm [resolvable:$true] %s750_s9 }
  0x5f   : > { %4638 = sst [smem:[#allocation71_spill]] %s4637_s10  ;;  %s3207_s26 = sshra.s32 %s751_s9, 4  ;;  %s3208_s26 = int_to_ptr.hbm [resolvable:$true] %s3207_s26 }
  0x60   : > { %s4639_s16 = scalar_select %p4055_p8, 1, 0 }
  0x61   : > { %s3209_s13 = scalar_lea.hbm %s3208_s26, 16  ;;  %p3215_p1 = scmp.lt.s32.totalorder %s3208_s26, %s4631_s25 }
  0x62   : > { %4640 = sst [smem:[#allocation72_spill]] %s4639_s16  ;;  %p3210_p11 = scmp.ne.s32.totalorder %s3208_s26, %s3209_s13 }
  0x63   : > { %p3216_p2 = scmp.lt.s32.totalorder %s3214_s17, %s3209_s13 }
  0x64   : > { %p3212_p13 = pnand %p4072_p12, %p3210_p11 }
  0x65   : > { %p3217_p3 = por %p3216_p2, %p3215_p1 }
  0x66   : > { %p3213_p0 = pneg %p3212_p13 }
  0x68   : > { %p3218_p4 = pnand %p3217_p3, %p3213_p0 }
  0x6a   : > { %3221 = shalt.err (!%p3218_p4)
}
  0x6b   : > { %s3812_s0 = smov 64   ;;  %s3813_s5 = smov 4  }
  0x6c   : > { %2919 = dma.hbm_to_vmem [thread:$0]  (!%p4063_p10), %s751_s9, 256, %s753_s21, [#allocation12], %s3812_s0, %s3812_s0, %s3813_s5  }
  0x6d   : > { %s3814_s23 = smov [#allocation14]   ;;  %s818_s26 = sshll.u32 %s4627_s6, 4  ;;  %s4086_s26 = int_to_ptr.hbm [resolvable:$true] %s818_s26 }
  0x6e   : > { %s792_s10 = sshll.u32 %s3814_s23, 4  ;;  %s3237_s13 = sshra.s32 %s4068_s22, 4  ;;  %s793_s10 = int_to_ptr.vmem [resolvable:$true] %s792_s10  ;;  %s3238_s13 = int_to_ptr.hbm [resolvable:$true] %s3237_s13 }
  0x6f   : > { %s3239_s17 = scalar_lea.hbm %s3238_s13, 16  ;;  %s3244_s25 = scalar_lea.hbm %s3895_s24, 16 }
  0x70   : > { %p3240_p5 = scmp.ne.s32.totalorder %s3238_s13, %s3239_s17  ;;  %p3245_p11 = scmp.lt.s32.totalorder %s3238_s13, %s3895_s24 }
  0x71   : > { %p3246_p13 = scmp.lt.s32.totalorder %s3244_s25, %s3239_s17 }
  0x72   : > { %p3242_p7 = pnand %p3240_p5, %p4072_p12 }
  0x73   : > { %p3247_p0 = por %p3246_p13, %p3245_p11 }
  0x74   : > { %p3243_p9 = pneg %p3242_p7 }
  0x76   : > { %p3248_p1 = pnand %p3247_p0, %p3243_p9 }
  0x78   : > { %3251 = shalt.err (!%p3248_p1)
}
  0x79   : > { %2925 = dma.hbm_to_vmem [thread:$0]  (!%p4063_p10), %s4068_s22, 256, %s793_s10, [#allocation15], %s3812_s0, %s3812_s0, %s3813_s5  }
  0x7a   : > { %s847_s21 = sshll.u32 %s3915_s20, 4  ;;  %s3815_s23 = smov [#allocation17]   ;;  %s4100_s21 = int_to_ptr.hbm [resolvable:$true] %s847_s21 }
  0x7b   : > { %s820_s9 = sshll.u32 %s3815_s23, 4  ;;  %s3267_s25 = sshra.s32 %s4086_s26, 4  ;;  %s821_s9 = int_to_ptr.vmem [resolvable:$true] %s820_s9  ;;  %s3268_s25 = int_to_ptr.hbm [resolvable:$true] %s3267_s25 }
  0x7c   : > { %s3269_s13 = scalar_lea.hbm %s3268_s25, 16  ;;  %s3274_s17 = scalar_lea.hbm %s4627_s6, 16 }
  0x7d   : > { %p3270_p2 = scmp.ne.s32.totalorder %s3268_s25, %s3269_s13  ;;  %p3275_p5 = scmp.lt.s32.totalorder %s3268_s25, %s4627_s6 }
  0x7e   : > { %p3276_p7 = scmp.lt.s32.totalorder %s3274_s17, %s3269_s13 }
  0x7f   : > { %p3272_p3 = pnand %p3270_p2, %p4072_p12 }
  0x80   : > { %p3277_p9 = por %p3276_p7, %p3275_p5 }
  0x81   : > { %p3273_p4 = pneg %p3272_p3 }
  0x83   : > { %p3278_p11 = pnand %p3277_p9, %p3273_p4 }
  0x85   : > { %3281 = shalt.err (!%p3278_p11)
}
  0x86   : > { %2931 = dma.hbm_to_vmem [thread:$0]  (!%p4063_p10), %s4086_s26, 256, %s821_s9, [#allocation18], %s3812_s0, %s3812_s0, %s3813_s5  }
  0x87   : > { %s3816_s22 = smov [#allocation20]   ;;  %s871_s23 = sshll.u32 %s4628_s4, 4  ;;  %s4114_s23 = int_to_ptr.hbm [resolvable:$true] %s871_s23 }
  0x88   : > { %s849_s10 = sshll.u32 %s3816_s22, 4  ;;  %s3297_s25 = sshra.s32 %s4100_s21, 4  ;;  %s850_s10 = int_to_ptr.vmem [resolvable:$true] %s849_s10  ;;  %s3298_s25 = int_to_ptr.hbm [resolvable:$true] %s3297_s25 }
  0x89   : > { %s3299_s13 = scalar_lea.hbm %s3298_s25, 1  ;;  %s3304_s17 = scalar_lea.hbm %s3915_s20, 1 }
  0x8a   : > { %p3300_p13 = scmp.ne.s32.totalorder %s3298_s25, %s3299_s13  ;;  %p3305_p2 = scmp.lt.s32.totalorder %s3298_s25, %s3915_s20 }
  0x8b   : > { %p3306_p3 = scmp.lt.s32.totalorder %s3304_s17, %s3299_s13 }
  0x8c   : > { %p3302_p0 = pnand %p3300_p13, %p4072_p12 }
  0x8d   : > { %p3307_p4 = por %p3306_p3, %p3305_p2 }
  0x8e   : > { %p3303_p1 = pneg %p3302_p0 }
  0x90   : > { %p3308_p5 = pnand %p3307_p4, %p3303_p1 }
  0x92   : > { %3311 = shalt.err (!%p3308_p5)
}
  0x93   : > { %2937 = dma.hbm_to_vmem [thread:$0]  (!%p4063_p10), %s4100_s21, 16, %s850_s10, [#allocation21]  }
  0x94   : > { %s894_s26 = sshll.u32 %s4629_s3, 4  ;;  %s3817_s9 = smov [#allocation23]   ;;  %s4125_s26 = int_to_ptr.hbm [resolvable:$true] %s894_s26 }
  0x95   : > { %s873_s22 = sshll.u32 %s3817_s9, 4  ;;  %s3327_s25 = sshra.s32 %s4114_s23, 4  ;;  %s874_s22 = int_to_ptr.vmem [resolvable:$true] %s873_s22  ;;  %s3328_s25 = int_to_ptr.hbm [resolvable:$true] %s3327_s25 }
  0x96   : > { %s3329_s13 = scalar_lea.hbm %s3328_s25, 1  ;;  %s3334_s17 = scalar_lea.hbm %s4628_s4, 1 }
  0x97   : > { %p3330_p7 = scmp.ne.s32.totalorder %s3328_s25, %s3329_s13  ;;  %p3335_p13 = scmp.lt.s32.totalorder %s3328_s25, %s4628_s4 }
  0x98   : > { %p3336_p0 = scmp.lt.s32.totalorder %s3334_s17, %s3329_s13 }
  0x99   : > { %p3332_p9 = pnand %p3330_p7, %p4072_p12 }
  0x9a   : > { %p3337_p1 = por %p3336_p0, %p3335_p13 }
  0x9b   : > { %p3333_p11 = pneg %p3332_p9 }
  0x9d   : > { %p3338_p2 = pnand %p3337_p1, %p3333_p11 }
  0x9f   : > { %3341 = shalt.err (!%p3338_p2)
}
  0xa0   : > { %2943 = dma.hbm_to_vmem [thread:$0]  (!%p4063_p10), %s4114_s23, 16, %s874_s22, [#allocation24]  }
  0xa1   : > { %s3818_s21 = smov [#allocation26]   ;;  %s764_s9 = sshll.u32 %s3870_s29, 4  ;;  %s4136_s9 = int_to_ptr.hbm [resolvable:$true] %s764_s9 }
  0xa2   : > { %s896_s10 = sshll.u32 %s3818_s21, 4  ;;  %s3357_s25 = sshra.s32 %s4125_s26, 4  ;;  %s897_s10 = int_to_ptr.vmem [resolvable:$true] %s896_s10  ;;  %s3358_s25 = int_to_ptr.hbm [resolvable:$true] %s3357_s25 }
  0xa3   : > { %s3359_s13 = scalar_lea.hbm %s3358_s25, 16  ;;  %s3364_s17 = scalar_lea.hbm %s4629_s3, 16 }
  0xa4   : > { %p3360_p3 = scmp.ne.s32.totalorder %s3358_s25, %s3359_s13  ;;  %p3365_p7 = scmp.lt.s32.totalorder %s3358_s25, %s4629_s3 }
  0xa5   : > { %p3366_p9 = scmp.lt.s32.totalorder %s3364_s17, %s3359_s13 }
  0xa6   : > { %p3362_p4 = pnand %p3360_p3, %p4072_p12 }
  0xa7   : > { %p3367_p11 = por %p3366_p9, %p3365_p7 }
  0xa8   : > { %p3363_p5 = pneg %p3362_p4 }
  0xaa   : > { %p3368_p13 = pnand %p3367_p11, %p3363_p5 }
  0xac   : > { %3371 = shalt.err (!%p3368_p13)
}
  0xad   : > { %2949 = dma.hbm_to_vmem [thread:$0]  (!%p4063_p10), %s4125_s26, 256, %s897_s10, [#allocation27], %s3812_s0, %s3812_s0, %s3813_s5  }
  0xae   : > { %s804_s23 = sshll.u32 %s3900_s30, 4  ;;  %s3819_s22 = smov [#allocation13]   ;;  %s4150_s23 = int_to_ptr.hbm [resolvable:$true] %s804_s23 }
  0xaf   : > { %s766_s21 = sshll.u32 %s3819_s22, 4  ;;  %s3387_s25 = sshra.s32 %s4136_s9, 4  ;;  %s767_s21 = int_to_ptr.vmem [resolvable:$true] %s766_s21  ;;  %s3388_s25 = int_to_ptr.hbm [resolvable:$true] %s3387_s25 }
  0xb0   : > { %s3389_s13 = scalar_lea.hbm %s3388_s25, 16  ;;  %s3394_s17 = scalar_lea.hbm %s3870_s29, 16 }
  0xb1   : > { %p3390_p0 = scmp.ne.s32.totalorder %s3388_s25, %s3389_s13  ;;  %p3395_p3 = scmp.lt.s32.totalorder %s3388_s25, %s3870_s29 }
  0xb2   : > { %p3396_p4 = scmp.lt.s32.totalorder %s3394_s17, %s3389_s13 }
  0xb3   : > { %p3392_p1 = pnand %p3390_p0, %p4072_p12 }
  0xb4   : > { %p3397_p5 = por %p3396_p4, %p3395_p3 }
  0xb5   : > { %p3393_p2 = pneg %p3392_p1 }
  0xb7   : > { %p3398_p7 = pnand %p3397_p5, %p3393_p2 }
  0xb9   : > { %3401 = shalt.err (!%p3398_p7)
}
  0xba   : > { %2922 = dma.hbm_to_vmem [thread:$0]  (!%p4063_p10), %s4136_s9, 256, %s767_s21, [#allocation12], %s3812_s0, %s3812_s0, %s3813_s5  }
  0xbb   : > { %s3820_s26 = smov [#allocation16]   ;;  %s832_s22 = sshll.u32 %s4625_s12, 4  ;;  %s4164_s22 = int_to_ptr.hbm [resolvable:$true] %s832_s22 }
  0xbc   : > { %s806_s10 = sshll.u32 %s3820_s26, 4  ;;  %s3417_s25 = sshra.s32 %s4150_s23, 4  ;;  %s807_s10 = int_to_ptr.vmem [resolvable:$true] %s806_s10  ;;  %s3418_s25 = int_to_ptr.hbm [resolvable:$true] %s3417_s25 }
  0xbd   : > { %s3419_s13 = scalar_lea.hbm %s3418_s25, 16  ;;  %s3424_s17 = scalar_lea.hbm %s3900_s30, 16 }
  0xbe   : > { %p3420_p9 = scmp.ne.s32.totalorder %s3418_s25, %s3419_s13  ;;  %p3425_p0 = scmp.lt.s32.totalorder %s3418_s25, %s3900_s30 }
  0xbf   : > { %p3426_p1 = scmp.lt.s32.totalorder %s3424_s17, %s3419_s13 }
  0xc0   : > { %p3422_p11 = pnand %p3420_p9, %p4072_p12 }
  0xc1   : > { %p3427_p2 = por %p3426_p1, %p3425_p0 }
  0xc2   : > { %p3423_p13 = pneg %p3422_p11 }
  0xc4   : > { %p3428_p3 = pnand %p3427_p2, %p3423_p13 }
  0xc6   : > { %3431 = shalt.err (!%p3428_p3)
}
  0xc7   : > { %2928 = dma.hbm_to_vmem [thread:$0]  (!%p4063_p10), %s4150_s23, 256, %s807_s10, [#allocation15], %s3812_s0, %s3812_s0, %s3813_s5  }
  0xc8   : > { %s859_s9 = sshll.u32 %s3920_s27, 4  ;;  %s3821_s21 = smov [#allocation19]   ;;  %s4178_s9 = int_to_ptr.hbm [resolvable:$true] %s859_s9 }
  0xc9   : > { %s834_s26 = sshll.u32 %s3821_s21, 4  ;;  %s3447_s25 = sshra.s32 %s4164_s22, 4  ;;  %s835_s26 = int_to_ptr.vmem [resolvable:$true] %s834_s26  ;;  %s3448_s25 = int_to_ptr.hbm [resolvable:$true] %s3447_s25 }
  0xca   : > { %s3449_s13 = scalar_lea.hbm %s3448_s25, 16  ;;  %s3454_s17 = scalar_lea.hbm %s4625_s12, 16 }
  0xcb   : > { %p3450_p4 = scmp.ne.s32.totalorder %s3448_s25, %s3449_s13  ;;  %p3455_p9 = scmp.lt.s32.totalorder %s3448_s25, %s4625_s12 }
  0xcc   : > { %p3456_p11 = scmp.lt.s32.totalorder %s3454_s17, %s3449_s13 }
  0xcd   : > { %p3452_p5 = pnand %p3450_p4, %p4072_p12 }
  0xce   : > { %p3457_p13 = por %p3456_p11, %p3455_p9 }
  0xcf   : > { %p3453_p7 = pneg %p3452_p5 }
  0xd1   : > { %p3458_p0 = pnand %p3457_p13, %p3453_p7 }
  0xd3   : > { %3461 = shalt.err (!%p3458_p0)
}
  0xd4   : > { %2934 = dma.hbm_to_vmem [thread:$0]  (!%p4063_p10), %s4164_s22, 256, %s835_s26, [#allocation18], %s3812_s0, %s3812_s0, %s3813_s5  }
  0xd5   : > { %s3822_s23 = smov [#allocation22]   ;;  %s883_s21 = sshll.u32 %s4624_s19, 4  ;;  %s4192_s21 = int_to_ptr.hbm [resolvable:$true] %s883_s21 }
  0xd6   : > { %s861_s10 = sshll.u32 %s3822_s23, 4  ;;  %s3477_s25 = sshra.s32 %s4178_s9, 4  ;;  %s862_s10 = int_to_ptr.vmem [resolvable:$true] %s861_s10  ;;  %s3478_s25 = int_to_ptr.hbm [resolvable:$true] %s3477_s25 }
  0xd7   : > { %s3479_s13 = scalar_lea.hbm %s3478_s25, 1  ;;  %s3484_s17 = scalar_lea.hbm %s3920_s27, 1 }
  0xd8   : > { %p3480_p1 = scmp.ne.s32.totalorder %s3478_s25, %s3479_s13  ;;  %p3485_p4 = scmp.lt.s32.totalorder %s3478_s25, %s3920_s27 }
  0xd9   : > { %p3486_p5 = scmp.lt.s32.totalorder %s3484_s17, %s3479_s13 }
  0xda   : > { %p3482_p2 = pnand %p3480_p1, %p4072_p12 }
  0xdb   : > { %p3487_p7 = por %p3486_p5, %p3485_p4 }
  0xdc   : > { %p3483_p3 = pneg %p3482_p2 }
  0xde   : > { %p3488_p9 = pnand %p3487_p7, %p3483_p3 }
  0xe0   : > { %3491 = shalt.err (!%p3488_p9)
}
  0xe1   : > { %2940 = dma.hbm_to_vmem [thread:$0]  (!%p4063_p10), %s4178_s9, 16, %s862_s10, [#allocation21]  }
  0xe2   : > { %s909_s0 = sshll.u32 %s4630_s1, 4  ;;  %s3823_s5 = smov [#allocation25]   ;;  %s4203_s0 = int_to_ptr.hbm [resolvable:$true] %s909_s0 }
  0xe3   : > { %s885_s22 = sshll.u32 %s3823_s5, 4  ;;  %s3507_s26 = sshra.s32 %s4192_s21, 4  ;;  %s886_s22 = int_to_ptr.vmem [resolvable:$true] %s885_s22  ;;  %s3508_s26 = int_to_ptr.hbm [resolvable:$true] %s3507_s26 }
  0xe4   : > { %s3509_s23 = scalar_lea.hbm %s3508_s26, 1  ;;  %s3514_s25 = scalar_lea.hbm %s4624_s19, 1 }
  0xe5   : > { %p3510_p11 = scmp.ne.s32.totalorder %s3508_s26, %s3509_s23  ;;  %p3515_p1 = scmp.lt.s32.totalorder %s3508_s26, %s4624_s19 }
  0xe6   : > { %p3516_p2 = scmp.lt.s32.totalorder %s3514_s25, %s3509_s23 }
  0xe7   : > { %p3512_p13 = pnand %p3510_p11, %p4072_p12 }
  0xe8   : > { %p3517_p3 = por %p3516_p2, %p3515_p1 }
  0xe9   : > { %p3513_p0 = pneg %p3512_p13 }
  0xeb   : > { %p3518_p4 = pnand %p3517_p3, %p3513_p0 }
  0xed   : > { %3521 = shalt.err (!%p3518_p4)
}
  0xee   : > { %2946 = dma.hbm_to_vmem [thread:$0]  (!%p4063_p10), %s4192_s21, 16, %s886_s22, [#allocation24]  }
  0xef   : > { %s3824_s9 = smov [#allocation28]   ;;  %s936_s13 = sshll.u32 %s4626_s8, 4  ;;  %s4214_s13 = int_to_ptr.hbm [resolvable:$true] %s936_s13 }
  0xf0   : > { %s911_s10 = sshll.u32 %s3824_s9, 4  ;;  %s3537_s17 = sshra.s32 %s4203_s0, 4  ;;  %s912_s10 = int_to_ptr.vmem [resolvable:$true] %s911_s10  ;;  %s3538_s17 = int_to_ptr.hbm [resolvable:$true] %s3537_s17 }
  0xf1   : > { %s3539_s5 = scalar_lea.hbm %s3538_s17, 1  ;;  %s3544_s26 = scalar_lea.hbm %s4630_s1, 1 }
  0xf2   : > { %p3540_p5 = scmp.ne.s32.totalorder %s3538_s17, %s3539_s5  ;;  %p3545_p11 = scmp.lt.s32.totalorder %s3538_s17, %s4630_s1 }
  0xf3   : > { %p3546_p13 = scmp.lt.s32.totalorder %s3544_s26, %s3539_s5 }
  0xf4   : > { %p3542_p7 = pnand %p3540_p5, %p4072_p12 }
  0xf5   : > { %p3547_p0 = por %p3546_p13, %p3545_p11 }
  0xf6   : > { %p3543_p9 = pneg %p3542_p7 }
  0xf8   : > { %p3548_p1 = pnand %p3547_p0, %p3543_p9 }
  0xfa   : > { %3551 = shalt.err (!%p3548_p1)
}
  0xfb   : > { %2952 = dma.hbm_to_vmem [thread:$0]  (!%p4063_p10), %s4203_s0, 16, %s912_s10, [#allocation27]  }
  0xfc   : > { %s3825_s21 = smov [#allocation29]   ;;  %s3567_s23 = sshra.s32 %s4214_s13, 4  ;;  %s3568_s23 = int_to_ptr.hbm [resolvable:$true] %s3567_s23 }
  0xfd   : > { %s938_s22 = sshll.u32 %s3825_s21, 4  ;;  %s3569_s25 = scalar_lea.hbm %s3568_s23, 1  ;;  %s939_s22 = int_to_ptr.vmem [resolvable:$true] %s938_s22 }
  0xfe   : > { %p3570_p2 = scmp.ne.s32.totalorder %s3568_s23, %s3569_s25  ;;  %s3574_s9 = scalar_lea.hbm %s4626_s8, 1 }
  0xff   : > { %p3575_p5 = scmp.lt.s32.totalorder %s3568_s23, %s4626_s8  ;;  %p3576_p7 = scmp.lt.s32.totalorder %s3574_s9, %s3569_s25 }
 0x100   : > { %p3572_p3 = pnand %p3570_p2, %p4072_p12 }
 0x101   : > { %p3577_p9 = por %p3576_p7, %p3575_p5 }
 0x102   : > { %p3573_p4 = pneg %p3572_p3 }
 0x104   : > { %p3578_p11 = pnand %p3577_p9, %p3573_p4 }
 0x106   : > { %3581 = shalt.err (!%p3578_p11)
}
 0x107   : > { %s4644_s0 = sld [smem:[#allocation68_spill]]  ;;  %s2649_s10 = sadd.s32 4294967294, %s3779_s7  }
 0x108   : > { %2955 = dma.hbm_to_vmem [thread:$0]  (!%p4063_p10), %s4214_s13, 16, %s939_s22, [#allocation30]  }
 0x109   : > { %s4645_s17 = sld [smem:[#allocation67_spill]]  ;;  %s99_s5 = sadd.s32 1, %s3771_s28 }
 0x10a   : > { %s102_s11 = sadd.s32 1, %s3775_s2  ;;  %p100_p12 = scmp.ge.s32.totalorder %s99_s5, 2 }
 0x10b   : > { %s4646_s26 = sld [smem:[#allocation66_spill]]  ;;  %s135_s21 = sadd.s32 1, %s3759_s18 }
 0x10c   : > { %p142_p13 = scmp.ne.s32.totalorder %s3759_s18, %s3755_s15  ;;  %p143_p0 = scmp.eq.s32.totalorder %s3779_s7, 0 }
 0x10d   : > { %s4702_s5 = smov (%p100_p12, %s99_s5), 0  ;;  %s4704_s11 = smov (!%p100_p12, %s102_s11), %s3775_s2 }
 0x10e   : > { %p4242_p1 = por %p143_p0, %p142_p13  ;;  %p148_p10 = scmp.ne.s32.totalorder %s3755_s15, %s3751_s14 }
 0x10f   : > { %p104_p2 = scmp.ge.s32.totalorder %s4704_s11, 2  ;;  %s705_s22 = ssub.s32 %s3771_s28, %s4702_s5 }
 0x110   : > { %p4252_p3 = por %p4049_p6, %p148_p10  ;;  %s709_s25 = sadd.s32 1, %s4644_s0 }
 0x111   : > { %s4706_s11 = smov (%p104_p2, %s4704_s11), 0  ;;  %p719_p4 = scmp.ne.s32.totalorder %s4644_s0, %s4645_s17 }
 0x112   : > { %s4649_s9 = sadd.s32 4294967295, %s3779_s7   ;;  %s4650_s1 = sld [smem:[#allocation43_spill]] }
 0x113   : > { %p720_p5 = scmp.eq.s32.totalorder %s4649_s9, 3  ;;  %s132_s3 = ssub.s32 %s3775_s2, %s4706_s11 }
 0x114   : > { %p725_p7 = scmp.ne.s32.totalorder %s4645_s17, %s4646_s26  ;;  %p133_p9 = scmp.eq.s32.totalorder %s132_s3, 0 }
 0x115   : > { %s706_s14 = sor.u32 %s705_s22, %s132_s3  ;;  %p4267_p12 = por %p720_p5, %p719_p4 }
 0x116   : > { %p707_p11 = scmp.eq.s32.totalorder %s706_s14, 0  ;;  %p726_p13 = scmp.eq.s32.totalorder %s2649_s10, 3 }
 0x117   : > { %s4651_s16 = scalar_select %p4267_p12, 1, 0 }
 0x118   : > { %s4272_s4 = scalar_select %p133_p9, %s3759_s18, %s135_s21  }
 0x119   : > { %s4708_s0 = smov (!%p707_p11, %s4644_s0), %s709_s25  ;;  %p2977_p0 = scmp.lt.s32.totalorder %s3779_s7, 4 }
 0x11a   : > { %s963_s6 = sand.u32 1, %s3759_s18   ;;  %s2666_s8 = sshll.u32 %s3775_s2, 2 }
 0x11b   : > { %p4280_p10 = por %p726_p13, %p725_p7  ;;  %s2665_s17 = sshll.u32 %s963_s6, 2 }
 0x11c   : > { %s971_s3 = scalar_lea.hbm %s4650_s1, %s2666_s8  ;;  %s967_s22 = scalar_lea.vmem [#allocation8], %s2665_s17 }
 0x11d   : > { %s4652_s9 = scalar_select %p4280_p10, 1, 0 }
 0x11e   : > { %s973_s26 = sshll.u32 %s971_s3, 4  ;;  %s975_s14 = sshll.u32 %s967_s22, 4  ;;  %s974_s26 = int_to_ptr.hbm [resolvable:$true] %s973_s26  ;;  %s976_s14 = int_to_ptr.vmem [resolvable:$true] %s975_s14 }
 0x11f   : > { %p4287_p2 = pnand %p2977_p0, %p4242_p1  ;;  %s964_s10 = scalar_lea.sflag [#allocation9], %s963_s6 }
 0x120   : > { %s3597_s25 = sshra.s32 %s974_s26, 4  ;;  %s3604_s8 = scalar_lea.hbm %s4650_s1, 8  ;;  %s3598_s25 = int_to_ptr.hbm [resolvable:$true] %s3597_s25 }
 0x121   : > { %s3599_s12 = scalar_lea.hbm %s3598_s25, 4  ;;  %p3601_p5 = pneg %p4287_p2 }
 0x122   : > { %p3600_p4 = scmp.ne.s32.totalorder %s3598_s25, %s3599_s12  ;;  %p3605_p11 = scmp.lt.s32.totalorder %s3598_s25, %s4650_s1 }
 0x123   : > { %p3606_p13 = scmp.lt.s32.totalorder %s3604_s8, %s3599_s12 }
 0x124   : > { %p3602_p7 = pnand %p3601_p5, %p3600_p4 }
 0x125   : > { %p3607_p10 = por %p3606_p13, %p3605_p11 }
 0x126   : > { %p3603_p9 = pneg %p3602_p7 }
 0x128   : > { %p3608_p12 = pnand %p3607_p10, %p3603_p9 }
 0x12a   : > { %3611 = shalt.err (!%p3608_p12)
}
 0x12b   : > { %2959 = dma.hbm_to_vmem [thread:$0]  (!%p4287_p2), %s974_s26, 64, %s976_s14, %s964_s10  }
 0x12c   : > { %984 = sbr.rel (%p4055_p8) target bundleno = 4025 (0xfb9), region = 132  ;;  %s986_s6 = sand.u32 (!%p4055_p8), 1, %s3755_s15  }
 0x12d   : > { %s4300_s17 = sshll.u32 (!%p4055_p8), %s986_s6, 2  ;;  %s987_s3 = scalar_lea.sflag (!%p4055_p8), [#allocation9], %s986_s6 }
 0x12e   : > { %s990_s22 = scalar_lea.vmem (!%p4055_p8), [#allocation8], %s4300_s17 }
 0x131   : > { %3702 = dma.done.wait (%p4252_p3), %s987_s3, 64  }
 0x132   : > { %3704 = vsyncadd (%p4252_p3), %s987_s3, 4294967232 }
 0x133   : > { %3706 = dma.done.wait (%p4049_p6), [#allocation12], 512  }
 0x134   : > { %3708 = vsyncadd (%p4049_p6), [#allocation12], 4294966784 }
 0x135   : > { %3710 = dma.done.wait (%p4049_p6), [#allocation15], 512  }
 0x136   : > { %3712 = vsyncadd (%p4049_p6), [#allocation15], 4294966784 }
 0x137   : > { %3714 = dma.done.wait (%p4049_p6), [#allocation18], 512  }
 0x138   : > { %3716 = vsyncadd (%p4049_p6), [#allocation18], 4294966784 }
 0x139   : > { %3718 = dma.done.wait (%p4049_p6), [#allocation21], 32  }
 0x13a   : > { %3720 = vsyncadd (%p4049_p6), [#allocation21], 4294967264 }
 0x13b   : > { %3722 = dma.done.wait (%p4049_p6), [#allocation24], 32  }
 0x13c   : > { %3724 = vsyncadd (%p4049_p6), [#allocation24], 4294967264 }
 0x13d   : > { %3726 = dma.done.wait (%p4049_p6), [#allocation27], 272  }
 0x13e   : > { %3728 = vsyncadd (%p4049_p6), [#allocation27], 4294967024 }
 0x13f   : > { %3730 = dma.done.wait (%p4049_p6), [#allocation30], 16  }
 0x140   : > { %3732 = vsyncadd (%p4049_p6), [#allocation30], 4294967280  ;;  %s4656_s23 = sld [smem:[#allocation67_spill]] }
 0x141   : > { %s4657_s26 = sld [smem:[#allocation70_spill]] }
 0x142   : > { %s4658_s14 = sld [smem:[#allocation42_spill]] }
 0x143   : > { %s4659_s6 = sld [smem:[#allocation69_spill]] }
 0x146   : > { %s4594_s21 = sand.u32 1, %s4656_s23  }
 0x147   : > { %p1134_p8 = scmp.lt.s32.totalorder %s4657_s26, 1  ;;  %s4339_s10 = sshll.u32 %s4594_s21, 3 }
 0x149   : > { %s4710_s26 = smov (!%p1134_p8, %s4657_s26), 1  ;;  %p2685_p1 = scmp.ne.s32.totalorder %s4659_s6, 0 }
 0x14a   : > { %s2829_s25 = sshll.u32 %s4710_s26, 3  ;;  %s4660_s3 = sld [smem:[#allocation45_spill]] (!%p2685_p1) }
 0x14b   : > { %s4343_s8 = scalar_lea.vmem %s4658_s14, %s2829_s25  ;;  %1143 = sbr.rel (%p2685_p1) target bundleno = 757 (0x2f5), region = 192 }
 0x14c   : > { %s4661_s17 = sld [smem:[#allocation59_spill]] (!%p2685_p1) }
 0x14d   : > { %s4663_s12 = sld [smem:[#allocation48_spill]] (!%p2685_p1) }
 0x14e   : > { %s4664_s23 = sld [smem:[#allocation49_spill]] (!%p2685_p1) }
 0x150   : > { %v2857_v0 = vld [vmem:[%s4343_s8] sm:$0xff]   ;;  %vm1150_vm0 = vcmask 261120   ;;  %v3826_v5 = vmov 32.0   ;;  %v2835_v22 = vld [vmem:[#allocation16 + $0x8] sm:$0xff]  ;;  %v2837_v23 = vld [vmem:[#allocation17 + $0x8] sm:$0xff]  ;;  %vm1252_vm8 = vcmask 257024  }
 0x151   : > { %v2858_v1 = vunpack.c.l.bf16 %v2857_v0  ;;  %v2859_v3 = vunpack.c.h.bf16 %v2857_v0  ;;  %3137 = vrcp.f32 %v3826_v5  ;;  %1323 = vmatpush.bf16.msra.mxu2 %v2835_v22  ;;  %1358 = vmatpush.bf16.msra.mxu3 %v2837_v23  ;;  %v2834_v24 = vld [vmem:[#allocation16] sm:$0xff]  ;;  %v2836_v25 = vld [vmem:[#allocation17] sm:$0xff]  ;;  %v1293_v26 = vld [vmem:[%s990_s22] sm:$0xf]  ;;  %s4662_s22 = sld [smem:[#allocation60_spill]] }
 0x152   : > { %v2831_v27 = vld [vmem:[%s4660_s3 + $0x8] sm:$0xff]  ;;  %v2830_v30 = vld [vmem:[%s4660_s3] sm:$0xff] }
 0x153   : > { %v1151_v2 = vsel %vm1150_vm0, %v2858_v1, 0.0  ;;  %v1154_v4 = vsel %vm1150_vm0, %v2859_v3, 0.0  ;;  %v2833_v28 = vld [vmem:[#allocation11 + $0x8] sm:$0xff]  ;;  %1242 = vmatpush.bf16.msra.mxu0 %v2831_v27  ;;  %v2832_v31 = vld [vmem:[#allocation11] sm:$0xff] }
 0x154   : > { %1152 = vadd.xlane.f32.xlu0 %v1151_v2  ;;  %1281 = vmatpush.bf16.msra.mxu1 %v2833_v28  ;;  %v3131_v50 = vld [vmem:[%s4661_s17] ss:$0 sm:$0xff]  ;;  %v3133_v60 = vld [vmem:[#allocation22] ss:$0 sm:$0xff]  ;;  %v3134_v61 = vld [vmem:[#allocation23] ss:$0 sm:$0xff] }
 0x155   : > { %1324 = vmatpush.bf16.msra.mxu2 %v2834_v24  ;;  %1359 = vmatpush.bf16.msra.mxu3 %v2836_v25 }
 0x157   : > { %v3138_v6 = vpop.eup %3137  ;;  %1243 = vmatpush.bf16.msra.mxu0 %v2830_v30  ;;  %v3132_v55 = vld [vmem:[%s4662_s22] ss:$0 sm:$0xff] }
 0x158   : > { %v1158_v7 = vmul.f32 32.0, %v3138_v6  ;;  %vm1162_vm1 = vweird.f32 %v3138_v6  ;;  %2712 = vmatmul.msk.bf16.vlgmr.msra.gmra.mxu2 %vm1150_vm0, %v1293_v26  ;;  %2721 = vmatmul.msk.bf16.vlgmr.msra.gmra.mxu3 %vm1150_vm0, %v1293_v26 }
 0x159   : > { %1282 = vmatpush.bf16.msra.mxu1 %v2832_v31 }
 0x15a   : > { %v1159_v8 = vsub.f32 1.0, %v1158_v7  ;;  %v3136_v7 = vld [vmem:[%s4664_s23] ss:$0 sm:$0xff] }
 0x15c   : > { %1155 = vadd.xlane.f32.xlu0 %v1154_v4  ;;  %v1160_v9 = vmul.f32 %v3138_v6, %v1159_v8 }
 0x15e   : > { %v1161_v10 = vadd.f32 %v3138_v6, %v1160_v9 }
 0x160   : > { %v1163_v11 = vsel %vm1162_vm1, %v3138_v6, %v1161_v10  ;;  %v3135_v6 = vld [vmem:[%s4663_s12] ss:$0 sm:$0xff] }
 0x1c7   : > { %v1153_v12 = vpop.xlane.xlu0 %1152 }
 0x1c8   : > { %v1164_v13 = vmul.f32 %v1163_v11, %v1153_v12 }
 0x1ca   : > { %v1166_v14 = vsub.f32 %v2858_v1, %v1164_v13 }
 0x1cc   : > { %v1168_v15 = vmul.f32 %v1166_v14, %v1166_v14 }
 0x1ce   : > { %v1170_v16 = vsel %vm1150_vm0, %v1168_v15, 0.0 }
 0x1cf   : > { %1171 = vadd.xlane.f32.xlu1 %v1170_v16  ;;  %v1156_v17 = vpop.xlane.xlu0 %1155 }
 0x1d0   : > { %v1165_v18 = vmul.f32 %v1163_v11, %v1156_v17 }
 0x1d2   : > { %v1167_v19 = vsub.f32 %v2859_v3, %v1165_v18 }
 0x1d4   : > { %v1169_v20 = vmul.f32 %v1167_v19, %v1167_v19 }
 0x1d6   : > { %v1173_v21 = vsel %vm1150_vm0, %v1169_v20, 0.0 }
 0x1d7   : > { %1174 = vadd.xlane.f32.xlu1 %v1173_v21 }
 0x1db   : > { %v1326_v62 = vpop.f32.mrf.mxu2  ;;  %v1361_v63 = vpop.f32.mrf.mxu3 }
 0x1dc   : > { %v1327_v0 = vadd.f32 %v3133_v60, %v1326_v62  ;;  %v1362_v1 = vadd.f32 %v3134_v61, %v1361_v63 }
 0x1de   : > { %v1330_v2 = vpack.c.bf16 %v1327_v0, %v1327_v0  ;;  %v1365_v3 = vpack.c.bf16 %v1362_v1, %v1362_v1 }
 0x1e0   : > { %1331 = vst.msk [vmem:[#allocation4] sm:$0xf] %vm1252_vm8, %v1330_v2 }
 0x1e1   : > { %1366 = vst.msk [vmem:[#allocation5] sm:$0xf] %vm1252_vm8, %v1365_v3 }
 0x1e3   : > { %v1328_v4 = vpop.f32.mrf.mxu2  ;;  %v1363_v5 = vpop.f32.mrf.mxu3 }
 0x242   : > { %v1172_v29 = vpop.xlane.xlu1 %1171 }
 0x243   : > { %v1176_v32 = vmul.f32 %v1172_v29, %v1163_v11 }
 0x245   : > { %v1178_v33 = vadd.f32 1e-06, %v1176_v32 }
 0x247   : > { %3139 = vrsqrt.f32 %v1178_v33  ;;  %vm1186_vm3 = vweird.f32 %v1178_v33 }
 0x24a   : > { %v1175_v34 = vpop.xlane.xlu1 %1174 }
 0x24b   : > { %v1177_v35 = vmul.f32 %v1175_v34, %v1163_v11 }
 0x24d   : > { %v3140_v36 = vpop.eup %3139  ;;  %v1179_v37 = vadd.f32 1e-06, %v1177_v35 }
 0x24e   : > { %v1181_v38 = vmul.f32 %v3140_v36, %v1178_v33  ;;  %vm1187_vm2 = vweird.f32 %v3140_v36 }
 0x24f   : > { %3141 = vrsqrt.f32 %v1179_v37  ;;  %vm1188_vm4 = vmor %vm1186_vm3, %vm1187_vm2  ;;  %vm1196_vm6 = vweird.f32 %v1179_v37 }
 0x250   : > { %v1182_v39 = vmul.f32 %v3140_v36, %v1181_v38 }
 0x252   : > { %v1183_v40 = vmul.f32 0.5, %v1182_v39 }
 0x254   : > { %v1184_v41 = vsub.f32 1.5, %v1183_v40 }
 0x255   : > { %v3142_v42 = vpop.eup %3141 }
 0x256   : > { %v1185_v43 = vmul.f32 %v3140_v36, %v1184_v41  ;;  %v1191_v44 = vmul.f32 %v3142_v42, %v1179_v37  ;;  %vm1197_vm5 = vweird.f32 %v3142_v42 }
 0x257   : > { %vm1198_vm7 = vmor %vm1196_vm6, %vm1197_vm5 }
 0x258   : > { %v1192_v45 = vmul.f32 %v3142_v42, %v1191_v44  ;;  %v1189_v46 = vsel %vm1188_vm4, %v3140_v36, %v1185_v43 }
 0x259   : > { %v1200_v49 = vmul.f32 %v1189_v46, %v1166_v14 }
 0x25a   : > { %v1193_v47 = vmul.f32 0.5, %v1192_v45 }
 0x25b   : > { %v1205_v54 = vmul.f32 %v3131_v50, %v1200_v49 }
 0x25c   : > { %v1194_v48 = vsub.f32 1.5, %v1193_v47 }
 0x25d   : > { %v1210_v57 = vadd.f32 %v3132_v55, %v1205_v54 }
 0x25e   : > { %v1195_v51 = vmul.f32 %v3142_v42, %v1194_v48 }
 0x260   : > { %v1199_v52 = vsel %vm1198_vm7, %v3142_v42, %v1195_v51 }
 0x261   : > { %v1201_v53 = vmul.f32 %v1199_v52, %v1167_v19 }
 0x263   : > { %v1206_v56 = vmul.f32 %v3131_v50, %v1201_v53 }
 0x265   : > { %v1211_v58 = vadd.f32 %v3132_v55, %v1206_v56 }
 0x267   : > { %v1212_v59 = vpack.c.bf16 %v1211_v58, %v1210_v57 }
 0x269   : > { %2694 = vmatmul.msk.bf16.vlgmr.msra.gmra.mxu0 %vm1150_vm0, %v1212_v59  ;;  %2703 = vmatmul.msk.bf16.vlgmr.msra.gmra.mxu1 %vm1150_vm0, %v1212_v59 }
 0x2e6   : > { %v1245_v8 = vpop.f32.mrf.mxu0  ;;  %v1284_v9 = vpop.f32.mrf.mxu1 }
 0x2e7   : > { %v1246_v10 = vadd.f32 %v3135_v6, %v1245_v8  ;;  %v1285_v11 = vadd.f32 %v3136_v7, %v1284_v9 }
 0x2e9   : > { %v1250_v12 = vpack.c.bf16 %v1246_v10, %v1246_v10  ;;  %v1289_v13 = vpack.c.bf16 %v1285_v11, %v1285_v11 }
 0x2eb   : > { %1253 = vst.msk [vmem:[#allocation2] sm:$0xf] %vm1252_vm8, %v1250_v12 }
 0x2ec   : > { %1291 = vst.msk [vmem:[#allocation3] sm:$0xf] %vm1252_vm8, %v1289_v13 }
 0x2ee   : > { %v1247_v14 = vpop.f32.mrf.mxu0  ;;  %v1286_v15 = vpop.f32.mrf.mxu1 }
 0x2ef   : > { %v1248_v16 = vadd.f32 %v3135_v6, %v1247_v14  ;;  %v1287_v17 = vadd.f32 %v3136_v7, %v1286_v15 }
 0x2f1   : > { %v1251_v18 = vpack.c.bf16 %v1248_v16, %v1248_v16  ;;  %v1290_v19 = vpack.c.bf16 %v1287_v17, %v1287_v17 }
 0x2f3   : > { %1254 = vst.msk [vmem:[#allocation2 + $0x4] sm:$0xf] %vm1252_vm8, %v1251_v18 }
 0x2f4   : > { %1292 = vst.msk [vmem:[#allocation3 + $0x4] sm:$0xf] %vm1252_vm8, %v1290_v19 }
 0x2f5 PF: > { %s4665_s26 = sld [smem:[#allocation69_spill]]  ;;  %vm1388_vm9 = vcmask 261120   ;;  %v3827_v23 = vmov 32.0   ;;  %vm1473_vm11 = vcmask 64512   ;;  %s3828_s23 = smov 112   ;;  %v1374_v6 = vlaneseq }
 0x2f6   : > { %s4666_s22 = sld [smem:[#allocation44_spill]]  ;;  %3155 = vrcp.f32 %v3827_v23  ;;  %v3831_v13 = vmov -1e+09   ;;  %vm1495_vm0 = vcmask 130048   ;;  %vm1610_vm1 = vcmask 1043456   ;;  %s4681_s1 = scalar_lea.vmem [#allocation31], %s4339_s10 }
 0x2f7   : > { %v1375_v8 = vshrl.u32 %v1374_v6, 7  ;;  %v4404_v11 = vand.u32 127, %v1374_v6  ;;  %s2395_s3 = sshll.u32 %s4681_s1, 4  ;;  %p4684_p3 = scmp.ne.s32.totalorder %s4651_s16, 0  ;;  %s2396_s3 = int_to_ptr.vmem [resolvable:$true] %s2395_s3 }
 0x2fa   : > { %v2844_v37 = vld [vmem:[#allocation2] sm:$0xff] }
 0x2fb   : > { %s2722_s14 = sshll.u32 %s4665_s26, 3  ;;  %v2840_v38 = vld [vmem:[#allocation2] sm:$0xff]  ;;  %v2843_v5 = vld [vmem:[#allocation3] sm:$0xff] }
 0x2fc   : > { %s1368_s25 = sshra.s32 %s2722_s14, 3  ;;  %s4667_s12 = smov %s4666_s22  ;;  %v3156_v24 = vpop.eup %3155  ;;  %v2839_v35 = vld [vmem:[%s4666_s22 + $0x8] sm:$0xff]  ;;  %v1478_v41 = vsel %vm1473_vm11, %v2840_v38, 0  ;;  %v2842_v56 = vld [vmem:[#allocation2] sm:$0xff]  ;;  %v1376_v9 = vstv %s2722_s14 }
 0x2fd   : > { %s2723_s6 = sshll.u32 %s1368_s25, 2  ;;  %v1393_v25 = vmul.f32 32.0, %v3156_v24  ;;  %vm1397_vm10 = vweird.f32 %v3156_v24  ;;  %1456 = vmatpush.bf16.msra.mxu0 %v2839_v35  ;;  %v2838_v36 = vld [vmem:[%s4667_s12] sm:$0xff]  ;;  %s4669_s25 = sld [smem:[#allocation60_spill]]  ;;  %1487 = vmatpush.bf16.xpose.msra.mxu1 %v1478_v41  ;;  %v1377_v10 = vadd.s32 %v1376_v9, %v1375_v8  ;;  %v2841_v19 = vld [vmem:[#allocation3] sm:$0xff] }
 0x2fe   : > { %s1371_s17 = scalar_lea.vmem %s4343_s8, %s2723_s6  ;;  %s4668_s8 = sld [smem:[#allocation59_spill]]  ;;  %1523 = vmatpush.bf16.msra.mxu2 %v2841_v19  ;;  %v2847_v35 = vld [vmem:[#allocation3] sm:$0xff] }
 0x2ff   : > { %v1372_v20 = vld [vmem:[%s1371_s17] sm:$0xf]  ;;  %v1394_v26 = vsub.f32 1.0, %v1393_v25  ;;  %s4670_s6 = sld [smem:[#allocation47_spill]]  ;;  %s3829_s17 = smov 120   ;;  %vm1380_vm15 = vcmp.le.s32.totalorder %v4404_v11, %v1377_v10 }
 0x300   : > { %v4374_v21 = vunpack.c.l.bf16 %v1372_v20  ;;  %1546 = vrot.lane.b32.xlu2 %v2842_v56, %s3829_s17  ;;  %s3830_s22 = smov 104   ;;  %v4408_v14 = vsel %vm1380_vm15, 0.0, %v3831_v13  ;;  %s4671_s14 = sld [smem:[#allocation50_spill]] }
 0x301   : > { %v1395_v27 = vmul.f32 %v3156_v24, %v1394_v26  ;;  %1457 = vmatpush.bf16.msra.mxu0 %v2838_v36 }
 0x302   : > { %v1389_v22 = vsel %vm1388_vm9, %v4374_v21, 0.0 }
 0x303   : > { %1390 = vadd.xlane.f32.xlu0 %v1389_v22  ;;  %v1396_v28 = vadd.f32 %v3156_v24, %v1395_v27  ;;  %v3144_v52 = vld [vmem:[%s4669_s25] ss:$0 sm:$0xff]  ;;  %s4673_s25 = sld [smem:[#allocation70_spill]] }
 0x304   : > { %v3143_v49 = vld [vmem:[%s4668_s8] ss:$0 sm:$0xff]  ;;  %s4672_s8 = sld [smem:[#allocation61_spill]] }
 0x305   : > { %v4378_v29 = vsel %vm1397_vm10, %v3156_v24, %v1396_v28  ;;  %v3145_v57 = vld [vmem:[%s4670_s6] ss:$0 sm:$0xff]  ;;  %vm2356_vm10 = vcmask 523264  }
 0x309   : > { %s1382_s6 = sld [smem:[#allocation7 + %s4673_s25]] }
 0x35a   : > { %v1547_v0 = vpop.permute.xlu2 %1546 }
 0x35b   : > { %v1552_v1 = vsel %vm1473_vm11, %v1547_v0, 0  ;;  %v1606_v0 = vld [vmem:[#allocation13 + $0x4] sm:$0xf] }
 0x35c   : > { %1561 = vmatpush.bf16.xpose.msra.mxu3 %v1552_v1  ;;  %v1612_v1 = vsel %vm1610_vm1, %v1606_v0, 0 }
 0x35d   : > { %1621 = vmatpush.bf16.msrb.mxu0 %v1612_v1 }
 0x376   : > { %v1391_v30 = vpop.xlane.xlu0 %1390 }
 0x377   : > { %v1399_v31 = vmul.f32 %v4378_v29, %v1391_v30 }
 0x379   : > { %v1400_v32 = vsub.f32 %v4374_v21, %v1399_v31 }
 0x37b   : > { %v1401_v33 = vmul.f32 %v1400_v32, %v1400_v32 }
 0x37d   : > { %v1402_v34 = vsel %vm1388_vm9, %v1401_v33, 0.0 }
 0x37e   : > { %1403 = vadd.xlane.f32.xlu0 %v1402_v34 }
 0x392   : > { %1657 = vrot.lane.b32.xlu0 %v2844_v37, %s3828_s23 }
 0x39a   : > { %1585 = vrot.lane.b32.xlu0 %v2843_v5, %s3829_s17 }
 0x3f1   : > { %v1404_v39 = vpop.xlane.xlu0 %1403 }
 0x3f2   : > { %v1405_v40 = vmul.f32 %v1404_v39, %v4378_v29  ;;  %v2846_v39 = vld [vmem:[#allocation2] sm:$0xff] }
 0x3f4   : > { %v1406_v42 = vadd.f32 1e-06, %v1405_v40 }
 0x3f6   : > { %3157 = vrsqrt.f32 %v1406_v42  ;;  %vm1413_vm13 = vweird.f32 %v1406_v42 }
 0x3fc   : > { %v3158_v43 = vpop.eup %3157 }
 0x3fd   : > { %v1408_v44 = vmul.f32 %v3158_v43, %v1406_v42  ;;  %vm1414_vm12 = vweird.f32 %v3158_v43 }
 0x3fe   : > { %vm1415_vm14 = vmor %vm1413_vm13, %vm1414_vm12 }
 0x3ff   : > { %v1409_v45 = vmul.f32 %v3158_v43, %v1408_v44 }
 0x401   : > { %v1410_v46 = vmul.f32 0.5, %v1409_v45 }
 0x403   : > { %v1411_v47 = vsub.f32 1.5, %v1410_v46 }
 0x404   : > { %v1658_v2 = vpop.permute.xlu0 %1657 }
 0x405   : > { %v1412_v48 = vmul.f32 %v3158_v43, %v1411_v47  ;;  %v1663_v3 = vsel %vm1473_vm11, %v1658_v2, 0 }
 0x406   : > { %1672 = vmatpush.bf16.xpose.msrb.mxu3 %v1663_v3 }
 0x407   : > { %v1416_v50 = vsel %vm1415_vm14, %v3158_v43, %v1412_v48  ;;  %v1531_v48 = vld [vmem:[#allocation13] sm:$0xf] }
 0x408   : > { %v1417_v51 = vmul.f32 %v1416_v50, %v1400_v32 }
 0x40a   : > { %v1421_v53 = vmul.f32 %v3143_v49, %v1417_v51  ;;  %v1631_v49 = vsel %vm1610_vm1, %v1531_v48, 0 }
 0x40b   : > { %1640 = vmatpush.bf16.msrb.mxu1 %v1631_v49 }
 0x40c   : > { %v1425_v54 = vadd.f32 %v3144_v52, %v1421_v53  ;;  %v1586_v40 = vpop.permute.xlu0 %1585 }
 0x40d   : > { %1598 = vmatpush.bf16.msrb.mxu2 %v1586_v40 }
 0x40e   : > { %v1426_v55 = vpack.c.bf16 %v1425_v54, %v1425_v54 }
 0x410   : > { %2732 = vmatmul.msk.bf16.vlgmr.msra.gmra.mxu0 %vm1388_vm9, %v1426_v55 }
 0x48d   : > { %v1459_v58 = vpop.f32.mrf.mxu0 }
 0x48e   : > { %v1460_v59 = vadd.f32 %v3145_v57, %v1459_v58 }
 0x490   : > { %v1463_v60 = vpack.c.bf16 %v1460_v59, %v1460_v59 }
 0x492   : > { %v1537_v61 = vunpack.c.l.b16 %v1463_v60  ;;  %2737 = vmatmul.msk.bf16.vlgmr.msra.gmra.mxu1 %vm1473_vm11, %v1463_v60 }
 0x494   : > { %v1538_v62 = vpack.c.b16 %v1537_v61, %v1537_v61 }
 0x495   : > { %v1461_v63 = vpop.f32.mrf.mxu0 }
 0x496   : > { %1539 = vrot.lane.b32.xlu2 %v1538_v62, %s3829_s17 }
 0x49e   : > { %1650 = vrot.lane.b32.xlu2 %v1538_v62, %s3828_s23 }
 0x4a6   : > { %1742 = vrot.lane.b32.xlu2 %v1538_v62, %s3830_s22 }
 0x4f0   : > { %v1540_v4 = vpop.permute.xlu2 %1539 }
 0x4f1   : > { %2747 = vmatmul.msk.bf16.vlgmr.msra.gmra.mxu3 %vm1473_vm11, %v1540_v4 }
 0x4f8   : > { %v1651_v7 = vpop.permute.xlu2 %1650 }
 0x500   : > { %v1743_v41 = vpop.permute.xlu2 %1742 }
 0x501   : > { %2759 = vmatmul.msk.bf16.vlgmr.msrb.gmra.mxu3 %vm1473_vm11, %v1651_v7 }
 0x50f   : > { %v1489_v12 = vpop.f32.mrf.mxu1 }
 0x510   : > { %v1493_v15 = vmul.f32 0.35355338, %v1489_v12 }
 0x512   : > { %v1494_v16 = vadd.f32 %v1493_v15, %v4408_v14 }
 0x514   : > { %v1496_v17 = vsel %vm1495_vm0, %v1494_v16, -inf }
 0x515   : > { %1497 = vmax.xlane.f32.xlu1 %v1496_v17 }
 0x517   : > { %v1491_v18 = vpop.f32.mrf.mxu1 }
 0x518   : > { %v2845_v18 = vld [vmem:[#allocation3] sm:$0xff] }
 0x574   : > { %v1563_v20 = vpop.f32.mrf.mxu3 }
 0x575   : > { %v1567_v22 = vmul.f32 0.35355338, %v1563_v20 }
 0x577   : > { %v1568_v23 = vadd.f32 %v1567_v22, %v4408_v14 }
 0x579   : > { %v1569_v24 = vsel %vm1495_vm0, %v1568_v23, -inf }
 0x57a   : > { %1570 = vmax.xlane.f32.xlu2 %v1569_v24 }
 0x57c   : > { %v1565_v25 = vpop.f32.mrf.mxu3 }
 0x584   : > { %v1674_v26 = vpop.f32.mrf.mxu3 }
 0x585   : > { %v1678_v27 = vmul.f32 0.35355338, %v1674_v26 }
 0x587   : > { %v1679_v28 = vadd.f32 %v1678_v27, %v4408_v14 }
 0x588   : > { %v1498_v30 = vpop.xlane.xlu1 %1497 }
 0x589   : > { %v1499_v31 = vsub.f32 %v1494_v16, %v1498_v30  ;;  %v1680_v32 = vsel %vm1495_vm0, %v1679_v28, -inf  ;;  %v1809_v30 = vld [vmem:[#allocation13 + $0xc] sm:$0xf] }
 0x58a   : > { %1681 = vmax.xlane.f32.xlu0 %v1680_v32  ;;  %v1717_v32 = vld [vmem:[#allocation13 + $0x8] sm:$0xf] }
 0x58b   : > { %v1500_v33 = vmul.f32 1.442695, %v1499_v31  ;;  %v1814_v31 = vsel %vm1610_vm1, %v1809_v30, 0 }
 0x58c   : > { %v1676_v34 = vpop.f32.mrf.mxu3 }
 0x58d   : > { %3159 = vpow2.f32 %v1500_v33  ;;  %v1722_v33 = vsel %vm1610_vm1, %v1717_v32, 0 }
 0x58e   : > { %1731 = vmatpush.bf16.msra.mxu0 %v1722_v33 }
 0x592   : > { %1788 = vrot.lane.b32.xlu2 %v2847_v35, %s3830_s22 }
 0x593   : > { %v3160_v36 = vpop.eup %3159 }
 0x594   : > { %v1502_v37 = vsel %vm1495_vm0, %v3160_v36, 0.0  ;;  %v1506_v38 = vpack.c.bf16 %v3160_v36, %v3160_v36 }
 0x595   : > { %1503 = vadd.xlane.f32.xlu1 %v1502_v37 }
 0x596   : > { %2742 = vmatmul.msk.bf16.vlgmr.msra.gmra.mxu2 %vm1495_vm0, %v1506_v38 }
 0x5ae   : > { %1749 = vrot.lane.b32.xlu1 %v2846_v39, %s3830_s22 }
 0x5ed   : > { %v1571_v42 = vpop.xlane.xlu2 %1570 }
 0x5ee   : > { %v1572_v43 = vsub.f32 %v1568_v23, %v1571_v42 }
 0x5f0   : > { %v1573_v44 = vmul.f32 1.442695, %v1572_v43 }
 0x5f2   : > { %3161 = vpow2.f32 %v1573_v44 }
 0x5f5   : > { %v1789_v63 = vpop.permute.xlu2 %1788 }
 0x5f6   : > { %1801 = vmatpush.bf16.msra.mxu3 %v1789_v63  ;;  %v2848_v63 = vld [vmem:[#allocation14] sm:$0xff] }
 0x5f8   : > { %v3162_v45 = vpop.eup %3161 }
 0x5f9   : > { %v1575_v46 = vsel %vm1495_vm0, %v3162_v45, 0.0  ;;  %v1579_v47 = vpack.c.bf16 %v3162_v45, %v3162_v45 }
 0x5fa   : > { %1576 = vadd.xlane.f32.xlu0 %v1575_v46 }
 0x5fb   : > { %2752 = vmatmul.msk.bf16.vlgmr.msrb.gmra.mxu2 %vm1495_vm0, %v1579_v47 }
 0x5fd   : > { %v1682_v50 = vpop.xlane.xlu0 %1681 }
 0x5fe   : > { %v1683_v51 = vsub.f32 %v1679_v28, %v1682_v50 }
 0x600   : > { %v1684_v52 = vmul.f32 1.442695, %v1683_v51  ;;  %v3146_v51 = vld [vmem:[%s4671_s14] ss:$0 sm:$0xff]  ;;  %s4677_s14 = sld [smem:[#allocation64_spill]] }
 0x602   : > { %3163 = vpow2.f32 %v1684_v52 }
 0x608   : > { %v3164_v53 = vpop.eup %3163  ;;  %v1504_v55 = vpop.xlane.xlu1 %1503 }
 0x609   : > { %v1686_v54 = vsel %vm1495_vm0, %v3164_v53, 0.0  ;;  %3165 = vrcp.f32 %v1504_v55  ;;  %v1690_v28 = vpack.c.bf16 %v3164_v53, %v3164_v53 }
 0x60a   : > { %1687 = vadd.xlane.f32.xlu2 %v1686_v54 }
 0x60f   : > { %v3166_v56 = vpop.eup %3165 }
 0x619   : > { %v1525_v57 = vpop.f32.mrf.mxu2 }
 0x61a   : > { %v1529_v58 = vmul.f32 %v3166_v56, %v1525_v57 }
 0x61c   : > { %v1530_v59 = vpack.c.bf16 %v1529_v58, %v1529_v58 }
 0x61e   : > { %2754 = vmatmul.msk.bf16.vlgmr.msrb.gmra.mxu1 %vm1473_vm11, %v1530_v59 }
 0x620   : > { %v1750_v60 = vpop.permute.xlu1 %1749 }
 0x621   : > { %v1527_v61 = vpop.f32.mrf.mxu2  ;;  %v1755_v62 = vsel %vm1473_vm11, %v1750_v60, 0 }
 0x622   : > { %1764 = vmatpush.bf16.xpose.msra.mxu1 %v1755_v62  ;;  %v2849_v62 = vld [vmem:[#allocation14 + $0x8] sm:$0xff] }
 0x62e   : > { %2770 = vmatmul.msk.bf16.vlgmr.msra.gmra.mxu1 %vm1473_vm11, %v1743_v41 }
 0x66d   : > { %v1577_v2 = vpop.xlane.xlu0 %1576 }
 0x66e   : > { %3167 = vrcp.f32 %v1577_v2 }
 0x674   : > { %v3168_v3 = vpop.eup %3167 }
 0x67d   : > { %v1688_v39 = vpop.xlane.xlu2 %1687 }
 0x67e   : > { %v1600_v4 = vpop.f32.mrf.mxu2 }
 0x67f   : > { %v1604_v5 = vmul.f32 %v3168_v3, %v1600_v4 }
 0x681   : > { %v1605_v6 = vpack.c.bf16 %v1604_v5, %v1604_v5 }
 0x683   : > { %2753 = vmatmul.msk.bf16.vlgmr.msrb.gmra.mxu0 %vm1473_vm11, %v1605_v6 }
 0x684   : > { %1898 = vmatpush.bf16.msrb.mxu0 %v2849_v62 }
 0x686   : > { %v1602_v7 = vpop.f32.mrf.mxu2 }
 0x688   : > { %1899 = vmatpush.bf16.msrb.mxu0 %v2848_v63 }
 0x69b   : > { %v1642_v8 = vpop.f32.mrf.mxu1 }
 0x6a3   : > { %v1644_v9 = vpop.f32.mrf.mxu1 }
 0x6ab   : > { %v1766_v10 = vpop.f32.mrf.mxu1 }
 0x6ac   : > { %v1770_v12 = vmul.f32 0.35355338, %v1766_v10  ;;  %v3147_v10 = vld [vmem:[%s4672_s8] ss:$0 sm:$0xff]  ;;  %s4678_s8 = sld [smem:[#allocation65_spill]] }
 0x6ae   : > { %v1771_v15 = vadd.f32 %v1770_v12, %v4408_v14 }
 0x6b0   : > { %v1772_v16 = vsel %vm1495_vm0, %v1771_v15, -inf }
 0x6b1   : > { %1773 = vmax.xlane.f32.xlu1 %v1772_v16  ;;  %v3148_v16 = vld [vmem:[#allocation29] ss:$0 sm:$0xff] }
 0x6b3   : > { %v1768_v17 = vpop.f32.mrf.mxu1 }
 0x6ca   : > { %1696 = vrot.lane.b32.xlu1 %v2845_v18, %s3828_s23 }
 0x700   : > { %v1623_v19 = vpop.f32.mrf.mxu0 }
 0x701   : > { %v1643_v47 = vadd.f32 %v1642_v8, %v1623_v19 }
 0x708   : > { %v1625_v20 = vpop.f32.mrf.mxu0 }
 0x709   : > { %v3149_v20 = vld [vmem:[#allocation20] ss:$0 sm:$0xff] }
 0x724   : > { %v1774_v22 = vpop.xlane.xlu1 %1773 }
 0x725   : > { %v1775_v23 = vsub.f32 %v1771_v15, %v1774_v22 }
 0x727   : > { %v1776_v24 = vmul.f32 1.442695, %v1775_v23 }
 0x729   : > { %3169 = vpow2.f32 %v1776_v24 }
 0x72f   : > { %v3170_v25 = vpop.eup %3169 }
 0x730   : > { %v1782_v26 = vpack.c.bf16 %v3170_v25, %v3170_v25  ;;  %v1778_v27 = vsel %vm1495_vm0, %v3170_v25, 0.0 }
 0x731   : > { %1779 = vadd.xlane.f32.xlu0 %v1778_v27 }
 0x732   : > { %2775 = vmatmul.msk.bf16.vlgmr.msra.gmra.mxu3 %vm1495_vm0, %v1782_v26 }
 0x73c   : > { %v1697_v14 = vpop.permute.xlu1 %1696 }
 0x73d   : > { %1709 = vmatpush.bf16.msra.mxu2 %v1697_v14  ;;  %v1383_v14 = vstv %s1382_s6  ;;  %s4679_s6 = sld [smem:[#allocation58_spill]] }
 0x73e   : > { %vm1384_vm5 = vcmp.lt.s32.totalorder %v4404_v11, %v1383_v14  ;;  %v1907_v11 = vld [vmem:[#allocation5] sm:$0xf] }
 0x73f   : > { %v4457_v30 = vsel %vm1384_vm5, 0.0, %v3831_v13  ;;  %v1944_v13 = vsel %vm1610_vm1, %v1907_v11, 0 }
 0x740   : > { %2764 = vmatmul.msk.bf16.vlgmr.msra.gmra.mxu2 %vm1495_vm0, %v1690_v28  ;;  %1953 = vmatpush.bf16.msrb.mxu3 %v1944_v13  ;;  %v2032_v13 = vld [vmem:[#allocation19 + $0x4] sm:$0xf] }
 0x741   : > { %1823 = vmatpush.bf16.msrb.mxu2 %v1814_v31 }
 0x7a4   : > { %v1780_v34 = vpop.xlane.xlu0 %1779 }
 0x7a5   : > { %3171 = vrcp.f32 %v1780_v34 }
 0x7a6   : > { %3173 = vrcp.f32 %v1688_v39 }
 0x7ab   : > { %v3172_v35 = vpop.eup %3171 }
 0x7ac   : > { %v3174_v41 = vpop.eup %3173 }
 0x7b5   : > { %v1803_v36 = vpop.f32.mrf.mxu3 }
 0x7b6   : > { %v1807_v37 = vmul.f32 %v3172_v35, %v1803_v36  ;;  %v1962_v35 = vld [vmem:[#allocation4] sm:$0xf] }
 0x7b7   : > { %v1970_v36 = vunpack.c.l.b16 %v1962_v35 }
 0x7b8   : > { %v1808_v38 = vpack.c.bf16 %v1807_v37, %v1807_v37 }
 0x7b9   : > { %v1971_v37 = vpack.c.b16 %v1970_v36, %v1970_v36 }
 0x7ba   : > { %2776 = vmatmul.msk.bf16.vlgmr.msrb.gmra.mxu2 %vm1473_vm11, %v1808_v38  ;;  %v2159_v38 = vld [vmem:[#allocation4] sm:$0xf] }
 0x7bb   : > { %v2164_v39 = vunpack.c.l.b16 %v2159_v38 }
 0x7bd   : > { %v1805_v40 = vpop.f32.mrf.mxu3 }
 0x7be   : > { %v2165_v40 = vpack.c.b16 %v2164_v39, %v2164_v39  ;;  %v2072_v39 = vld [vmem:[#allocation5] sm:$0xf] }
 0x7c3   : > { %v1711_v42 = vpop.f32.mrf.mxu2 }
 0x7c4   : > { %v1715_v43 = vmul.f32 %v3174_v41, %v1711_v42  ;;  %v2071_v41 = vld [vmem:[#allocation4] sm:$0xf] }
 0x7c5   : > { %v2076_v42 = vunpack.c.l.b16 %v2071_v41  ;;  %v2037_v41 = vsel %vm1610_vm1, %v2032_v13, 0 }
 0x7c6   : > { %v1716_v44 = vpack.c.bf16 %v1715_v43, %v1715_v43 }
 0x7c7   : > { %v2077_v43 = vpack.c.b16 %v2076_v42, %v2076_v42 }
 0x7c8   : > { %2765 = vmatmul.msk.bf16.vlgmr.msra.gmra.mxu0 %vm1473_vm11, %v1716_v44 }
 0x7cb   : > { %v1713_v45 = vpop.f32.mrf.mxu2 }
 0x83d   : > { %v1825_v46 = vpop.f32.mrf.mxu2 }
 0x845   : > { %v1733_v48 = vpop.f32.mrf.mxu0  ;;  %v1827_v49 = vpop.f32.mrf.mxu2 }
 0x846   : > { %v1737_v50 = vadd.f32 %v1733_v48, %v1643_v47  ;;  %v1961_v47 = vld [vmem:[#allocation19] sm:$0xf] }
 0x847   : > { %v2056_v48 = vsel %vm1610_vm1, %v1961_v47, 0 }
 0x848   : > { %v1829_v52 = vadd.f32 %v1825_v46, %v1737_v50  ;;  %2065 = vmatpush.bf16.msra.mxu3 %v2056_v48 }
 0x84a   : > { %v1834_v53 = vadd.f32 %v3146_v51, %v1829_v52 }
 0x84c   : > { %v4441_v54 = vadd.f32 %v1834_v53, %v4374_v21  ;;  %v1906_v21 = vld [vmem:[#allocation4] sm:$0xf] }
 0x84d   : > { %v1735_v55 = vpop.f32.mrf.mxu0  ;;  %v1912_v1 = vsel %vm1473_vm11, %v1906_v21, 0 }
 0x84e   : > { %v1838_v56 = vsel %vm1388_vm9, %v4441_v54, 0.0  ;;  %1921 = vmatpush.bf16.xpose.msrb.mxu1 %v1912_v1 }
 0x84f   : > { %1839 = vadd.xlane.f32.xlu0 %v1838_v56 }
 0x856   : > { %2046 = vmatpush.bf16.msra.mxu1 %v2037_v41 }
 0x8c2   : > { %v1840_v57 = vpop.xlane.xlu0 %1839 }
 0x8c3   : > { %v1841_v58 = vmul.f32 %v1840_v57, %v4378_v29 }
 0x8c5   : > { %v1842_v59 = vsub.f32 %v4441_v54, %v1841_v58 }
 0x8c7   : > { %v1843_v60 = vmul.f32 %v1842_v59, %v1842_v59 }
 0x8c9   : > { %v1844_v61 = vsel %vm1388_vm9, %v1843_v60, 0.0 }
 0x8ca   : > { %1845 = vadd.xlane.f32.xlu1 %v1844_v61  ;;  %v1963_v61 = vld [vmem:[#allocation5] sm:$0xf] }
 0x8cb   : > { %v2007_v63 = vunpack.c.l.b16 %v1963_v61 }
 0x8cd   : > { %v2008_v21 = vpack.c.b16 %v2007_v63, %v2007_v63 }
 0x8e3   : > { %2078 = vrot.lane.b32.xlu1 %v2077_v43, %s3828_s23 }
 0x93d   : > { %v1846_v0 = vpop.xlane.xlu1 %1845 }
 0x93e   : > { %v1847_v2 = vmul.f32 %v1846_v0, %v4378_v29 }
 0x940   : > { %v1848_v3 = vadd.f32 1e-06, %v1847_v2 }
 0x942   : > { %3175 = vrsqrt.f32 %v1848_v3  ;;  %vm1855_vm3 = vweird.f32 %v1848_v3 }
 0x948   : > { %v3176_v4 = vpop.eup %3175 }
 0x949   : > { %v1850_v5 = vmul.f32 %v3176_v4, %v1848_v3  ;;  %vm1856_vm2 = vweird.f32 %v3176_v4 }
 0x94a   : > { %vm1857_vm4 = vmor %vm1855_vm3, %vm1856_vm2 }
 0x94b   : > { %v1851_v6 = vmul.f32 %v3176_v4, %v1850_v5 }
 0x94d   : > { %v1852_v7 = vmul.f32 0.5, %v1851_v6 }
 0x94f   : > { %v1853_v8 = vsub.f32 1.5, %v1852_v7 }
 0x951   : > { %v1854_v9 = vmul.f32 %v3176_v4, %v1853_v8 }
 0x953   : > { %v1858_v12 = vsel %vm1857_vm4, %v3176_v4, %v1854_v9 }
 0x954   : > { %v1859_v15 = vmul.f32 %v1858_v12, %v1842_v59 }
 0x955   : > { %v2079_v58 = vpop.permute.xlu1 %2078 }
 0x956   : > { %v1863_v17 = vmul.f32 %v3147_v10, %v1859_v15  ;;  %v2084_v59 = vsel %vm1473_vm11, %v2079_v58, 0 }
 0x958   : > { %v1867_v18 = vadd.f32 %v3148_v16, %v1863_v17 }
 0x95a   : > { %v1868_v19 = vpack.c.bf16 %v1867_v18, %v1867_v18 }
 0x95c   : > { %2785 = vmatmul.msk.bf16.vlgmr.msrb.gmra.mxu0 %vm1388_vm9, %v1868_v19 }
 0x9d9   : > { %v1901_v22 = vpop.f32.mrf.mxu0 }
 0x9da   : > { %v1902_v23 = vadd.f32 %v3149_v20, %v1901_v22 }
 0x9dc   : > { %v1905_v24 = vpack.c.bf16 %v1902_v23, %v1902_v23 }
 0x9de   : > { %v1965_v25 = vunpack.c.l.b16 %v1905_v24  ;;  %2786 = vmatmul.msk.bf16.vlgmr.msrb.gmra.mxu1 %vm1473_vm11, %v1905_v24 }
 0x9e0   : > { %v1966_v26 = vpack.c.b16 %v1965_v25, %v1965_v25 }
 0x9e1   : > { %v1903_v27 = vpop.f32.mrf.mxu0 }
 0x9e2   : > { %1967 = vrot.lane.b32.xlu2 %v1966_v26, %s3829_s17 }
 0xa3c   : > { %v1968_v55 = vpop.permute.xlu2 %1967 }
 0xa5b   : > { %v1923_v28 = vpop.f32.mrf.mxu1 }
 0xa5c   : > { %v1927_v31 = vmul.f32 0.35355338, %v1923_v28 }
 0xa5e   : > { %v1928_v32 = vadd.f32 %v1927_v31, %v4457_v30  ;;  %v2160_v31 = vld [vmem:[#allocation5] sm:$0xf] }
 0xa60   : > { %v1929_v33 = vsel %vm1473_vm11, %v1928_v32, -inf }
 0xa61   : > { %1930 = vmax.xlane.f32.xlu0 %v1929_v33  ;;  %v2201_v33 = vunpack.c.l.b16 %v2160_v31 }
 0xa63   : > { %v1925_v34 = vpop.f32.mrf.mxu1  ;;  %v2202_v35 = vpack.c.b16 %v2201_v33, %v2201_v33 }
 0xa75   : > { %1972 = vrot.lane.b32.xlu0 %v1971_v37, %s3829_s17 }
 0xa7d   : > { %2166 = vrot.lane.b32.xlu0 %v2165_v40, %s3830_s22  ;;  %v2113_v40 = vunpack.c.l.b16 %v2072_v39  ;;  %v2850_v39 = vld [vmem:[#allocation26] sm:$0xff] }
 0xa7f   : > { %v2114_v11 = vpack.c.b16 %v2113_v40, %v2113_v40 }
 0xa85   : > { %2161 = vrot.lane.b32.xlu0 %v1966_v26, %s3830_s22 }
 0xad4   : > { %v1931_v44 = vpop.xlane.xlu0 %1930 }
 0xad5   : > { %v1932_v45 = vsub.f32 %v1928_v32, %v1931_v44 }
 0xad7   : > { %v1933_v46 = vmul.f32 1.442695, %v1932_v45 }
 0xad9   : > { %3177 = vpow2.f32 %v1933_v46 }
 0xadf   : > { %v3178_v49 = vpop.eup %3177 }
 0xae0   : > { %v1939_v50 = vpack.c.bf16 %v3178_v49, %v3178_v49  ;;  %v1935_v51 = vsel %vm1473_vm11, %v3178_v49, 0.0 }
 0xae1   : > { %1936 = vadd.xlane.f32.xlu0 %v1935_v51 }
 0xae2   : > { %2787 = vmatmul.msk.bf16.vlgmr.msrb.gmra.mxu3 %vm1473_vm11, %v1939_v50 }
 0xae7   : > { %v1973_v52 = vpop.permute.xlu0 %1972 }
 0xae8   : > { %v1978_v53 = vsel %vm1473_vm11, %v1973_v52, 0 }
 0xae9   : > { %1987 = vmatpush.bf16.xpose.msra.mxu2 %v1978_v53 }
 0xaef   : > { %v2167_v56 = vpop.permute.xlu0 %2166 }
 0xaf0   : > { %v2172_v57 = vsel %vm1473_vm11, %v2167_v56, 0  ;;  %2788 = vmatmul.msk.bf16.vlgmr.msra.gmra.mxu2 %vm1473_vm11, %v1968_v55 }
 0xaf1   : > { %2181 = vmatpush.bf16.xpose.msrb.mxu3 %v2172_v57  ;;  %2093 = vmatpush.bf16.xpose.msrb.mxu2 %v2084_v59 }
 0xaf5   : > { %2073 = vrot.lane.b32.xlu0 %v1966_v26, %s3828_s23 }
 0xaf7   : > { %v2162_v60 = vpop.permute.xlu0 %2161 }
 0xafd   : > { %2009 = vrot.lane.b32.xlu0 %v2008_v21, %s3829_s17  ;;  %v2226_v21 = vld [vmem:[#allocation19 + $0xc] sm:$0xf] }
 0xb54   : > { %v1937_v62 = vpop.xlane.xlu0 %1936 }
 0xb55   : > { %3179 = vrcp.f32 %v1937_v62 }
 0xb5b   : > { %v3180_v0 = vpop.eup %3179 }
 0xb65   : > { %v1955_v1 = vpop.f32.mrf.mxu3 }
 0xb66   : > { %v1959_v2 = vmul.f32 %v3180_v0, %v1955_v1  ;;  %v2231_v0 = vsel %vm1610_vm1, %v2226_v21, 0  ;;  %v2138_v1 = vld [vmem:[#allocation19 + $0x8] sm:$0xf] }
 0xb67   : > { %v2074_v3 = vpop.permute.xlu0 %2073 }
 0xb68   : > { %v1960_v4 = vpack.c.bf16 %v1959_v2, %v1959_v2  ;;  %2792 = vmatmul.msk.bf16.vlgmr.msrb.gmra.mxu2 %vm1473_vm11, %v2074_v3  ;;  %v2143_v2 = vsel %vm1610_vm1, %v2138_v1, 0 }
 0xb69   : > { %2152 = vmatpush.bf16.msrb.mxu1 %v2143_v2 }
 0xb6a   : > { %2791 = vmatmul.msk.bf16.vlgmr.msra.gmra.mxu3 %vm1473_vm11, %v1960_v4 }
 0xb6d   : > { %v1957_v5 = vpop.f32.mrf.mxu3 }
 0xb6f   : > { %v2010_v12 = vpop.permute.xlu0 %2009 }
 0xb70   : > { %v2015_v15 = vsel %vm1610_vm1, %v2010_v12, 0 }
 0xb71   : > { %2024 = vmatpush.bf16.msra.mxu0 %v2015_v15 }
 0xb73   : > { %v1989_v6 = vpop.f32.mrf.mxu2 }
 0xb74   : > { %v1993_v7 = vmul.f32 0.35355338, %v1989_v6 }
 0xb76   : > { %v1994_v8 = vadd.f32 %v1993_v7, %v4457_v30 }
 0xb78   : > { %v1995_v9 = vsel %vm1473_vm11, %v1994_v8, -inf }
 0xb79   : > { %1996 = vmax.xlane.f32.xlu2 %v1995_v9 }
 0xb7a   : > { %2795 = vmatmul.msk.bf16.vlgmr.msrb.gmra.mxu3 %vm1473_vm11, %v2162_v60 }
 0xb7b   : > { %v1991_v10 = vpop.f32.mrf.mxu2 }
 0xb91   : > { %2203 = vrot.lane.b32.xlu2 %v2202_v35, %s3830_s22  ;;  %s4676_s22 = sld [smem:[#allocation63_spill]] }
 0xbeb   : > { %v2095_v16 = vpop.f32.mrf.mxu2 }
 0xbec   : > { %v2099_v17 = vmul.f32 0.35355338, %v2095_v16  ;;  %v1997_v18 = vpop.xlane.xlu2 %1996 }
 0xbed   : > { %v1998_v19 = vsub.f32 %v1994_v8, %v1997_v18  ;;  %v4481_v20 = vpop.f32.mrf.mxu3 }
 0xbee   : > { %v2100_v22 = vadd.f32 %v2099_v17, %v4457_v30 }
 0xbef   : > { %v1999_v23 = vmul.f32 1.442695, %v1998_v19 }
 0xbf0   : > { %v2101_v24 = vsel %vm1473_vm11, %v2100_v22, -inf }
 0xbf1   : > { %3181 = vpow2.f32 %v1999_v23  ;;  %2102 = vmax.xlane.f32.xlu0 %v2101_v24 }
 0xbf3   : > { %v2097_v25 = vpop.f32.mrf.mxu2 }
 0xbf4   : > { %v2204_v42 = vpop.permute.xlu2 %2203 }
 0xbf5   : > { %v2069_v26 = vpop.f32.mrf.mxu3  ;;  %v2209_v43 = vsel %vm1610_vm1, %v2204_v42, 0 }
 0xbf6   : > { %2218 = vmatpush.bf16.msra.mxu2 %v2209_v43 }
 0xbf7   : > { %v3182_v27 = vpop.eup %3181 }
 0xbf8   : > { %v2005_v14 = vpack.c.bf16 %v3182_v27, %v3182_v27  ;;  %v2001_v28 = vsel %vm1473_vm11, %v3182_v27, 0.0  ;;  %v3150_v27 = vld [vmem:[#allocation25] ss:$0 sm:$0xff] }
 0xbf9   : > { %2002 = vadd.xlane.f32.xlu0 %v2001_v28 }
 0xbfa   : > { %2789 = vmatmul.msk.bf16.vlgmr.msra.gmra.mxu0 %vm1473_vm11, %v2005_v14 }
 0xbfd   : > { %v2183_v32 = vpop.f32.mrf.mxu3 }
 0xbfe   : > { %v2187_v34 = vmul.f32 0.35355338, %v2183_v32 }
 0xc00   : > { %v2188_v36 = vadd.f32 %v2187_v34, %v4457_v30 }
 0xc02   : > { %v2189_v37 = vsel %vm1473_vm11, %v2188_v36, -inf }
 0xc03   : > { %2190 = vmax.xlane.f32.xlu1 %v2189_v37 }
 0xc05   : > { %v2185_v38 = vpop.f32.mrf.mxu3 }
 0xc06   : > { %v2851_v38 = vld [vmem:[#allocation26 + $0x8] sm:$0xff] }
 0xc1c   : > { %2115 = vrot.lane.b32.xlu1 %v2114_v11, %s3828_s23  ;;  %s4674_s23 = sld [smem:[#allocation57_spill]] }
 0xc22   : > { %s4675_s17 = smov %s4674_s23  ;;  %v2855_v40 = vld [vmem:[%s4674_s23 + $0x18] sm:$0xff]  ;;  %s4680_s23 = sld [smem:[#allocation67_spill]] }
 0xc23   : > { %2364 = vmatpush.bf16.msra.mxu3 %v2855_v40  ;;  %v2854_v13 = vld [vmem:[%s4675_s17 + $0x10] sm:$0xff] }
 0xc27   : > { %2365 = vmatpush.bf16.msra.mxu3 %v2854_v13 }
 0xc28   : > { %s4683_s19 = sand.u32 1, %s4680_s23  }
 0xc64   : > { %v2103_v30 = vpop.xlane.xlu0 %2102 }
 0xc65   : > { %v2104_v44 = vsub.f32 %v2100_v22, %v2103_v30 }
 0xc67   : > { %v2105_v45 = vmul.f32 1.442695, %v2104_v44 }
 0xc69   : > { %3183 = vpow2.f32 %v2105_v45 }
 0xc6c   : > { %v2003_v46 = vpop.xlane.xlu0 %2002 }
 0xc6d   : > { %3185 = vrcp.f32 %v2003_v46 }
 0xc6f   : > { %v3184_v47 = vpop.eup %3183 }
 0xc70   : > { %v2107_v48 = vsel %vm1473_vm11, %v3184_v47, 0.0  ;;  %v2111_v63 = vpack.c.bf16 %v3184_v47, %v3184_v47  ;;  %v3151_v47 = vld [vmem:[%s4676_s22] ss:$0 sm:$0xff]  ;;  %s2825_s22 = sshll.u32 %s4673_s25, 1  ;;  %s2381_s25 = scalar_lea.sflag [#allocation10], %s4683_s19 }
 0xc71   : > { %2108 = vadd.xlane.f32.xlu2 %v2107_v48 }
 0xc73   : > { %v3186_v50 = vpop.eup %3185 }
 0xc76   : > { %v2191_v49 = vpop.xlane.xlu1 %2190 }
 0xc77   : > { %v2192_v51 = vsub.f32 %v2188_v36, %v2191_v49  ;;  %v2026_v52 = vpop.f32.mrf.mxu0  ;;  %v3152_v49 = vld [vmem:[%s4677_s14] ss:$0 sm:$0xff]  ;;  %s2391_s14 = sadd.s32 %s4665_s26, %s2825_s22 }
 0xc78   : > { %v2030_v53 = vmul.f32 %v3186_v50, %v2026_v52  ;;  %s2826_s21 = sshll.u32 %s2391_s14, 3 }
 0xc79   : > { %v2193_v55 = vmul.f32 1.442695, %v2192_v51  ;;  %s2393_s13 = scalar_lea.hbm %s4678_s8, %s2826_s21  ;;  %s3647_s21 = scalar_lea.hbm %s4678_s8, 32 }
 0xc7a   : > { %v2031_v56 = vpack.c.bf16 %v2030_v53, %v2030_v53  ;;  %v2853_v53 = vld [vmem:[%s4675_s17 + $0x8] sm:$0xff]  ;;  %s2397_s12 = sshll.u32 %s2393_s13, 4  ;;  %s2398_s12 = int_to_ptr.hbm [resolvable:$true] %s2397_s12 }
 0xc7b   : > { %3187 = vpow2.f32 %v2193_v55  ;;  %2366 = vmatpush.bf16.msra.mxu3 %v2853_v53  ;;  %v2852_v55 = vld [vmem:[%s4675_s17] sm:$0xff]  ;;  %s4682_s17 = smov %s4681_s1  ;;  %s3641_s26 = sshra.s32 %s2398_s12, 4  ;;  %s3642_s26 = int_to_ptr.hbm [resolvable:$true] %s3641_s26 }
 0xc7c   : > { %2790 = vmatmul.msk.bf16.vlgmr.msra.gmra.mxu1 %vm1473_vm11, %v2031_v56  ;;  %v3153_v56 = vld [vmem:[#allocation28] ss:$0 sm:$0xff]  ;;  %s3643_s22 = scalar_lea.hbm %s3642_s26, 8  ;;  %p3648_p10 = scmp.lt.s32.totalorder %s3642_s26, %s4678_s8 }
 0xc7d   : > { %2315 = vmatpush.bf16.msra.mxu1 %v2851_v38  ;;  %p3644_p6 = scmp.ne.s32.totalorder %s3642_s26, %s3643_s22  ;;  %p3649_p2 = scmp.lt.s32.totalorder %s3647_s21, %s3643_s22 }
 0xc7f   : > { %v2028_v57 = vpop.f32.mrf.mxu0  ;;  %2367 = vmatpush.bf16.msra.mxu3 %v2852_v55  ;;  %p3645_p12 = pnand %p3644_p6, %p4684_p3  ;;  %p3650_p4 = por %p3649_p2, %p3648_p10 }
 0xc81   : > { %v3188_v58 = vpop.eup %3187  ;;  %2316 = vmatpush.bf16.msra.mxu1 %v2850_v39  ;;  %p3646_p0 = pneg %p3645_p12 }
 0xc82   : > { %v2199_v59 = vpack.c.bf16 %v3188_v58, %v3188_v58  ;;  %v2195_v60 = vsel %vm1473_vm11, %v3188_v58, 0.0 }
 0xc83   : > { %2196 = vadd.xlane.f32.xlu0 %v2195_v60  ;;  %p3651_p5 = pnand %p3650_p4, %p3646_p0 }
 0xc84   : > { %2796 = vmatmul.msk.bf16.vlgmr.msra.gmra.mxu2 %vm1473_vm11, %v2199_v59 }
 0xc8e   : > { %v2116_v61 = vpop.permute.xlu1 %2115 }
 0xc8f   : > { %v2121_v62 = vsel %vm1610_vm1, %v2116_v61, 0 }
 0xc90   : > { %2130 = vmatpush.bf16.msrb.mxu0 %v2121_v62  ;;  %v3154_v62 = vld [vmem:[%s4679_s6] ss:$0 sm:$0xff] }
 0xc93   : > { %2793 = vmatmul.msk.bf16.vlgmr.msrb.gmra.mxu0 %vm1473_vm11, %v2111_v63 }
 0xc94   : > { %2240 = vmatpush.bf16.msra.mxu0 %v2231_v0 }
 0xce4   : > { %v2109_v7 = vpop.xlane.xlu2 %2108 }
 0xcf6   : > { %v2197_v4 = vpop.xlane.xlu0 %2196 }
 0xcf7   : > { %3189 = vrcp.f32 %v2197_v4 }
 0xcf8   : > { %3191 = vrcp.f32 %v2109_v7 }
 0xcf9   : > { %v2048_v3 = vpop.f32.mrf.mxu1 }
 0xcfa   : > { %v2068_v23 = vadd.f32 %v4481_v20, %v2048_v3 }
 0xcfd   : > { %v3190_v6 = vpop.eup %3189 }
 0xcfe   : > { %v3192_v15 = vpop.eup %3191 }
 0xd01   : > { %v2050_v5 = vpop.f32.mrf.mxu1 }
 0xd07   : > { %v2220_v8 = vpop.f32.mrf.mxu2 }
 0xd08   : > { %v2224_v9 = vmul.f32 %v3190_v6, %v2220_v8 }
 0xd0a   : > { %v2225_v10 = vpack.c.bf16 %v2224_v9, %v2224_v9 }
 0xd0c   : > { %2797 = vmatmul.msk.bf16.vlgmr.msra.gmra.mxu0 %vm1473_vm11, %v2225_v10 }
 0xd0f   : > { %v2222_v12 = vpop.f32.mrf.mxu2 }
 0xd10   : > { %v2132_v16 = vpop.f32.mrf.mxu0 }
 0xd11   : > { %v2136_v17 = vmul.f32 %v3192_v15, %v2132_v16 }
 0xd13   : > { %v2137_v18 = vpack.c.bf16 %v2136_v17, %v2136_v17 }
 0xd15   : > { %2794 = vmatmul.msk.bf16.vlgmr.msrb.gmra.mxu1 %vm1473_vm11, %v2137_v18 }
 0xd18   : > { %v2134_v19 = vpop.f32.mrf.mxu0 }
 0xd89   : > { %v2242_v22 = vpop.f32.mrf.mxu0 }
 0xd91   : > { %v2244_v24 = vpop.f32.mrf.mxu0 }
 0xd92   : > { %v2154_v25 = vpop.f32.mrf.mxu1 }
 0xd93   : > { %v2158_v26 = vadd.f32 %v2154_v25, %v2068_v23 }
 0xd95   : > { %v2246_v14 = vadd.f32 %v2242_v22, %v2158_v26 }
 0xd97   : > { %v2251_v28 = vadd.f32 %v3150_v27, %v2246_v14 }
 0xd99   : > { %v2252_v31 = vadd.f32 %v2251_v28, %v4441_v54 }
 0xd9a   : > { %v2156_v32 = vpop.f32.mrf.mxu1 }
 0xd9b   : > { %v2255_v33 = vsel %vm1388_vm9, %v2252_v31, 0.0 }
 0xd9c   : > { %2256 = vadd.xlane.f32.xlu0 %v2255_v33 }
 0xe0f   : > { %v2257_v34 = vpop.xlane.xlu0 %2256 }
 0xe10   : > { %v2258_v35 = vmul.f32 %v2257_v34, %v4378_v29 }
 0xe12   : > { %v2259_v36 = vsub.f32 %v2252_v31, %v2258_v35 }
 0xe14   : > { %v2260_v37 = vmul.f32 %v2259_v36, %v2259_v36 }
 0xe16   : > { %v2261_v20 = vsel %vm1388_vm9, %v2260_v37, 0.0 }
 0xe17   : > { %2262 = vadd.xlane.f32.xlu1 %v2261_v20 }
 0xe8a   : > { %v2263_v54 = vpop.xlane.xlu1 %2262 }
 0xe8b   : > { %v2264_v11 = vmul.f32 %v2263_v54, %v4378_v29 }
 0xe8d   : > { %v2265_v41 = vadd.f32 1e-06, %v2264_v11 }
 0xe8f   : > { %3193 = vrsqrt.f32 %v2265_v41  ;;  %vm2272_vm7 = vweird.f32 %v2265_v41 }
 0xe95   : > { %v3194_v42 = vpop.eup %3193 }
 0xe96   : > { %v2267_v43 = vmul.f32 %v3194_v42, %v2265_v41  ;;  %vm2273_vm6 = vweird.f32 %v3194_v42 }
 0xe97   : > { %vm2274_vm8 = vmor %vm2272_vm7, %vm2273_vm6 }
 0xe98   : > { %v2268_v30 = vmul.f32 %v3194_v42, %v2267_v43 }
 0xe9a   : > { %v2269_v44 = vmul.f32 0.5, %v2268_v30 }
 0xe9c   : > { %v2270_v45 = vsub.f32 1.5, %v2269_v44 }
 0xe9e   : > { %v2271_v46 = vmul.f32 %v3194_v42, %v2270_v45 }
 0xea0   : > { %v2275_v48 = vsel %vm2274_vm8, %v3194_v42, %v2271_v46 }
 0xea1   : > { %v2276_v29 = vmul.f32 %v2275_v48, %v2259_v36 }
 0xea3   : > { %v2280_v50 = vmul.f32 %v3151_v47, %v2276_v29 }
 0xea5   : > { %v2284_v51 = vadd.f32 %v3152_v49, %v2280_v50 }
 0xea7   : > { %v2285_v52 = vpack.c.bf16 %v2284_v51, %v2284_v51 }
 0xea9   : > { %2806 = vmatmul.msk.bf16.vlgmr.msra.gmra.mxu1 %vm1388_vm9, %v2285_v52 }
 0xf26   : > { %v2318_v57 = vpop.f32.mrf.mxu1 }
 0xf27   : > { %v2319_v58 = vadd.f32 %v3153_v56, %v2318_v57 }
 0xf29   : > { %v2322_v59 = vmax.f32 %v2319_v58, 0.0 }
 0xf2b   : > { %v2323_v60 = vpack.c.bf16 %v2322_v59, %v2322_v59 }
 0xf2d   : > { %2823 = vmatmul.msk.bf16.vlgmr.msra.gmra.mxu3 %vm2356_vm10, %v2323_v60 }
 0xf2e   : > { %v2320_v61 = vpop.f32.mrf.mxu1 }
 0xfb0   : > { %v2369_v63 = vpop.f32.mrf.mxu3 }
 0xfb1   : > { %v2373_v21 = vadd.f32 %v2369_v63, %v2252_v31 }
 0xfb3   : > { %v2378_v0 = vadd.f32 %v3154_v62, %v2373_v21 }
 0xfb5   : > { %2379 = vst.msk [vmem:[%s4682_s17] sm:$0xff] %vm1388_vm9, %v2378_v0 }
 0xfb6   : > { %3654 = shalt.err (!%p3651_p5)
}
 0xfb7   : > { %2914 = dma.vmem_to_hbm [thread:$0]  (%p4684_p3), %s2396_s3, 128, %s2398_s12, %s2381_s25  }
 0xfb8   : > { %v2371_v1 = vpop.f32.mrf.mxu3 }
 0xfb9 PF: > { %s4685_s19 = sld [smem:[#allocation66_spill]]  ;;  %p2991_p7 = scmp.ge.s32.totalorder %s3779_s7, 2 }
 0xfba   : > { %p4686_p9 = scmp.ne.s32.totalorder %s4652_s9, 0 }
 0xfbc   : > { %p2961_p11 = pnand %p2991_p7, %p4686_p9 }
 0xfbe   : > { %p2962_p13 = pneg %p2961_p11 }
 0xfbf   : > { %s2409_s1 = sand.u32 1, %s4685_s19  }
 0xfc0   : > { %s2410_s10 = scalar_lea.sflag [#allocation10], %s2409_s1 }
 0xfc1   : > { %3734 = dma.done.wait (%p2962_p13), %s2410_s10, 128  }
 0xfc2   : > { %3736 = vsyncadd (%p2962_p13), %s2410_s10, 4294967168  ;;  %s90_s7 = sadd.s32 1, %s3779_s7   ;;  %s4687_s13 = sld [smem:[#allocation67_spill]] }
 0xfc3   : > { %p87_p8 = scmp.ge.s32.totalorder %s90_s7, 6   ;;  %s4688_s17 = sld [smem:[#allocation68_spill]] }
 0xfc4   : > { %s4689_s16 = smov %s4708_s0  ;;  %s4690_s3 = smov %s4702_s5 }
 0xfc5   : > { %s4693_s23 = smov %s4689_s16  ;;  %s4694_s14 = smov %s3755_s15 }
 0xfc6   : > { %s4695_s15 = smov %s3759_s18  ;;  %s4696_s18 = smov %s4272_s4 }
 0xfc7   : > { %s4697_s22 = smov %s3771_s28  ;;  %s4698_s26 = smov %s3775_s2 }
 0xfc8   : > { %s4691_s0 = smov %s4687_s13  ;;  %s4699_s28 = smov %s4690_s3 }
 0xfc9   : > { %s4692_s5 = smov %s4688_s17  ;;  %s4700_s2 = smov %s4706_s11 }
 0xfca   :  { %89 = sbr.rel (!%p87_p8) target bundleno = 80 (0x50), region = 266 }
 0xfcf   :  { %2416 = vsyncpa [#allocation9], 1 }
 0xfd0   :  { %2418 = vsyncpa [#allocation9 + $0x1], 1 }
 0xfd1   :  { %2419 = vsyncpa [#allocation12], 1 }
 0xfd2   :  { %2420 = vsyncpa [#allocation15], 1 }
 0xfd3   :  { %2421 = vsyncpa [#allocation18], 1 }
 0xfd4   :  { %2422 = vsyncpa [#allocation21], 1 }
 0xfd5   :  { %2423 = vsyncpa [#allocation24], 1 }
 0xfd6   :  { %2424 = vsyncpa [#allocation27], 1 }
 0xfd7   :  { %2425 = vsyncpa [#allocation30], 1 }
 0xfd8   :  { %2426 = vsyncpa [#allocation10], 1 }
 0xfd9   :  { %2428 = vsyncpa [#allocation10 + $0x1], 1 }

</bundles_post_ra>
